<compile_context>
chip_gen: v5e
topology: v5e:2x2
jax: 0.10.0
libtpu: 0.0.40
codegen_flags: <defaults>
</compile_context>

<pallas_src>
import functools

import jax
import jax.numpy as jnp
from jax import lax
from jax.experimental import pallas as pl
from jax.experimental.pallas import tpu as pltpu

KSIZE = 5
EPS = 1e-5

# Sub-pixel (stride-2) decomposition of ConvTranspose2d(k=5, s=2, p=2, op=1).
# Output rows of parity r are a dense conv of the 1-padded compact input with
# taps (d, k): d = row offset into the padded window, k = kernel tap index.
# The same table applies to columns.
TAPS = {
    0: ((0, 4), (1, 2), (2, 0)),   # even outputs
    1: ((1, 3), (2, 1)),           # odd outputs
}


# ------------------------------ tiling helpers ------------------------------ #

def _round_up(x, m):
    return (x + m - 1) // m * m


@functools.lru_cache(maxsize=1)
def _num_tensorcores():
    """Best-effort TensorCores-per-chip (parallel grid axes split across them).
    Defaults to 1, which is always safe."""
    try:
        kind = jax.devices()[0].device_kind.lower()
    except Exception:
        return 1
    return 2 if any(t in kind for t in ("v7", "7x", "v4", "v5p")) else 1


def _pick_row_tile(m, row_bytes, *, row_align=8, target_bytes=4 << 20,
                   want_multi=False):
    """Largest row tile (multiple of row_align, divisor of m) under a byte
    budget.  If want_multi (multi-TC chip and no other parallel split), prefer
    a tile giving >=2 grid steps; otherwise just take the biggest."""
    cands = [t for t in (4096, 2048, 1024, 512, 256, 128, 64, 32, 16, 8)
             if t % row_align == 0 and m % t == 0
             and t * row_bytes <= target_bytes]
    if not cands:
        return m
    if want_multi:
        for t in cands:
            if m // t >= 2:
                return t
    return cands[0]


def _pick_n_tile(n):
    # 256-wide N tiles match the 2x256x256 MXU on v6e/v7x; 128 is the fallback.
    for t in (256, 128):
        if n % t == 0:
            return t
    return n


def _pick_k_tile(k):
    if k <= 512:
        return k
    for t in (512, 256, 128):
        if k % t == 0:
            return t
    return k


def _vmem_limit(*block_bytes, scratch=0):
    """Per-call VMEM request: double-buffered in/out blocks + scratch + slack,
    capped well below v7x's 64 MiB physical VMEM."""
    need = 2 * sum(block_bytes) + scratch + (2 << 20)
    return int(min(max(need, 8 << 20), 48 << 20))


# ------------------------------ Pallas kernels ------------------------------ #

def _mm_stats_kernel(a_ref, w_ref, y_ref, sum_ref, sq_ref, acc_ref):
    """Tiled matmul with a fused per-column (sum, sum^2) epilogue for BN.
    Column sums run as ones @ acc on the MXU (spare slot) rather than
    cross-sublane XLU reductions."""
    k = pl.program_id(2)

    @pl.when(k == 0)
    def _():
        acc_ref[...] = jnp.zeros_like(acc_ref)

    acc_ref[...] += jnp.dot(a_ref[...], w_ref[...],
                            preferred_element_type=jnp.float32)

    @pl.when(k == pl.num_programs(2) - 1)
    def _():
        acc = acc_ref[...]
        y_ref[...] = acc.astype(y_ref.dtype)
        ones = jnp.ones((8, acc.shape[0]), jnp.float32)
        col_sum = jnp.dot(ones, acc, preferred_element_type=jnp.float32)
        col_sq = jnp.dot(ones, acc * acc, preferred_element_type=jnp.float32)
        sum_ref[...] = col_sum[0:1][None]
        sq_ref[...] = col_sq[0:1][None]


def _mm_bias_tanh_kernel(a_ref, w_ref, b_ref, y_ref, acc_ref):
    """Tiled matmul with fused bias + tanh epilogue (final generator layer)."""
    k = pl.program_id(2)

    @pl.when(k == 0)
    def _():
        acc_ref[...] = jnp.zeros_like(acc_ref)

    acc_ref[...] += jnp.dot(a_ref[...], w_ref[...],
                            preferred_element_type=jnp.float32)

    @pl.when(k == pl.num_programs(2) - 1)
    def _():
        y_ref[...] = jnp.tanh(acc_ref[...] + b_ref[...]).astype(y_ref.dtype)


def _affine_relu_kernel(x_ref, scale_ref, shift_ref, o_ref):
    y = x_ref[...].astype(jnp.float32) * scale_ref[...] + shift_ref[...]
    o_ref[...] = jnp.maximum(y, 0.0).astype(o_ref.dtype)


def _fc_bn_relu_kernel(z_ref, w_ref, g_ref, b_ref, o_ref):
    """Whole fc layer in one kernel: matmul + batch-stat BN + ReLU.  The fc
    bias is dropped (exactly cancelled by the BN mean subtraction)."""
    acc = jnp.dot(z_ref[...], w_ref[...], preferred_element_type=jnp.float32)
    m = acc.shape[0]
    mean = jnp.sum(acc, axis=0, keepdims=True) / m
    # TODO(synk): E[x^2]-E[x]^2 can cancel for very large counts; clamped >=0
    # and fine at these sizes.
    var = jnp.maximum(jnp.sum(acc * acc, axis=0, keepdims=True) / m
                      - mean * mean, 0.0)
    scale = g_ref[...] * lax.rsqrt(var + EPS)
    shift = b_ref[...] - mean * scale
    o_ref[...] = jnp.maximum(acc * scale + shift, 0.0).astype(o_ref.dtype)


# ------------------------------ kernel wrappers ----------------------------- #

def matmul_stats(a, w, *, out_dtype=jnp.bfloat16):
    """y = a @ w (f32 MXU accumulate) plus per-M-tile column sums / sums of
    squares for batch-stat BatchNorm."""
    m, k = a.shape
    k2, n = w.shape
    assert k == k2 and n % 128 == 0
    tk = _pick_k_tile(k)
    tn = _pick_n_tile(n)
    op_b = jnp.dtype(a.dtype).itemsize
    out_b = jnp.dtype(out_dtype).itemsize
    row_align = 16 if op_b < 4 else 8
    want_multi = _num_tensorcores() > 1 and (n // tn) < 2
    tm = _pick_row_tile(m, tk * op_b + tn * (out_b + 4),
                        row_align=row_align, want_multi=want_multi)
    nmi, nnj, nki = m // tm, n // tn, k // tk
    vmem = _vmem_limit(tm * tk * op_b, tk * tn * op_b, tm * tn * out_b,
                       2 * tn * 4, scratch=tm * tn * 4)

    return pl.pallas_call(
        _mm_stats_kernel,
        out_shape=(jax.ShapeDtypeStruct((m, n), out_dtype),
                   jax.ShapeDtypeStruct((nmi, 1, n), jnp.float32),
                   jax.ShapeDtypeStruct((nmi, 1, n), jnp.float32)),
        grid_spec=pltpu.PrefetchScalarGridSpec(
            num_scalar_prefetch=0,
            grid=(nmi, nnj, nki),
            in_specs=[
                pl.BlockSpec((tm, tk), lambda i, j, kk: (i, kk)),
                pl.BlockSpec((tk, tn), lambda i, j, kk: (kk, j)),
            ],
            out_specs=(
                pl.BlockSpec((tm, tn), lambda i, j, kk: (i, j)),
                pl.BlockSpec((1, 1, tn), lambda i, j, kk: (i, 0, j)),
                pl.BlockSpec((1, 1, tn), lambda i, j, kk: (i, 0, j)),
            ),
            scratch_shapes=[pltpu.VMEM((tm, tn), jnp.float32)],
        ),
        compiler_params=pltpu.CompilerParams(
            dimension_semantics=("parallel", "parallel", "arbitrary"),
            vmem_limit_bytes=vmem),
    )(a, w)


def matmul_bias_tanh(a, w, b, *, out_dtype=jnp.bfloat16):
    """tanh(a @ w + b) with bias/tanh fused into the matmul epilogue."""
    m, k = a.shape
    k2, n = w.shape
    assert k == k2 and n % 128 == 0
    tk = _pick_k_tile(k)
    tn = _pick_n_tile(n)
    op_b = jnp.dtype(a.dtype).itemsize
    out_b = jnp.dtype(out_dtype).itemsize
    row_align = 16 if op_b < 4 else 8
    want_multi = _num_tensorcores() > 1 and (n // tn) < 2
    tm = _pick_row_tile(m, tk * op_b + tn * (out_b + 4),
                        row_align=row_align, want_multi=want_multi)
    vmem = _vmem_limit(tm * tk * op_b, tk * tn * op_b, tm * tn * out_b,
                       tn * 4, scratch=tm * tn * 4)

    return pl.pallas_call(
        _mm_bias_tanh_kernel,
        out_shape=jax.ShapeDtypeStruct((m, n), out_dtype),
        grid_spec=pltpu.PrefetchScalarGridSpec(
            num_scalar_prefetch=0,
            grid=(m // tm, n // tn, k // tk),
            in_specs=[
                pl.BlockSpec((tm, tk), lambda i, j, kk: (i, kk)),
                pl.BlockSpec((tk, tn), lambda i, j, kk: (kk, j)),
                pl.BlockSpec((1, tn), lambda i, j, kk: (0, j)),
            ],
            out_specs=pl.BlockSpec((tm, tn), lambda i, j, kk: (i, j)),
            scratch_shapes=[pltpu.VMEM((tm, tn), jnp.float32)],
        ),
        compiler_params=pltpu.CompilerParams(
            dimension_semantics=("parallel", "parallel", "arbitrary"),
            vmem_limit_bytes=vmem),
    )(a, w, b.reshape(1, n).astype(jnp.float32))


def affine_relu(x, scale, shift, *, out_dtype=jnp.bfloat16):
    """Fused BatchNorm affine (per-column scale/shift) + ReLU, lane-dense."""
    m, n = x.shape
    assert n % 128 == 0
    tn = _pick_n_tile(n)
    in_b = jnp.dtype(x.dtype).itemsize
    out_b = jnp.dtype(out_dtype).itemsize
    row_align = 16 if min(in_b, out_b) < 4 else 8
    want_multi = _num_tensorcores() > 1 and (n // tn) < 2
    tm = _pick_row_tile(m, tn * (in_b + out_b),
                        row_align=row_align, want_multi=want_multi)
    vmem = _vmem_limit(tm * tn * in_b, tm * tn * out_b, 2 * tn * 4)

    return pl.pallas_call(
        _affine_relu_kernel,
        out_shape=jax.ShapeDtypeStruct((m, n), out_dtype),
        grid_spec=pltpu.PrefetchScalarGridSpec(
            num_scalar_prefetch=0,
            grid=(m // tm, n // tn),
            in_specs=[
                pl.BlockSpec((tm, tn), lambda i, j: (i, j)),
                pl.BlockSpec((1, tn), lambda i, j: (0, j)),
                pl.BlockSpec((1, tn), lambda i, j: (0, j)),
            ],
            out_specs=pl.BlockSpec((tm, tn), lambda i, j: (i, j)),
        ),
        compiler_params=pltpu.CompilerParams(
            dimension_semantics=("parallel", "parallel"),
            vmem_limit_bytes=vmem),
    )(x, scale.reshape(1, n).astype(jnp.float32),
      shift.reshape(1, n).astype(jnp.float32))


def fc_bn_relu(z, w, gamma, beta, *, out_dtype=jnp.bfloat16):
    """fc layer: Linear (bias dropped) + BatchNorm1d (batch stats) + ReLU as a
    single kernel when it fits VMEM; tiled fallback otherwise."""
    m, k = z.shape
    _, n = w.shape
    op_b = jnp.dtype(z.dtype).itemsize
    total = (m * k + k * n) * op_b + m * n * (4 + jnp.dtype(out_dtype).itemsize)
    if total > (12 << 20):
        y, s, sq = matmul_stats(z, w, out_dtype=out_dtype)
        scale, shift = _bn_scale_shift(s.sum(axis=(0, 1)), sq.sum(axis=(0, 1)),
                                       m, gamma, beta)
        return affine_relu(y, scale, shift, out_dtype=out_dtype)
    return pl.pallas_call(
        _fc_bn_relu_kernel,
        out_shape=jax.ShapeDtypeStruct((m, n), out_dtype),
        compiler_params=pltpu.CompilerParams(
            vmem_limit_bytes=_vmem_limit(m * k * 4, k * n * 4, m * n * 4,
                                         2 * n * 4, scratch=m * n * 4)),
    )(z, w, gamma.reshape(1, n).astype(jnp.float32),
      beta.reshape(1, n).astype(jnp.float32))


# ------------------------------- layer helpers ------------------------------ #

def _bn_scale_shift(total_sum, total_sq, count, gamma, beta):
    """Fold batch mean/var into a per-channel scale/shift (training-mode BN)."""
    mean = total_sum / count
    var = jnp.maximum(total_sq / count - mean * mean, 0.0)
    inv = lax.rsqrt(var + EPS)
    scale = gamma * inv
    shift = beta - mean * scale
    return scale, shift


def _deconv_patches(x):
    """Single shared im2col for ALL four output parities: the 9 offsets of the
    3x3 window of the 1-padded input, concatenated along channels.
    TODO(synk): plain-JAX glue; shifted-window gathers cannot be expressed
    with block-index BlockSpecs at these small spatial sizes."""
    b, h, w_sp, cin = x.shape
    xp = jnp.pad(x, ((0, 0), (1, 1), (1, 1), (0, 0)))
    cols = [xp[:, dy:dy + h, dx:dx + w_sp, :]
            for dy in range(3) for dx in range(3)]
    pat = jnp.concatenate(cols, axis=-1)              # (B, H, W, 9*Cin)
    return pat.reshape(b * h * w_sp, 9 * cin)


def _interleave(y, b, h, w_sp, cout):
    """y: (B*H*W, >=4*Cout) fused-branch output, column layout (ry, rx, c).
    Returns NHWC with out[:, 2py+ry, 2px+rx, c]."""
    y = y[:, :4 * cout].reshape(b, h, w_sp, 2, 2, cout)
    return y.transpose(0, 1, 3, 2, 4, 5).reshape(b, 2 * h, 2 * w_sp, cout)


def _replicate_pad(v, cout, n_pad, fill=0.0):
    v4 = jnp.tile(v, 4)
    return jnp.pad(v4, (0, n_pad - 4 * cout), constant_values=fill)


def deconv_bn_relu(x, w_fused, gamma, beta, cout, *, operand_dtype):
    """ConvTranspose2d(5, s=2, p=2, op=1) + BatchNorm2d(batch stats) + ReLU,
    all four output parities in ONE matmul (branch-fused weights)."""
    b, h, w_sp, _ = x.shape
    n_pad = w_fused.shape[1]
    pat = _deconv_patches(x)
    y, s, sq = matmul_stats(pat, w_fused, out_dtype=operand_dtype)
    s = s.sum(axis=(0, 1))[:4 * cout].reshape(4, cout).sum(axis=0)
    sq = sq.sum(axis=(0, 1))[:4 * cout].reshape(4, cout).sum(axis=0)
    count = b * (2 * h) * (2 * w_sp)
    scale, shift = _bn_scale_shift(s, sq, count, gamma, beta)
    scale = _replicate_pad(scale, cout, n_pad, fill=1.0)
    shift = _replicate_pad(shift, cout, n_pad, fill=0.0)
    y = affine_relu(y, scale, shift, out_dtype=operand_dtype)
    return _interleave(y, b, h, w_sp, cout)


def deconv_tanh(x, w_fused, bias_fused, cout, *, operand_dtype):
    """Final ConvTranspose2d + bias + tanh, single fused matmul."""
    b, h, w_sp, _ = x.shape
    pat = _deconv_patches(x)
    y = matmul_bias_tanh(pat, w_fused, bias_fused, out_dtype=operand_dtype)
    return _interleave(y, b, h, w_sp, cout)


# ------------------------------- parameters --------------------------------- #

def init_params(key, gf_dim, ch, rows, cols, z_dim):
    """Raw parameters mirroring the PyTorch module layout (f32)."""
    keys = jax.random.split(key, 16)
    p = {}
    fc_out = gf_dim * 8 * rows * cols
    p["fc_w"] = 0.05 * jax.random.normal(keys[0], (z_dim, fc_out), jnp.float32)
    p["fc_b"] = 0.05 * jax.random.normal(keys[1], (fc_out,), jnp.float32)
    p["fc_gamma"] = jnp.ones((fc_out,), jnp.float32)
    p["fc_beta"] = jnp.zeros((fc_out,), jnp.float32)
    chans = [gf_dim * 8, gf_dim * 4, gf_dim * 2, gf_dim, ch]
    for li in range(4):
        cin, cout = chans[li], chans[li + 1]
        p[f"dc{li}_w"] = 0.05 * jax.random.normal(
            keys[2 + 3 * li], (cin, cout, KSIZE, KSIZE), jnp.float32)
        p[f"dc{li}_b"] = 0.05 * jax.random.normal(
            keys[3 + 3 * li], (cout,), jnp.float32)
        if li < 3:
            p[f"dc{li}_gamma"] = jnp.ones((cout,), jnp.float32)
            p[f"dc{li}_beta"] = jnp.zeros((cout,), jnp.float32)
    return p


def prepare_params(p, gf_dim, ch, *, operand_dtype=jnp.bfloat16):
    """One-time repack: branch-fused sub-pixel weights (K = 9*Cin, N =
    pad(4*Cout, 128), zero rows for unused taps per branch), operand-dtype
    casts.  Biases feeding batch-stat BN (fc, dc0-dc2) are dropped: exactly
    cancelled by the mean subtraction."""
    q = {}
    fc_out = p["fc_w"].shape[1]
    n_fc = _round_up(fc_out, 128)
    q["fc_w"] = jnp.pad(p["fc_w"],
                        ((0, 0), (0, n_fc - fc_out))).astype(operand_dtype)
    q["fc_gamma"] = jnp.pad(p["fc_gamma"], (0, n_fc - fc_out),
                            constant_values=1.0)
    q["fc_beta"] = jnp.pad(p["fc_beta"], (0, n_fc - fc_out))

    chans = [gf_dim * 8, gf_dim * 4, gf_dim * 2, gf_dim, ch]
    for li in range(4):
        cin, cout = chans[li], chans[li + 1]
        n_pad = _round_up(4 * cout, 128)
        w = p[f"dc{li}_w"]                       # (Cin, Cout, 5, 5) PyTorch
        wf = jnp.zeros((9 * cin, 4 * cout), jnp.float32)
        for ry in (0, 1):
            for rx in (0, 1):
                br = ry * 2 + rx
                for dy, ky in TAPS[ry]:
                    for dx, kx in TAPS[rx]:
                        o = dy * 3 + dx
                        wf = wf.at[o * cin:(o + 1) * cin,
                                   br * cout:(br + 1) * cout].set(w[:, :, ky, kx])
        q[f"dc{li}_w"] = jnp.pad(
            wf, ((0, 0), (0, n_pad - 4 * cout))).astype(operand_dtype)
        if li < 3:
            q[f"dc{li}_gamma"] = p[f"dc{li}_gamma"]
            q[f"dc{li}_beta"] = p[f"dc{li}_beta"]
        else:
            q[f"dc{li}_b"] = _replicate_pad(p[f"dc{li}_b"], cout,
                                            n_pad).astype(jnp.float32)
    return q


# -------------------------------- Generator --------------------------------- #

def generator_forward(prepped, z, gf_dim, ch, rows, cols,
                      *, operand_dtype=jnp.bfloat16):
    b = z.shape[0]
    fc_out = gf_dim * 8 * rows * cols

    # fc: Linear (bias dropped; cancelled by BN) + BatchNorm1d + ReLU, fused.
    h = fc_bn_relu(z.astype(operand_dtype), prepped["fc_w"],
                   prepped["fc_gamma"], prepped["fc_beta"],
                   out_dtype=operand_dtype)[:, :fc_out]

    # view(-1, gf_dim*8, rows, cols), then channels-last for the conv kernels.
    x = h.reshape(b, gf_dim * 8, rows, cols).transpose(0, 2, 3, 1)

    couts = [gf_dim * 4, gf_dim * 2, gf_dim, ch]
    for li in range(3):
        x = deconv_bn_relu(x, prepped[f"dc{li}_w"], prepped[f"dc{li}_gamma"],
                           prepped[f"dc{li}_beta"], couts[li],
                           operand_dtype=operand_dtype)
    x = deconv_tanh(x, prepped["dc3_w"], prepped["dc3_b"], couts[3],
                    operand_dtype=operand_dtype)

    return x.transpose(0, 3, 1, 2).astype(jnp.float32)   # NCHW like PyTorch


# -------------------------- pure-JAX reference (test) ----------------------- #

def _bn_ref(x2d, gamma, beta):
    mean = x2d.mean(axis=0)
    var = x2d.var(axis=0)
    return (x2d - mean) * (gamma / jnp.sqrt(var + EPS)) + beta


def reference_forward(params, z, gf_dim, ch, rows, cols):
    b = z.shape[0]
    h = jnp.dot(z, params["fc_w"], precision=lax.Precision.HIGHEST)
    h = h + params["fc_b"]
    h = jnp.maximum(_bn_ref(h, params["fc_gamma"], params["fc_beta"]), 0.0)
    x = h.reshape(b, gf_dim * 8, rows, cols)
    for li in range(4):
        w = params[f"dc{li}_w"]                              # (Cin, Cout, 5, 5)
        w_conv = jnp.flip(w, (2, 3)).transpose(1, 0, 2, 3)   # OIHW
        x = lax.conv_general_dilated(
            x, w_conv, window_strides=(1, 1), padding=((2, 3), (2, 3)),
            lhs_dilation=(2, 2), dimension_numbers=("NCHW", "OIHW", "NCHW"),
            precision=lax.Precision.HIGHEST)
        x = x + params[f"dc{li}_b"][None, :, None, None]
        if li < 3:
            bsz, c, hh, ww = x.shape
            x2 = x.transpose(0, 2, 3, 1).reshape(-1, c)
            x2 = jnp.maximum(_bn_ref(x2, params[f"dc{li}_gamma"],
                                     params[f"dc{li}_beta"]), 0.0)
            x = x2.reshape(bsz, hh, ww, c).transpose(0, 3, 1, 2)
        else:
            x = jnp.tanh(x)
    return x


# ----------------------------------- main ------------------------------------ #

if __name__ == "__main__":
    gf_dim, ch, z_dim = 4, 3, 32
    rows, cols = [4], [4]
    batch = 2

    key = jax.random.PRNGKey(0)
    params = init_params(key, gf_dim, ch, rows[0], cols[0], z_dim)
    z = jax.random.normal(jax.random.fold_in(key, 999), (batch, z_dim),
                          jnp.float32)

    prepped_bf16 = prepare_params(params, gf_dim, ch,
                                  operand_dtype=jnp.bfloat16)
    prepped_f32 = prepare_params(params, gf_dim, ch,
                                 operand_dtype=jnp.float32)

    fwd = functools.partial(generator_forward, gf_dim=gf_dim, ch=ch,
                            rows=rows[0], cols=cols[0])
    fwd_bf16 = jax.jit(functools.partial(fwd, operand_dtype=jnp.bfloat16))
    fwd_f32 = jax.jit(functools.partial(fwd, operand_dtype=jnp.float32))

    # Main (bf16-operand) run.
    out = jax.block_until_ready(fwd_bf16(prepped_bf16, z))
    assert out.shape == (batch, ch, rows[0] * 16, cols[0] * 16), out.shape
    assert out.dtype == jnp.float32
    assert bool(jnp.all(jnp.isfinite(out)))
    assert bool(jnp.all(jnp.abs(out) <= 1.0 + 1e-2))   # tanh range sanity

    # Structural correctness check: f32-operand Pallas path vs. a pure-JAX
    # (lax.conv_general_dilated) reference of the PyTorch module.
    out_f32 = jax.block_until_ready(fwd_f32(prepped_f32, z))
    ref = reference_forward(params, z, gf_dim, ch, rows[0], cols[0])
    max_diff = float(jnp.max(jnp.abs(out_f32 - ref)))
    assert max_diff < 5e-2, max_diff

    print("KERNEL_OK")
</pallas_src>

<mosaic_0001>
module attributes {stable_mosaic.version = 11 : i64} {
  func.func @_fc_bn_relu_kernel(%arg0: memref<2x32xbf16, #tpu.memory_space<vmem>>, %arg1: memref<32x512xbf16, #tpu.memory_space<vmem>>, %arg2: memref<1x512xf32, #tpu.memory_space<vmem>>, %arg3: memref<1x512xf32, #tpu.memory_space<vmem>>, %arg4: memref<2x512xbf16, #tpu.memory_space<vmem>>) attributes {dimension_semantics = [], scalar_prefetch = 0 : i64, scratch_operands = 0 : i64, tpu.core_type = #tpu.core_type<tc>} {
    %c0 = arith.constant 0 : index
    %c0_0 = arith.constant 0 : index
    %0 = vector.load %arg0[%c0, %c0_0] : memref<2x32xbf16, #tpu.memory_space<vmem>>, vector<2x32xbf16>
    %c0_1 = arith.constant 0 : index
    %c0_2 = arith.constant 0 : index
    %1 = vector.load %arg1[%c0_1, %c0_2] : memref<32x512xbf16, #tpu.memory_space<vmem>>, vector<32x512xbf16>
    %cst = arith.constant dense<0.000000e+00> : vector<2x512xf32>
    %2 = tpu.matmul %0, %1, %cst {dimension_numbers = #tpu.dot_dimension_numbers<[1], [0], [0], [1], [0, 0, 1, 1], [], []>} : vector<2x32xbf16>, vector<32x512xbf16>, vector<2x512xf32> -> vector<2x512xf32>
    %cst_3 = arith.constant dense<0.000000e+00> : vector<512xf32>
    %3 = vector.multi_reduction <add>, %2, %cst_3 [0] : vector<2x512xf32> to vector<512xf32>
    %4 = vector.shape_cast %3 : vector<512xf32> to vector<1x512xf32>
    %cst_4 = arith.constant 2.000000e+00 : f32
    %5 = vector.broadcast %cst_4 : f32 to vector<1x512xf32>
    %6 = arith.divf %4, %5 : vector<1x512xf32>
    %7 = arith.mulf %2, %2 : vector<2x512xf32>
    %cst_5 = arith.constant dense<0.000000e+00> : vector<512xf32>
    %8 = vector.multi_reduction <add>, %7, %cst_5 [0] : vector<2x512xf32> to vector<512xf32>
    %9 = vector.shape_cast %8 : vector<512xf32> to vector<1x512xf32>
    %cst_6 = arith.constant 2.000000e+00 : f32
    %10 = vector.broadcast %cst_6 : f32 to vector<1x512xf32>
    %11 = arith.divf %9, %10 : vector<1x512xf32>
    %12 = arith.mulf %6, %6 : vector<1x512xf32>
    %13 = arith.subf %11, %12 : vector<1x512xf32>
    %cst_7 = arith.constant 0.000000e+00 : f32
    %14 = vector.broadcast %cst_7 : f32 to vector<1x512xf32>
    %15 = arith.maximumf %13, %14 : vector<1x512xf32>
    %c0_8 = arith.constant 0 : index
    %c0_9 = arith.constant 0 : index
    %16 = vector.load %arg2[%c0_8, %c0_9] : memref<1x512xf32, #tpu.memory_space<vmem>>, vector<1x512xf32>
    %cst_10 = arith.constant 9.99999974E-6 : f32
    %17 = vector.broadcast %cst_10 : f32 to vector<1x512xf32>
    %18 = arith.addf %15, %17 : vector<1x512xf32>
    %19 = math.rsqrt %18 : vector<1x512xf32>
    %20 = arith.mulf %16, %19 : vector<1x512xf32>
    %c0_11 = arith.constant 0 : index
    %c0_12 = arith.constant 0 : index
    %21 = vector.load %arg3[%c0_11, %c0_12] : memref<1x512xf32, #tpu.memory_space<vmem>>, vector<1x512xf32>
    %22 = arith.mulf %6, %20 : vector<1x512xf32>
    %23 = arith.subf %21, %22 : vector<1x512xf32>
    %24 = vector.broadcast %20 : vector<1x512xf32> to vector<2x512xf32>
    %25 = arith.mulf %2, %24 : vector<2x512xf32>
    %26 = vector.broadcast %23 : vector<1x512xf32> to vector<2x512xf32>
    %27 = arith.addf %25, %26 : vector<2x512xf32>
    %cst_13 = arith.constant 0.000000e+00 : f32
    %28 = vector.broadcast %cst_13 : f32 to vector<2x512xf32>
    %29 = arith.maximumf %27, %28 : vector<2x512xf32>
    %30 = arith.truncf %29 : vector<2x512xf32> to vector<2x512xbf16>
    %c0_14 = arith.constant 0 : index
    %c0_15 = arith.constant 0 : index
    %31 = vector.load %arg4[%c0_14, %c0_15] : memref<2x512xbf16, #tpu.memory_space<vmem>>, vector<2x512xbf16>
    tpu.vector_store %arg4[%c0_14, %c0_15], %30 {strides = array<i32>} : memref<2x512xbf16, #tpu.memory_space<vmem>>, vector<2x512xbf16>,
    return
  }
}

module attributes {stable_mosaic.version = 11 : i64} {
  func.func @_mm_stats_kernel(%arg0: i32, %arg1: i32, %arg2: i32, %arg3: memref<32x288xbf16, #tpu.memory_space<vmem>>, %arg4: memref<288x128xbf16, #tpu.memory_space<vmem>>, %arg5: memref<32x128xbf16, #tpu.memory_space<vmem>>, %arg6: memref<1x1x128xf32, #tpu.memory_space<vmem>>, %arg7: memref<1x1x128xf32, #tpu.memory_space<vmem>>, %arg8: memref<32x128xf32, #tpu.memory_space<vmem>>) attributes {dimension_semantics = [#tpu.dimension_semantics<parallel>, #tpu.dimension_semantics<parallel>, #tpu.dimension_semantics<arbitrary>], iteration_bounds = array<i64: 1, 1, 1>, scalar_prefetch = 0 : i64, scratch_operands = 1 : i64, tpu.core_type = #tpu.core_type<tc>, window_params = [{transform_indices = @transform_0, window_bounds = array<i64: 32, 288>}, {transform_indices = @transform_1, window_bounds = array<i64: 288, 128>}, {transform_indices = @transform_2, window_bounds = array<i64: 32, 128>}, {transform_indices = @transform_3, window_bounds = array<i64: 1, 1, 128>}, {transform_indices = @transform_4, window_bounds = array<i64: 1, 1, 128>}]} {
    %c0_i32 = arith.constant 0 : i32
    %0 = arith.cmpi eq, %arg2, %c0_i32 : i32
    %1 = arith.extui %0 : i1 to i32
    %c0_i32_0 = arith.constant 0 : i32
    %2 = arith.cmpi ne, %1, %c0_i32_0 : i32
    scf.if %2 {
      %cst_10 = arith.constant 0.000000e+00 : f32
      %12 = vector.broadcast %cst_10 : f32 to vector<32x128xf32>
      %c0_11 = arith.constant 0 : index
      %c0_12 = arith.constant 0 : index
      %13 = vector.load %arg8[%c0_11, %c0_12] : memref<32x128xf32, #tpu.memory_space<vmem>>, vector<32x128xf32>
      tpu.vector_store %arg8[%c0_11, %c0_12], %12 {strides = array<i32>} : memref<32x128xf32, #tpu.memory_space<vmem>>, vector<32x128xf32>,
    } else {
    }
    %c0 = arith.constant 0 : index
    %c0_1 = arith.constant 0 : index
    %3 = vector.load %arg8[%c0, %c0_1] : memref<32x128xf32, #tpu.memory_space<vmem>>, vector<32x128xf32>
    %c0_2 = arith.constant 0 : index
    %c0_3 = arith.constant 0 : index
    %4 = vector.load %arg3[%c0_2, %c0_3] : memref<32x288xbf16, #tpu.memory_space<vmem>>, vector<32x288xbf16>
    %c0_4 = arith.constant 0 : index
    %c0_5 = arith.constant 0 : index
    %5 = vector.load %arg4[%c0_4, %c0_5] : memref<288x128xbf16, #tpu.memory_space<vmem>>, vector<288x128xbf16>
    %cst = arith.constant dense<0.000000e+00> : vector<32x128xf32>
    %6 = tpu.matmul %4, %5, %cst {dimension_numbers = #tpu.dot_dimension_numbers<[1], [0], [0], [1], [0, 0, 1, 1], [], []>} : vector<32x288xbf16>, vector<288x128xbf16>, vector<32x128xf32> -> vector<32x128xf32>
    %7 = arith.addf %3, %6 : vector<32x128xf32>
    %c0_6 = arith.constant 0 : index
    %c0_7 = arith.constant 0 : index
    %8 = vector.load %arg8[%c0_6, %c0_7] : memref<32x128xf32, #tpu.memory_space<vmem>>, vector<32x128xf32>
    tpu.vector_store %arg8[%c0_6, %c0_7], %7 {strides = array<i32>} : memref<32x128xf32, #tpu.memory_space<vmem>>, vector<32x128xf32>,
    %c0_i32_8 = arith.constant 0 : i32
    %9 = arith.cmpi eq, %arg2, %c0_i32_8 : i32
    %10 = arith.extui %9 : i1 to i32
    %c0_i32_9 = arith.constant 0 : i32
    %11 = arith.cmpi ne, %10, %c0_i32_9 : i32
    scf.if %11 {
      %c0_10 = arith.constant 0 : index
      %c0_11 = arith.constant 0 : index
      %12 = vector.load %arg8[%c0_10, %c0_11] : memref<32x128xf32, #tpu.memory_space<vmem>>, vector<32x128xf32>
      %13 = arith.truncf %12 : vector<32x128xf32> to vector<32x128xbf16>
      %c0_12 = arith.constant 0 : index
      %c0_13 = arith.constant 0 : index
      %14 = vector.load %arg5[%c0_12, %c0_13] : memref<32x128xbf16, #tpu.memory_space<vmem>>, vector<32x128xbf16>
      tpu.vector_store %arg5[%c0_12, %c0_13], %13 {strides = array<i32>} : memref<32x128xbf16, #tpu.memory_space<vmem>>, vector<32x128xbf16>,
      %cst_14 = arith.constant 1.000000e+00 : f32
      %15 = vector.broadcast %cst_14 : f32 to vector<8x32xf32>
      %cst_15 = arith.constant dense<0.000000e+00> : vector<8x128xf32>
      %16 = tpu.matmul %15, %12, %cst_15 {dimension_numbers = #tpu.dot_dimension_numbers<[1], [0], [0], [1], [0, 0, 1, 1], [], []>} : vector<8x32xf32>, vector<32x128xf32>, vector<8x128xf32> -> vector<8x128xf32>
      %17 = arith.mulf %12, %12 : vector<32x128xf32>
      %cst_16 = arith.constant dense<0.000000e+00> : vector<8x128xf32>
      %18 = tpu.matmul %15, %17, %cst_16 {dimension_numbers = #tpu.dot_dimension_numbers<[1], [0], [0], [1], [0, 0, 1, 1], [], []>} : vector<8x32xf32>, vector<32x128xf32>, vector<8x128xf32> -> vector<8x128xf32>
      %19 = vector.extract_strided_slice %16 {offsets = [0, 0], sizes = [1, 128], strides = [1, 1]} : vector<8x128xf32> to vector<1x128xf32>
      %20 = vector.shape_cast %19 : vector<1x128xf32> to vector<1x1x128xf32>
      %c0_17 = arith.constant 0 : index
      %c0_18 = arith.constant 0 : index
      %c0_19 = arith.constant 0 : index
      %21 = vector.load %arg6[%c0_17, %c0_18, %c0_19] : memref<1x1x128xf32, #tpu.memory_space<vmem>>, vector<1x1x128xf32>
      tpu.vector_store %arg6[%c0_17, %c0_18, %c0_19], %20 {strides = array<i32>} : memref<1x1x128xf32, #tpu.memory_space<vmem>>, vector<1x1x128xf32>,
      %22 = vector.extract_strided_slice %18 {offsets = [0, 0], sizes = [1, 128], strides = [1, 1]} : vector<8x128xf32> to vector<1x128xf32>
      %23 = vector.shape_cast %22 : vector<1x128xf32> to vector<1x1x128xf32>
      %c0_20 = arith.constant 0 : index
      %c0_21 = arith.constant 0 : index
      %c0_22 = arith.constant 0 : index
      %24 = vector.load %arg7[%c0_20, %c0_21, %c0_22] : memref<1x1x128xf32, #tpu.memory_space<vmem>>, vector<1x1x128xf32>
      tpu.vector_store %arg7[%c0_20, %c0_21, %c0_22], %23 {strides = array<i32>} : memref<1x1x128xf32, #tpu.memory_space<vmem>>, vector<1x1x128xf32>,
    } else {
    }
    return
  }
  func.func @transform_0(%arg0: i32, %arg1: i32, %arg2: i32) -> (i32, i32) {
    %c0_i32 = arith.constant 0 : i32
    return %arg0, %arg2 : i32, i32
  }
  func.func @transform_1(%arg0: i32, %arg1: i32, %arg2: i32) -> (i32, i32) {
    %c0_i32 = arith.constant 0 : i32
    return %arg2, %arg1 : i32, i32
  }
  func.func @transform_2(%arg0: i32, %arg1: i32, %arg2: i32) -> (i32, i32) {
    %c0_i32 = arith.constant 0 : i32
    return %arg0, %arg1 : i32, i32
  }
  func.func @transform_3(%arg0: i32, %arg1: i32, %arg2: i32) -> (i32, i32, i32) {
    %c0_i32 = arith.constant 0 : i32
    %c0_i32_0 = arith.constant 0 : i32
    return %arg0, %c0_i32, %arg1 : i32, i32, i32
  }
  func.func @transform_4(%arg0: i32, %arg1: i32, %arg2: i32) -> (i32, i32, i32) {
    %c0_i32 = arith.constant 0 : i32
    %c0_i32_0 = arith.constant 0 : i32
    return %arg0, %c0_i32, %arg1 : i32, i32, i32
  }
}

module attributes {stable_mosaic.version = 11 : i64} {
  func.func @_affine_relu_kernel(%arg0: i32, %arg1: i32, %arg2: memref<32x128xbf16, #tpu.memory_space<vmem>>, %arg3: memref<1x128xf32, #tpu.memory_space<vmem>>, %arg4: memref<1x128xf32, #tpu.memory_space<vmem>>, %arg5: memref<32x128xbf16, #tpu.memory_space<vmem>>) attributes {dimension_semantics = [#tpu.dimension_semantics<parallel>, #tpu.dimension_semantics<parallel>], iteration_bounds = array<i64: 1, 1>, scalar_prefetch = 0 : i64, scratch_operands = 0 : i64, tpu.core_type = #tpu.core_type<tc>, window_params = [{transform_indices = @transform_0, window_bounds = array<i64: 32, 128>}, {transform_indices = @transform_1, window_bounds = array<i64: 1, 128>}, {transform_indices = @transform_2, window_bounds = array<i64: 1, 128>}, {transform_indices = @transform_3, window_bounds = array<i64: 32, 128>}]} {
    %c0 = arith.constant 0 : index
    %c0_0 = arith.constant 0 : index
    %0 = vector.load %arg2[%c0, %c0_0] : memref<32x128xbf16, #tpu.memory_space<vmem>>, vector<32x128xbf16>
    %1 = arith.extf %0 : vector<32x128xbf16> to vector<32x128xf32>
    %c0_1 = arith.constant 0 : index
    %c0_2 = arith.constant 0 : index
    %2 = vector.load %arg3[%c0_1, %c0_2] : memref<1x128xf32, #tpu.memory_space<vmem>>, vector<1x128xf32>
    %3 = vector.broadcast %2 : vector<1x128xf32> to vector<32x128xf32>
    %4 = arith.mulf %1, %3 : vector<32x128xf32>
    %c0_3 = arith.constant 0 : index
    %c0_4 = arith.constant 0 : index
    %5 = vector.load %arg4[%c0_3, %c0_4] : memref<1x128xf32, #tpu.memory_space<vmem>>, vector<1x128xf32>
    %6 = vector.broadcast %5 : vector<1x128xf32> to vector<32x128xf32>
    %7 = arith.addf %4, %6 : vector<32x128xf32>
    %cst = arith.constant 0.000000e+00 : f32
    %8 = vector.broadcast %cst : f32 to vector<32x128xf32>
    %9 = arith.maximumf %7, %8 : vector<32x128xf32>
    %10 = arith.truncf %9 : vector<32x128xf32> to vector<32x128xbf16>
    %c0_5 = arith.constant 0 : index
    %c0_6 = arith.constant 0 : index
    %11 = vector.load %arg5[%c0_5, %c0_6] : memref<32x128xbf16, #tpu.memory_space<vmem>>, vector<32x128xbf16>
    tpu.vector_store %arg5[%c0_5, %c0_6], %10 {strides = array<i32>} : memref<32x128xbf16, #tpu.memory_space<vmem>>, vector<32x128xbf16>,
    return
  }
  func.func @transform_0(%arg0: i32, %arg1: i32) -> (i32, i32) {
    %c0_i32 = arith.constant 0 : i32
    return %arg0, %arg1 : i32, i32
  }
  func.func @transform_1(%arg0: i32, %arg1: i32) -> (i32, i32) {
    %c0_i32 = arith.constant 0 : i32
    %c0_i32_0 = arith.constant 0 : i32
    return %c0_i32, %arg1 : i32, i32
  }
  func.func @transform_2(%arg0: i32, %arg1: i32) -> (i32, i32) {
    %c0_i32 = arith.constant 0 : i32
    %c0_i32_0 = arith.constant 0 : i32
    return %c0_i32, %arg1 : i32, i32
  }
  func.func @transform_3(%arg0: i32, %arg1: i32) -> (i32, i32) {
    %c0_i32 = arith.constant 0 : i32
    return %arg0, %arg1 : i32, i32
  }
}

module attributes {stable_mosaic.version = 11 : i64} {
  func.func @_mm_stats_kernel(%arg0: i32, %arg1: i32, %arg2: i32, %arg3: memref<128x144xbf16, #tpu.memory_space<vmem>>, %arg4: memref<144x128xbf16, #tpu.memory_space<vmem>>, %arg5: memref<128x128xbf16, #tpu.memory_space<vmem>>, %arg6: memref<1x1x128xf32, #tpu.memory_space<vmem>>, %arg7: memref<1x1x128xf32, #tpu.memory_space<vmem>>, %arg8: memref<128x128xf32, #tpu.memory_space<vmem>>) attributes {dimension_semantics = [#tpu.dimension_semantics<parallel>, #tpu.dimension_semantics<parallel>, #tpu.dimension_semantics<arbitrary>], iteration_bounds = array<i64: 1, 1, 1>, scalar_prefetch = 0 : i64, scratch_operands = 1 : i64, tpu.core_type = #tpu.core_type<tc>, window_params = [{transform_indices = @transform_0, window_bounds = array<i64: 128, 144>}, {transform_indices = @transform_1, window_bounds = array<i64: 144, 128>}, {transform_indices = @transform_2, window_bounds = array<i64: 128, 128>}, {transform_indices = @transform_3, window_bounds = array<i64: 1, 1, 128>}, {transform_indices = @transform_4, window_bounds = array<i64: 1, 1, 128>}]} {
    %c0_i32 = arith.constant 0 : i32
    %0 = arith.cmpi eq, %arg2, %c0_i32 : i32
    %1 = arith.extui %0 : i1 to i32
    %c0_i32_0 = arith.constant 0 : i32
    %2 = arith.cmpi ne, %1, %c0_i32_0 : i32
    scf.if %2 {
      %cst_10 = arith.constant 0.000000e+00 : f32
      %12 = vector.broadcast %cst_10 : f32 to vector<128x128xf32>
      %c0_11 = arith.constant 0 : index
      %c0_12 = arith.constant 0 : index
      %13 = vector.load %arg8[%c0_11, %c0_12] : memref<128x128xf32, #tpu.memory_space<vmem>>, vector<128x128xf32>
      tpu.vector_store %arg8[%c0_11, %c0_12], %12 {strides = array<i32>} : memref<128x128xf32, #tpu.memory_space<vmem>>, vector<128x128xf32>,
    } else {
    }
    %c0 = arith.constant 0 : index
    %c0_1 = arith.constant 0 : index
    %3 = vector.load %arg8[%c0, %c0_1] : memref<128x128xf32, #tpu.memory_space<vmem>>, vector<128x128xf32>
    %c0_2 = arith.constant 0 : index
    %c0_3 = arith.constant 0 : index
    %4 = vector.load %arg3[%c0_2, %c0_3] : memref<128x144xbf16, #tpu.memory_space<vmem>>, vector<128x144xbf16>
    %c0_4 = arith.constant 0 : index
    %c0_5 = arith.constant 0 : index
    %5 = vector.load %arg4[%c0_4, %c0_5] : memref<144x128xbf16, #tpu.memory_space<vmem>>, vector<144x128xbf16>
    %cst = arith.constant dense<0.000000e+00> : vector<128x128xf32>
    %6 = tpu.matmul %4, %5, %cst {dimension_numbers = #tpu.dot_dimension_numbers<[1], [0], [0], [1], [0, 0, 1, 1], [], []>} : vector<128x144xbf16>, vector<144x128xbf16>, vector<128x128xf32> -> vector<128x128xf32>
    %7 = arith.addf %3, %6 : vector<128x128xf32>
    %c0_6 = arith.constant 0 : index
    %c0_7 = arith.constant 0 : index
    %8 = vector.load %arg8[%c0_6, %c0_7] : memref<128x128xf32, #tpu.memory_space<vmem>>, vector<128x128xf32>
    tpu.vector_store %arg8[%c0_6, %c0_7], %7 {strides = array<i32>} : memref<128x128xf32, #tpu.memory_space<vmem>>, vector<128x128xf32>,
    %c0_i32_8 = arith.constant 0 : i32
    %9 = arith.cmpi eq, %arg2, %c0_i32_8 : i32
    %10 = arith.extui %9 : i1 to i32
    %c0_i32_9 = arith.constant 0 : i32
    %11 = arith.cmpi ne, %10, %c0_i32_9 : i32
    scf.if %11 {
      %c0_10 = arith.constant 0 : index
      %c0_11 = arith.constant 0 : index
      %12 = vector.load %arg8[%c0_10, %c0_11] : memref<128x128xf32, #tpu.memory_space<vmem>>, vector<128x128xf32>
      %13 = arith.truncf %12 : vector<128x128xf32> to vector<128x128xbf16>
      %c0_12 = arith.constant 0 : index
      %c0_13 = arith.constant 0 : index
      %14 = vector.load %arg5[%c0_12, %c0_13] : memref<128x128xbf16, #tpu.memory_space<vmem>>, vector<128x128xbf16>
      tpu.vector_store %arg5[%c0_12, %c0_13], %13 {strides = array<i32>} : memref<128x128xbf16, #tpu.memory_space<vmem>>, vector<128x128xbf16>,
      %cst_14 = arith.constant 1.000000e+00 : f32
      %15 = vector.broadcast %cst_14 : f32 to vector<8x128xf32>
      %cst_15 = arith.constant dense<0.000000e+00> : vector<8x128xf32>
      %16 = tpu.matmul %15, %12, %cst_15 {dimension_numbers = #tpu.dot_dimension_numbers<[1], [0], [0], [1], [0, 0, 1, 1], [], []>} : vector<8x128xf32>, vector<128x128xf32>, vector<8x128xf32> -> vector<8x128xf32>
      %17 = arith.mulf %12, %12 : vector<128x128xf32>
      %cst_16 = arith.constant dense<0.000000e+00> : vector<8x128xf32>
      %18 = tpu.matmul %15, %17, %cst_16 {dimension_numbers = #tpu.dot_dimension_numbers<[1], [0], [0], [1], [0, 0, 1, 1], [], []>} : vector<8x128xf32>, vector<128x128xf32>, vector<8x128xf32> -> vector<8x128xf32>
      %19 = vector.extract_strided_slice %16 {offsets = [0, 0], sizes = [1, 128], strides = [1, 1]} : vector<8x128xf32> to vector<1x128xf32>
      %20 = vector.shape_cast %19 : vector<1x128xf32> to vector<1x1x128xf32>
      %c0_17 = arith.constant 0 : index
      %c0_18 = arith.constant 0 : index
      %c0_19 = arith.constant 0 : index
      %21 = vector.load %arg6[%c0_17, %c0_18, %c0_19] : memref<1x1x128xf32, #tpu.memory_space<vmem>>, vector<1x1x128xf32>
      tpu.vector_store %arg6[%c0_17, %c0_18, %c0_19], %20 {strides = array<i32>} : memref<1x1x128xf32, #tpu.memory_space<vmem>>, vector<1x1x128xf32>,
      %22 = vector.extract_strided_slice %18 {offsets = [0, 0], sizes = [1, 128], strides = [1, 1]} : vector<8x128xf32> to vector<1x128xf32>
      %23 = vector.shape_cast %22 : vector<1x128xf32> to vector<1x1x128xf32>
      %c0_20 = arith.constant 0 : index
      %c0_21 = arith.constant 0 : index
      %c0_22 = arith.constant 0 : index
      %24 = vector.load %arg7[%c0_20, %c0_21, %c0_22] : memref<1x1x128xf32, #tpu.memory_space<vmem>>, vector<1x1x128xf32>
      tpu.vector_store %arg7[%c0_20, %c0_21, %c0_22], %23 {strides = array<i32>} : memref<1x1x128xf32, #tpu.memory_space<vmem>>, vector<1x1x128xf32>,
    } else {
    }
    return
  }
  func.func @transform_0(%arg0: i32, %arg1: i32, %arg2: i32) -> (i32, i32) {
    %c0_i32 = arith.constant 0 : i32
    return %arg0, %arg2 : i32, i32
  }
  func.func @transform_1(%arg0: i32, %arg1: i32, %arg2: i32) -> (i32, i32) {
    %c0_i32 = arith.constant 0 : i32
    return %arg2, %arg1 : i32, i32
  }
  func.func @transform_2(%arg0: i32, %arg1: i32, %arg2: i32) -> (i32, i32) {
    %c0_i32 = arith.constant 0 : i32
    return %arg0, %arg1 : i32, i32
  }
  func.func @transform_3(%arg0: i32, %arg1: i32, %arg2: i32) -> (i32, i32, i32) {
    %c0_i32 = arith.constant 0 : i32
    %c0_i32_0 = arith.constant 0 : i32
    return %arg0, %c0_i32, %arg1 : i32, i32, i32
  }
  func.func @transform_4(%arg0: i32, %arg1: i32, %arg2: i32) -> (i32, i32, i32) {
    %c0_i32 = arith.constant 0 : i32
    %c0_i32_0 = arith.constant 0 : i32
    return %arg0, %c0_i32, %arg1 : i32, i32, i32
  }
}

module attributes {stable_mosaic.version = 11 : i64} {
  func.func @_affine_relu_kernel(%arg0: i32, %arg1: i32, %arg2: memref<128x128xbf16, #tpu.memory_space<vmem>>, %arg3: memref<1x128xf32, #tpu.memory_space<vmem>>, %arg4: memref<1x128xf32, #tpu.memory_space<vmem>>, %arg5: memref<128x128xbf16, #tpu.memory_space<vmem>>) attributes {dimension_semantics = [#tpu.dimension_semantics<parallel>, #tpu.dimension_semantics<parallel>], iteration_bounds = array<i64: 1, 1>, scalar_prefetch = 0 : i64, scratch_operands = 0 : i64, tpu.core_type = #tpu.core_type<tc>, window_params = [{transform_indices = @transform_0, window_bounds = array<i64: 128, 128>}, {transform_indices = @transform_1, window_bounds = array<i64: 1, 128>}, {transform_indices = @transform_2, window_bounds = array<i64: 1, 128>}, {transform_indices = @transform_3, window_bounds = array<i64: 128, 128>}]} {
    %c0 = arith.constant 0 : index
    %c0_0 = arith.constant 0 : index
    %0 = vector.load %arg2[%c0, %c0_0] : memref<128x128xbf16, #tpu.memory_space<vmem>>, vector<128x128xbf16>
    %1 = arith.extf %0 : vector<128x128xbf16> to vector<128x128xf32>
    %c0_1 = arith.constant 0 : index
    %c0_2 = arith.constant 0 : index
    %2 = vector.load %arg3[%c0_1, %c0_2] : memref<1x128xf32, #tpu.memory_space<vmem>>, vector<1x128xf32>
    %3 = vector.broadcast %2 : vector<1x128xf32> to vector<128x128xf32>
    %4 = arith.mulf %1, %3 : vector<128x128xf32>
    %c0_3 = arith.constant 0 : index
    %c0_4 = arith.constant 0 : index
    %5 = vector.load %arg4[%c0_3, %c0_4] : memref<1x128xf32, #tpu.memory_space<vmem>>, vector<1x128xf32>
    %6 = vector.broadcast %5 : vector<1x128xf32> to vector<128x128xf32>
    %7 = arith.addf %4, %6 : vector<128x128xf32>
    %cst = arith.constant 0.000000e+00 : f32
    %8 = vector.broadcast %cst : f32 to vector<128x128xf32>
    %9 = arith.maximumf %7, %8 : vector<128x128xf32>
    %10 = arith.truncf %9 : vector<128x128xf32> to vector<128x128xbf16>
    %c0_5 = arith.constant 0 : index
    %c0_6 = arith.constant 0 : index
    %11 = vector.load %arg5[%c0_5, %c0_6] : memref<128x128xbf16, #tpu.memory_space<vmem>>, vector<128x128xbf16>
    tpu.vector_store %arg5[%c0_5, %c0_6], %10 {strides = array<i32>} : memref<128x128xbf16, #tpu.memory_space<vmem>>, vector<128x128xbf16>,
    return
  }
  func.func @transform_0(%arg0: i32, %arg1: i32) -> (i32, i32) {
    %c0_i32 = arith.constant 0 : i32
    return %arg0, %arg1 : i32, i32
  }
  func.func @transform_1(%arg0: i32, %arg1: i32) -> (i32, i32) {
    %c0_i32 = arith.constant 0 : i32
    %c0_i32_0 = arith.constant 0 : i32
    return %c0_i32, %arg1 : i32, i32
  }
  func.func @transform_2(%arg0: i32, %arg1: i32) -> (i32, i32) {
    %c0_i32 = arith.constant 0 : i32
    %c0_i32_0 = arith.constant 0 : i32
    return %c0_i32, %arg1 : i32, i32
  }
  func.func @transform_3(%arg0: i32, %arg1: i32) -> (i32, i32) {
    %c0_i32 = arith.constant 0 : i32
    return %arg0, %arg1 : i32, i32
  }
}

module attributes {stable_mosaic.version = 11 : i64} {
  func.func @_mm_stats_kernel(%arg0: i32, %arg1: i32, %arg2: i32, %arg3: memref<512x72xbf16, #tpu.memory_space<vmem>>, %arg4: memref<72x128xbf16, #tpu.memory_space<vmem>>, %arg5: memref<512x128xbf16, #tpu.memory_space<vmem>>, %arg6: memref<1x1x128xf32, #tpu.memory_space<vmem>>, %arg7: memref<1x1x128xf32, #tpu.memory_space<vmem>>, %arg8: memref<512x128xf32, #tpu.memory_space<vmem>>) attributes {dimension_semantics = [#tpu.dimension_semantics<parallel>, #tpu.dimension_semantics<parallel>, #tpu.dimension_semantics<arbitrary>], iteration_bounds = array<i64: 1, 1, 1>, scalar_prefetch = 0 : i64, scratch_operands = 1 : i64, tpu.core_type = #tpu.core_type<tc>, window_params = [{transform_indices = @transform_0, window_bounds = array<i64: 512, 72>}, {transform_indices = @transform_1, window_bounds = array<i64: 72, 128>}, {transform_indices = @transform_2, window_bounds = array<i64: 512, 128>}, {transform_indices = @transform_3, window_bounds = array<i64: 1, 1, 128>}, {transform_indices = @transform_4, window_bounds = array<i64: 1, 1, 128>}]} {
    %c0_i32 = arith.constant 0 : i32
    %0 = arith.cmpi eq, %arg2, %c0_i32 : i32
    %1 = arith.extui %0 : i1 to i32
    %c0_i32_0 = arith.constant 0 : i32
    %2 = arith.cmpi ne, %1, %c0_i32_0 : i32
    scf.if %2 {
      %cst_10 = arith.constant 0.000000e+00 : f32
      %12 = vector.broadcast %cst_10 : f32 to vector<512x128xf32>
      %c0_11 = arith.constant 0 : index
      %c0_12 = arith.constant 0 : index
      %13 = vector.load %arg8[%c0_11, %c0_12] : memref<512x128xf32, #tpu.memory_space<vmem>>, vector<512x128xf32>
      tpu.vector_store %arg8[%c0_11, %c0_12], %12 {strides = array<i32>} : memref<512x128xf32, #tpu.memory_space<vmem>>, vector<512x128xf32>,
    } else {
    }
    %c0 = arith.constant 0 : index
    %c0_1 = arith.constant 0 : index
    %3 = vector.load %arg8[%c0, %c0_1] : memref<512x128xf32, #tpu.memory_space<vmem>>, vector<512x128xf32>
    %c0_2 = arith.constant 0 : index
    %c0_3 = arith.constant 0 : index
    %4 = vector.load %arg3[%c0_2, %c0_3] : memref<512x72xbf16, #tpu.memory_space<vmem>>, vector<512x72xbf16>
    %c0_4 = arith.constant 0 : index
    %c0_5 = arith.constant 0 : index
    %5 = vector.load %arg4[%c0_4, %c0_5] : memref<72x128xbf16, #tpu.memory_space<vmem>>, vector<72x128xbf16>
    %cst = arith.constant dense<0.000000e+00> : vector<512x128xf32>
    %6 = tpu.matmul %4, %5, %cst {dimension_numbers = #tpu.dot_dimension_numbers<[1], [0], [0], [1], [0, 0, 1, 1], [], []>} : vector<512x72xbf16>, vector<72x128xbf16>, vector<512x128xf32> -> vector<512x128xf32>
    %7 = arith.addf %3, %6 : vector<512x128xf32>
    %c0_6 = arith.constant 0 : index
    %c0_7 = arith.constant 0 : index
    %8 = vector.load %arg8[%c0_6, %c0_7] : memref<512x128xf32, #tpu.memory_space<vmem>>, vector<512x128xf32>
    tpu.vector_store %arg8[%c0_6, %c0_7], %7 {strides = array<i32>} : memref<512x128xf32, #tpu.memory_space<vmem>>, vector<512x128xf32>,
    %c0_i32_8 = arith.constant 0 : i32
    %9 = arith.cmpi eq, %arg2, %c0_i32_8 : i32
    %10 = arith.extui %9 : i1 to i32
    %c0_i32_9 = arith.constant 0 : i32
    %11 = arith.cmpi ne, %10, %c0_i32_9 : i32
    scf.if %11 {
      %c0_10 = arith.constant 0 : index
      %c0_11 = arith.constant 0 : index
      %12 = vector.load %arg8[%c0_10, %c0_11] : memref<512x128xf32, #tpu.memory_space<vmem>>, vector<512x128xf32>
      %13 = arith.truncf %12 : vector<512x128xf32> to vector<512x128xbf16>
      %c0_12 = arith.constant 0 : index
      %c0_13 = arith.constant 0 : index
      %14 = vector.load %arg5[%c0_12, %c0_13] : memref<512x128xbf16, #tpu.memory_space<vmem>>, vector<512x128xbf16>
      tpu.vector_store %arg5[%c0_12, %c0_13], %13 {strides = array<i32>} : memref<512x128xbf16, #tpu.memory_space<vmem>>, vector<512x128xbf16>,
      %cst_14 = arith.constant 1.000000e+00 : f32
      %15 = vector.broadcast %cst_14 : f32 to vector<8x512xf32>
      %cst_15 = arith.constant dense<0.000000e+00> : vector<8x128xf32>
      %16 = tpu.matmul %15, %12, %cst_15 {dimension_numbers = #tpu.dot_dimension_numbers<[1], [0], [0], [1], [0, 0, 1, 1], [], []>} : vector<8x512xf32>, vector<512x128xf32>, vector<8x128xf32> -> vector<8x128xf32>
      %17 = arith.mulf %12, %12 : vector<512x128xf32>
      %cst_16 = arith.constant dense<0.000000e+00> : vector<8x128xf32>
      %18 = tpu.matmul %15, %17, %cst_16 {dimension_numbers = #tpu.dot_dimension_numbers<[1], [0], [0], [1], [0, 0, 1, 1], [], []>} : vector<8x512xf32>, vector<512x128xf32>, vector<8x128xf32> -> vector<8x128xf32>
      %19 = vector.extract_strided_slice %16 {offsets = [0, 0], sizes = [1, 128], strides = [1, 1]} : vector<8x128xf32> to vector<1x128xf32>
      %20 = vector.shape_cast %19 : vector<1x128xf32> to vector<1x1x128xf32>
      %c0_17 = arith.constant 0 : index
      %c0_18 = arith.constant 0 : index
      %c0_19 = arith.constant 0 : index
      %21 = vector.load %arg6[%c0_17, %c0_18, %c0_19] : memref<1x1x128xf32, #tpu.memory_space<vmem>>, vector<1x1x128xf32>
      tpu.vector_store %arg6[%c0_17, %c0_18, %c0_19], %20 {strides = array<i32>} : memref<1x1x128xf32, #tpu.memory_space<vmem>>, vector<1x1x128xf32>,
      %22 = vector.extract_strided_slice %18 {offsets = [0, 0], sizes = [1, 128], strides = [1, 1]} : vector<8x128xf32> to vector<1x128xf32>
      %23 = vector.shape_cast %22 : vector<1x128xf32> to vector<1x1x128xf32>
      %c0_20 = arith.constant 0 : index
      %c0_21 = arith.constant 0 : index
      %c0_22 = arith.constant 0 : index
      %24 = vector.load %arg7[%c0_20, %c0_21, %c0_22] : memref<1x1x128xf32, #tpu.memory_space<vmem>>, vector<1x1x128xf32>
      tpu.vector_store %arg7[%c0_20, %c0_21, %c0_22], %23 {strides = array<i32>} : memref<1x1x128xf32, #tpu.memory_space<vmem>>, vector<1x1x128xf32>,
    } else {
    }
    return
  }
  func.func @transform_0(%arg0: i32, %arg1: i32, %arg2: i32) -> (i32, i32) {
    %c0_i32 = arith.constant 0 : i32
    return %arg0, %arg2 : i32, i32
  }
  func.func @transform_1(%arg0: i32, %arg1: i32, %arg2: i32) -> (i32, i32) {
    %c0_i32 = arith.constant 0 : i32
    return %arg2, %arg1 : i32, i32
  }
  func.func @transform_2(%arg0: i32, %arg1: i32, %arg2: i32) -> (i32, i32) {
    %c0_i32 = arith.constant 0 : i32
    return %arg0, %arg1 : i32, i32
  }
  func.func @transform_3(%arg0: i32, %arg1: i32, %arg2: i32) -> (i32, i32, i32) {
    %c0_i32 = arith.constant 0 : i32
    %c0_i32_0 = arith.constant 0 : i32
    return %arg0, %c0_i32, %arg1 : i32, i32, i32
  }
  func.func @transform_4(%arg0: i32, %arg1: i32, %arg2: i32) -> (i32, i32, i32) {
    %c0_i32 = arith.constant 0 : i32
    %c0_i32_0 = arith.constant 0 : i32
    return %arg0, %c0_i32, %arg1 : i32, i32, i32
  }
}

module attributes {stable_mosaic.version = 11 : i64} {
  func.func @_affine_relu_kernel(%arg0: i32, %arg1: i32, %arg2: memref<512x128xbf16, #tpu.memory_space<vmem>>, %arg3: memref<1x128xf32, #tpu.memory_space<vmem>>, %arg4: memref<1x128xf32, #tpu.memory_space<vmem>>, %arg5: memref<512x128xbf16, #tpu.memory_space<vmem>>) attributes {dimension_semantics = [#tpu.dimension_semantics<parallel>, #tpu.dimension_semantics<parallel>], iteration_bounds = array<i64: 1, 1>, scalar_prefetch = 0 : i64, scratch_operands = 0 : i64, tpu.core_type = #tpu.core_type<tc>, window_params = [{transform_indices = @transform_0, window_bounds = array<i64: 512, 128>}, {transform_indices = @transform_1, window_bounds = array<i64: 1, 128>}, {transform_indices = @transform_2, window_bounds = array<i64: 1, 128>}, {transform_indices = @transform_3, window_bounds = array<i64: 512, 128>}]} {
    %c0 = arith.constant 0 : index
    %c0_0 = arith.constant 0 : index
    %0 = vector.load %arg2[%c0, %c0_0] : memref<512x128xbf16, #tpu.memory_space<vmem>>, vector<512x128xbf16>
    %1 = arith.extf %0 : vector<512x128xbf16> to vector<512x128xf32>
    %c0_1 = arith.constant 0 : index
    %c0_2 = arith.constant 0 : index
    %2 = vector.load %arg3[%c0_1, %c0_2] : memref<1x128xf32, #tpu.memory_space<vmem>>, vector<1x128xf32>
    %3 = vector.broadcast %2 : vector<1x128xf32> to vector<512x128xf32>
    %4 = arith.mulf %1, %3 : vector<512x128xf32>
    %c0_3 = arith.constant 0 : index
    %c0_4 = arith.constant 0 : index
    %5 = vector.load %arg4[%c0_3, %c0_4] : memref<1x128xf32, #tpu.memory_space<vmem>>, vector<1x128xf32>
    %6 = vector.broadcast %5 : vector<1x128xf32> to vector<512x128xf32>
    %7 = arith.addf %4, %6 : vector<512x128xf32>
    %cst = arith.constant 0.000000e+00 : f32
    %8 = vector.broadcast %cst : f32 to vector<512x128xf32>
    %9 = arith.maximumf %7, %8 : vector<512x128xf32>
    %10 = arith.truncf %9 : vector<512x128xf32> to vector<512x128xbf16>
    %c0_5 = arith.constant 0 : index
    %c0_6 = arith.constant 0 : index
    %11 = vector.load %arg5[%c0_5, %c0_6] : memref<512x128xbf16, #tpu.memory_space<vmem>>, vector<512x128xbf16>
    tpu.vector_store %arg5[%c0_5, %c0_6], %10 {strides = array<i32>} : memref<512x128xbf16, #tpu.memory_space<vmem>>, vector<512x128xbf16>,
    return
  }
  func.func @transform_0(%arg0: i32, %arg1: i32) -> (i32, i32) {
    %c0_i32 = arith.constant 0 : i32
    return %arg0, %arg1 : i32, i32
  }
  func.func @transform_1(%arg0: i32, %arg1: i32) -> (i32, i32) {
    %c0_i32 = arith.constant 0 : i32
    %c0_i32_0 = arith.constant 0 : i32
    return %c0_i32, %arg1 : i32, i32
  }
  func.func @transform_2(%arg0: i32, %arg1: i32) -> (i32, i32) {
    %c0_i32 = arith.constant 0 : i32
    %c0_i32_0 = arith.constant 0 : i32
    return %c0_i32, %arg1 : i32, i32
  }
  func.func @transform_3(%arg0: i32, %arg1: i32) -> (i32, i32) {
    %c0_i32 = arith.constant 0 : i32
    return %arg0, %arg1 : i32, i32
  }
}

module attributes {stable_mosaic.version = 11 : i64} {
  func.func @_mm_bias_tanh_kernel(%arg0: i32, %arg1: i32, %arg2: i32, %arg3: memref<2048x36xbf16, #tpu.memory_space<vmem>>, %arg4: memref<36x128xbf16, #tpu.memory_space<vmem>>, %arg5: memref<1x128xf32, #tpu.memory_space<vmem>>, %arg6: memref<2048x128xbf16, #tpu.memory_space<vmem>>, %arg7: memref<2048x128xf32, #tpu.memory_space<vmem>>) attributes {dimension_semantics = [#tpu.dimension_semantics<parallel>, #tpu.dimension_semantics<parallel>, #tpu.dimension_semantics<arbitrary>], iteration_bounds = array<i64: 1, 1, 1>, scalar_prefetch = 0 : i64, scratch_operands = 1 : i64, tpu.core_type = #tpu.core_type<tc>, window_params = [{transform_indices = @transform_0, window_bounds = array<i64: 2048, 36>}, {transform_indices = @transform_1, window_bounds = array<i64: 36, 128>}, {transform_indices = @transform_2, window_bounds = array<i64: 1, 128>}, {transform_indices = @transform_3, window_bounds = array<i64: 2048, 128>}]} {
    %c0_i32 = arith.constant 0 : i32
    %0 = arith.cmpi eq, %arg2, %c0_i32 : i32
    %1 = arith.extui %0 : i1 to i32
    %c0_i32_0 = arith.constant 0 : i32
    %2 = arith.cmpi ne, %1, %c0_i32_0 : i32
    scf.if %2 {
      %cst_10 = arith.constant 0.000000e+00 : f32
      %12 = vector.broadcast %cst_10 : f32 to vector<2048x128xf32>
      %c0_11 = arith.constant 0 : index
      %c0_12 = arith.constant 0 : index
      %13 = vector.load %arg7[%c0_11, %c0_12] : memref<2048x128xf32, #tpu.memory_space<vmem>>, vector<2048x128xf32>
      tpu.vector_store %arg7[%c0_11, %c0_12], %12 {strides = array<i32>} : memref<2048x128xf32, #tpu.memory_space<vmem>>, vector<2048x128xf32>,
    } else {
    }
    %c0 = arith.constant 0 : index
    %c0_1 = arith.constant 0 : index
    %3 = vector.load %arg7[%c0, %c0_1] : memref<2048x128xf32, #tpu.memory_space<vmem>>, vector<2048x128xf32>
    %c0_2 = arith.constant 0 : index
    %c0_3 = arith.constant 0 : index
    %4 = vector.load %arg3[%c0_2, %c0_3] : memref<2048x36xbf16, #tpu.memory_space<vmem>>, vector<2048x36xbf16>
    %c0_4 = arith.constant 0 : index
    %c0_5 = arith.constant 0 : index
    %5 = vector.load %arg4[%c0_4, %c0_5] : memref<36x128xbf16, #tpu.memory_space<vmem>>, vector<36x128xbf16>
    %cst = arith.constant dense<0.000000e+00> : vector<2048x128xf32>
    %6 = tpu.matmul %4, %5, %cst {dimension_numbers = #tpu.dot_dimension_numbers<[1], [0], [0], [1], [0, 0, 1, 1], [], []>} : vector<2048x36xbf16>, vector<36x128xbf16>, vector<2048x128xf32> -> vector<2048x128xf32>
    %7 = arith.addf %3, %6 : vector<2048x128xf32>
    %c0_6 = arith.constant 0 : index
    %c0_7 = arith.constant 0 : index
    %8 = vector.load %arg7[%c0_6, %c0_7] : memref<2048x128xf32, #tpu.memory_space<vmem>>, vector<2048x128xf32>
    tpu.vector_store %arg7[%c0_6, %c0_7], %7 {strides = array<i32>} : memref<2048x128xf32, #tpu.memory_space<vmem>>, vector<2048x128xf32>,
    %c0_i32_8 = arith.constant 0 : i32
    %9 = arith.cmpi eq, %arg2, %c0_i32_8 : i32
    %10 = arith.extui %9 : i1 to i32
    %c0_i32_9 = arith.constant 0 : i32
    %11 = arith.cmpi ne, %10, %c0_i32_9 : i32
    scf.if %11 {
      %c0_10 = arith.constant 0 : index
      %c0_11 = arith.constant 0 : index
      %12 = vector.load %arg7[%c0_10, %c0_11] : memref<2048x128xf32, #tpu.memory_space<vmem>>, vector<2048x128xf32>
      %c0_12 = arith.constant 0 : index
      %c0_13 = arith.constant 0 : index
      %13 = vector.load %arg5[%c0_12, %c0_13] : memref<1x128xf32, #tpu.memory_space<vmem>>, vector<1x128xf32>
      %14 = vector.broadcast %13 : vector<1x128xf32> to vector<2048x128xf32>
      %15 = arith.addf %12, %14 : vector<2048x128xf32>
      %16 = math.tanh %15 : vector<2048x128xf32>
      %17 = arith.truncf %16 : vector<2048x128xf32> to vector<2048x128xbf16>
      %c0_14 = arith.constant 0 : index
      %c0_15 = arith.constant 0 : index
      %18 = vector.load %arg6[%c0_14, %c0_15] : memref<2048x128xbf16, #tpu.memory_space<vmem>>, vector<2048x128xbf16>
      tpu.vector_store %arg6[%c0_14, %c0_15], %17 {strides = array<i32>} : memref<2048x128xbf16, #tpu.memory_space<vmem>>, vector<2048x128xbf16>,
    } else {
    }
    return
  }
  func.func @transform_0(%arg0: i32, %arg1: i32, %arg2: i32) -> (i32, i32) {
    %c0_i32 = arith.constant 0 : i32
    return %arg0, %arg2 : i32, i32
  }
  func.func @transform_1(%arg0: i32, %arg1: i32, %arg2: i32) -> (i32, i32) {
    %c0_i32 = arith.constant 0 : i32
    return %arg2, %arg1 : i32, i32
  }
  func.func @transform_2(%arg0: i32, %arg1: i32, %arg2: i32) -> (i32, i32) {
    %c0_i32 = arith.constant 0 : i32
    %c0_i32_0 = arith.constant 0 : i32
    return %c0_i32, %arg1 : i32, i32
  }
  func.func @transform_3(%arg0: i32, %arg1: i32, %arg2: i32) -> (i32, i32) {
    %c0_i32 = arith.constant 0 : i32
    return %arg0, %arg1 : i32, i32
  }
}

</mosaic_0001>

<bundles_post_ra>
// kernel: generator_forward.8
= control target key start
LH: loop header
LB: loop body
LE: loop exit
PB: predicated region body
PF: predicated region fallthrough
CT: control target
= control target key end

     0   :  { %9 = vsyncpa [#allocation3], 0  ;;  %s635_s0 = inlined_call_operand.vmem [shape: bf16[2,32], index: 0, kind: input, shape index: {}]   ;;  %s636_s1 = inlined_call_operand.hbm [shape: bf16[32,512], index: 1, kind: input, shape index: {}]   ;;  %s637_s2 = inlined_call_operand.hbm [shape: f32[1,512], index: 2, kind: input, shape index: {}]   ;;  %s638_s3 = inlined_call_operand.hbm [shape: f32[1,512], index: 3, kind: input, shape index: {}]   ;;  %s639_s4 = inlined_call_operand.vmem [shape: bf16[2,512], index: 4, kind: output, shape index: {}]  }
   0x1   :  { %10 = vsyncpa [#allocation5], 0  ;;  %s31_s17 = sshll.u32 %s637_s2, 4  ;;  %s518_s18 = smov [#allocation4]   ;;  %s32_s17 = int_to_ptr.hbm [resolvable:$true] %s31_s17 }
   0x2   :  { %s33_s19 = sshll.u32 %s518_s18, 4  ;;  %s17_s22 = sshll.u32 %s636_s1, 4  ;;  %s34_s19 = int_to_ptr.vmem [resolvable:$true] %s33_s19  ;;  %s18_s22 = int_to_ptr.hbm [resolvable:$true] %s17_s22 }
   0x3   :  { %36 = dma.hbm_to_vmem [thread:$0]  %s32_s17, 64, %s34_s19, [#allocation5]  }
   0x4   :  { %s519_s23 = smov [#allocation2]   ;;  %s520_s25 = smov 256  }
   0x5   :  { %s19_s24 = sshll.u32 %s519_s23, 4  ;;  %s521_s26 = smov 16   ;;  %s20_s24 = int_to_ptr.vmem [resolvable:$true] %s19_s24 }
   0x6   :  { %25 = dma.hbm_to_vmem [thread:$0]  %s18_s22, 1024, %s20_s24, [#allocation3], %s520_s25, %s520_s25, %s521_s26  }
   0x7   :  { %s42_s2 = sshll.u32 %s638_s3, 4  ;;  %s522_s29 = smov [#allocation6]   ;;  %s43_s2 = int_to_ptr.hbm [resolvable:$true] %s42_s2 }
   0x8   :  { %s44_s30 = sshll.u32 %s522_s29, 4  ;;  %s45_s30 = int_to_ptr.vmem [resolvable:$true] %s44_s30 }
   0x9   :  { %47 = dma.hbm_to_vmem [thread:$0]  %s43_s2, 64, %s45_s30, [#allocation5]  }
   0xa   :  { %514 = dma.done.wait [#allocation3], 1024  }
   0xb   :  { %515 = vsyncadd [#allocation3], 4294966272 }
   0xc   :  { %516 = dma.done.wait [#allocation5], 128  }
   0xd   :  { %517 = vsyncadd [#allocation5], 4294967168  ;;  %v400_v0 = vld [vmem:[#allocation2 + $0x20] sm:$0xf]  ;;  %v424_v1 = vld [vmem:[#allocation2 + $0x2c] sm:$0xf0] }
   0xe   :  { %v422_v2 = vld [vmem:[#allocation2 + $0x24] sm:$0xf]  ;;  %v401_v3 = vor.u32 %v424_v1, %v400_v0  ;;  %v402_v4 = vld [vmem:[#allocation2 + $0x30] sm:$0xf0]  ;;  %v408_v5 = vld [vmem:[#allocation2 + $0x28] sm:$0xf] }
   0xf   :  { %v425_v6 = vld [vmem:[#allocation2 + $0x34] sm:$0xf0]  ;;  %v405_v7 = vor.u32 %v422_v2, %v402_v4  ;;  %v423_v9 = vld [vmem:[#allocation2 + $0x2c] sm:$0xf]  ;;  %v410_v10 = vld [vmem:[#allocation2 + $0x38] sm:$0xf0] }
  0x10   :  { %v409_v8 = vor.u32 %v425_v6, %v408_v5  ;;  %v384_v11 = vld [vmem:[#allocation2] sm:$0xf]  ;;  %120 = vmatpush.bf16.msra.mxu0 %v401_v3  ;;  %v413_v12 = vor.u32 %v423_v9, %v410_v10  ;;  %v420_v13 = vld [vmem:[#allocation2 + $0xc] sm:$0xf0]  ;;  %v418_v14 = vld [vmem:[#allocation2 + $0x4] sm:$0xf] }
  0x11   :  { %v386_v15 = vld [vmem:[#allocation2 + $0x10] sm:$0xf0]  ;;  %133 = vmatpush.bf16.msra.mxu1 %v405_v7  ;;  %v385_v16 = vor.u32 %v420_v13, %v384_v11  ;;  %v392_v18 = vld [vmem:[#allocation2 + $0x8] sm:$0xf]  ;;  %v421_v19 = vld [vmem:[#allocation2 + $0x14] sm:$0xf0] }
  0x12   :  { %146 = vmatpush.bf16.msra.mxu2 %v409_v8  ;;  %v389_v17 = vor.u32 %v418_v14, %v386_v15  ;;  %v419_v20 = vld [vmem:[#allocation2 + $0xc] sm:$0xf]  ;;  %159 = vmatpush.bf16.msra.mxu3 %v413_v12  ;;  %v393_v21 = vor.u32 %v421_v19, %v392_v18  ;;  %v394_v22 = vld [vmem:[#allocation2 + $0x18] sm:$0xf0]  ;;  %v61_v24 = vld [vmem:[%s635_s0] sm:$0x1] }
  0x13   :  { %v397_v23 = vor.u32 %v419_v20, %v394_v22  ;;  %vm110_vm0 = vcmask 261120   ;;  %v523_v25 = vmov 2.0   ;;  %vm166_vm1 = vcmask 1041408  }
  0x14   :  { %121 = vmatpush.bf16.msra.mxu0 %v385_v16  ;;  %432 = vrcp.f32 %v523_v25  ;;  %vm306_vm14 = vcmask 1040384   ;;  %vm308_vm15 = vcmask 1042434  }
  0x15   :  { %134 = vmatpush.bf16.msra.mxu1 %v389_v17 }
  0x16   :  { %147 = vmatpush.bf16.msra.mxu2 %v393_v21  ;;  %160 = vmatpush.bf16.msra.mxu3 %v397_v23 }
  0x17   :  { %414 = vmatmul.msk.bf16.vlgmr.msra.gmra.mxu0 %vm110_vm0, %v61_v24 }
  0x18   :  { %415 = vmatmul.msk.bf16.vlgmr.msra.gmra.mxu1 %vm110_vm0, %v61_v24 }
  0x19   :  { %416 = vmatmul.msk.bf16.vlgmr.msra.gmra.mxu2 %vm110_vm0, %v61_v24  ;;  %417 = vmatmul.msk.bf16.vlgmr.msra.gmra.mxu3 %vm110_vm0, %v61_v24 }
  0x1a   :  { %v433_v26 = vpop.eup %432 }
  0x1b   :  { %v196_v27 = vmul.f32 2.0, %v433_v26  ;;  %vm200_vm2 = vweird.f32 %v433_v26 }
  0x1d   :  { %v197_v28 = vsub.f32 1.0, %v196_v27 }
  0x1f   :  { %v198_v29 = vmul.f32 %v433_v26, %v197_v28 }
  0x21   :  { %v199_v37 = vadd.f32 %v433_v26, %v198_v29 }
  0x23   :  { %v575_v47 = vsel %vm200_vm2, %v433_v26, %v199_v37 }
  0x94   :  { %v561_v30 = vpop.f32.mrf.mxu0 }
  0x95   :  { %v167_v31 = vsel %vm166_vm1, %v561_v30, 0.0  ;;  %v206_v32 = vmul.f32 %v561_v30, %v561_v30  ;;  %v567_v33 = vpop.f32.mrf.mxu1 }
  0x96   :  { %v168_v34 = vrot.slane %v167_v31, 4  ;;  %v174_v35 = vsel %vm166_vm1, %v567_v33, 0.0  ;;  %v207_v36 = vmul.f32 %v567_v33, %v567_v33 }
  0x97   :  { %v210_v38 = vsel %vm166_vm1, %v206_v32, 0.0  ;;  %v175_v39 = vrot.slane %v174_v35, 4 }
  0x98   :  { %v169_v40 = vadd.f32 %v168_v34, %v167_v31  ;;  %v211_v41 = vrot.slane %v210_v38, 4  ;;  %v217_v42 = vsel %vm166_vm1, %v207_v36, 0.0 }
  0x99   :  { %v176_v43 = vadd.f32 %v175_v39, %v174_v35  ;;  %v218_v44 = vrot.slane %v217_v42, 4 }
  0x9a   :  { %v170_v45 = vrot.slane %v169_v40, 2  ;;  %v212_v46 = vadd.f32 %v211_v41, %v210_v38 }
  0x9b   :  { %v177_v48 = vrot.slane %v176_v43, 2  ;;  %v219_v49 = vadd.f32 %v218_v44, %v217_v42 }
  0x9c   :  { %v577_v50 = vpop.f32.mrf.mxu2  ;;  %v171_v51 = vadd.f32 %v170_v45, %v169_v40  ;;  %v213_v52 = vrot.slane %v212_v46, 2  ;;  %v583_v55 = vpop.f32.mrf.mxu3 }
  0x9d   :  { %v181_v53 = vsel %vm166_vm1, %v577_v50, 0.0  ;;  %v208_v54 = vmul.f32 %v577_v50, %v577_v50  ;;  %v125_v56 = vpop.f32.mrf.mxu0  ;;  %v178_v57 = vadd.f32 %v177_v48, %v176_v43  ;;  %v220_v58 = vrot.slane %v219_v49, 2  ;;  %v138_v61 = vpop.f32.mrf.mxu1 }
  0x9e   :  { %v182_v59 = vrot.slane %v181_v53, 4  ;;  %v188_v60 = vsel %vm166_vm1, %v583_v55, 0.0  ;;  %v172_v62 = vrot.slane %v171_v51, 1  ;;  %v214_v63 = vadd.f32 %v213_v52, %v212_v46 }
  0x9f   :  { %v224_v0 = vsel %vm166_vm1, %v208_v54, 0.0  ;;  %v189_v1 = vrot.slane %v188_v60, 4  ;;  %v179_v2 = vrot.slane %v178_v57, 1  ;;  %v221_v3 = vadd.f32 %v220_v58, %v219_v49 }
  0xa0   :  { %v183_v4 = vadd.f32 %v182_v59, %v181_v53  ;;  %v225_v5 = vrot.slane %v224_v0, 4  ;;  %v173_v6 = vadd.f32 %v172_v62, %v171_v51  ;;  %v215_v7 = vrot.slane %v214_v63, 1 }
  0xa1   :  { %v190_v8 = vadd.f32 %v189_v1, %v188_v60  ;;  %v209_v9 = vmul.f32 %v583_v55, %v583_v55  ;;  %v180_v10 = vadd.f32 %v179_v2, %v178_v57  ;;  %v222_v11 = vrot.slane %v221_v3, 1 }
  0xa2   :  { %v184_v12 = vrot.slane %v183_v4, 2  ;;  %v226_v13 = vadd.f32 %v225_v5, %v224_v0  ;;  %v591_v14 = vmul.f32 %v575_v47, %v173_v6  ;;  %v216_v15 = vadd.f32 %v215_v7, %v214_v63 }
  0xa3   :  { %v191_v16 = vrot.slane %v190_v8, 2  ;;  %v231_v17 = vsel %vm166_vm1, %v209_v9, 0.0  ;;  %v595_v18 = vmul.f32 %v575_v47, %v180_v10  ;;  %v223_v19 = vadd.f32 %v222_v11, %v221_v3 }
  0xa4   :  { %v185_v20 = vadd.f32 %v184_v12, %v183_v4  ;;  %v227_v21 = vrot.slane %v226_v13, 2  ;;  %v151_v22 = vpop.f32.mrf.mxu2  ;;  %v238_v23 = vmul.f32 %v216_v15, %v575_v47  ;;  %v242_v24 = vmul.f32 %v591_v14, %v591_v14  ;;  %v164_v27 = vpop.f32.mrf.mxu3 }
  0xa5   :  { %v192_v25 = vadd.f32 %v191_v16, %v190_v8  ;;  %v232_v26 = vrot.slane %v231_v17, 4  ;;  %v239_v28 = vmul.f32 %v223_v19, %v575_v47  ;;  %v243_v29 = vmul.f32 %v595_v18, %v595_v18 }
  0xa6   :  { %v186_v31 = vrot.slane %v185_v20, 1  ;;  %v228_v32 = vadd.f32 %v227_v21, %v226_v13  ;;  %v246_v34 = vsub.f32 %v238_v23, %v242_v24 }
  0xa7   :  { %v193_v35 = vrot.slane %v192_v25, 1  ;;  %v233_v36 = vadd.f32 %v232_v26, %v231_v17  ;;  %v247_v37 = vsub.f32 %v239_v28, %v243_v29 }
  0xa8   :  { %v187_v38 = vadd.f32 %v186_v31, %v185_v20  ;;  %v229_v39 = vrot.slane %v228_v32, 1  ;;  %v250_v40 = vmax.f32 %v246_v34, 0.0  ;;  %v254_v34 = vld [vmem:[#allocation4] sm:$0xf] }
  0xa9   :  { %v194_v41 = vadd.f32 %v193_v35, %v192_v25  ;;  %v234_v42 = vrot.slane %v233_v36, 2  ;;  %v251_v43 = vmax.f32 %v247_v37, 0.0 }
  0xaa   :  { %v604_v44 = vmul.f32 %v575_v47, %v187_v38  ;;  %v230_v45 = vadd.f32 %v229_v39, %v228_v32  ;;  %v255_v46 = vadd.f32 1e-05, %v250_v40 }
  0xab   :  { %v607_v48 = vmul.f32 %v575_v47, %v194_v41  ;;  %v235_v49 = vadd.f32 %v234_v42, %v233_v36  ;;  %v256_v51 = vadd.f32 1e-05, %v251_v43 }
  0xac   :  { %v240_v52 = vmul.f32 %v230_v45, %v575_v47  ;;  %v244_v53 = vmul.f32 %v604_v44, %v604_v44  ;;  %vm265_vm13 = vweird.f32 %v255_v46 }
  0xad   :  { %v236_v54 = vrot.slane %v235_v49, 1  ;;  %434 = vrsqrt.f32 %v256_v51  ;;  %v245_v58 = vmul.f32 %v607_v48, %v607_v48  ;;  %vm275_vm5 = vweird.f32 %v256_v51 }
  0xae   :  { %v248_v56 = vsub.f32 %v240_v52, %v244_v53  ;;  %436 = vrsqrt.f32 %v255_v46 }
  0xaf   :  { %v237_v57 = vadd.f32 %v236_v54, %v235_v49 }
  0xb0   :  { %v252_v59 = vmax.f32 %v248_v56, 0.0  ;;  %v313_v56 = vld [vmem:[#allocation6] sm:$0xf] }
  0xb1   :  { %v241_v60 = vmul.f32 %v237_v57, %v575_v47 }
  0xb2   :  { %v257_v61 = vadd.f32 1e-05, %v252_v59 }
  0xb3   :  { %v249_v62 = vsub.f32 %v241_v60, %v245_v58  ;;  %v435_v63 = vpop.eup %434 }
  0xb4   :  { %438 = vrsqrt.f32 %v257_v61  ;;  %v437_v0 = vpop.eup %436  ;;  %v270_v1 = vmul.f32 %v435_v63, %v256_v51  ;;  %vm276_vm3 = vweird.f32 %v435_v63  ;;  %vm285_vm7 = vweird.f32 %v257_v61 }
  0xb5   :  { %v253_v2 = vmax.f32 %v249_v62, 0.0  ;;  %v260_v5 = vmul.f32 %v437_v0, %v255_v46  ;;  %vm277_vm6 = vmor %vm275_vm5, %vm276_vm3  ;;  %vm266_vm10 = vweird.f32 %v437_v0 }
  0xb6   :  { %v271_v3 = vmul.f32 %v435_v63, %v270_v1  ;;  %vm267_vm0 = vmor %vm265_vm13, %vm266_vm10 }
  0xb7   :  { %v258_v4 = vadd.f32 1e-05, %v253_v2  ;;  %v261_v9 = vmul.f32 %v437_v0, %v260_v5 }
  0xb8   :  { %v272_v7 = vmul.f32 0.5, %v271_v3 }
  0xb9   :  { %440 = vrsqrt.f32 %v258_v4  ;;  %v262_v47 = vmul.f32 0.5, %v261_v9  ;;  %vm295_vm11 = vweird.f32 %v258_v4 }
  0xba   :  { %v439_v6 = vpop.eup %438  ;;  %v273_v11 = vsub.f32 1.5, %v272_v7 }
  0xbb   :  { %v280_v8 = vmul.f32 %v439_v6, %v257_v61  ;;  %vm286_vm4 = vweird.f32 %v439_v6  ;;  %v263_v21 = vsub.f32 1.5, %v262_v47 }
  0xbc   :  { %v274_v17 = vmul.f32 %v435_v63, %v273_v11  ;;  %vm287_vm8 = vmor %vm285_vm7, %vm286_vm4 }
  0xbd   :  { %v281_v10 = vmul.f32 %v439_v6, %v280_v8  ;;  %v264_v26 = vmul.f32 %v437_v0, %v263_v21 }
  0xbe   :  { %v278_v23 = vsel %vm277_vm6, %v435_v63, %v274_v17 }
  0xbf   :  { %v441_v12 = vpop.eup %440  ;;  %v282_v13 = vmul.f32 0.5, %v281_v10  ;;  %v303_v28 = vrot.slane %v278_v23, 7  ;;  %v268_v35 = vsel %vm267_vm0, %v437_v0, %v264_v26 }
  0xc0   :  { %v290_v15 = vmul.f32 %v441_v12, %v258_v4  ;;  %vm296_vm9 = vweird.f32 %v441_v12 }
  0xc1   :  { %v283_v16 = vsub.f32 1.5, %v282_v13  ;;  %vm297_vm12 = vmor %vm295_vm11, %vm296_vm9  ;;  %v307_v36 = vsel %vm306_vm14, %v268_v35, %v303_v28 }
  0xc2   :  { %v291_v19 = vmul.f32 %v441_v12, %v290_v15 }
  0xc3   :  { %v284_v20 = vmul.f32 %v439_v6, %v283_v16 }
  0xc4   :  { %v292_v22 = vmul.f32 0.5, %v291_v19 }
  0xc5   :  { %v288_v24 = vsel %vm287_vm8, %v439_v6, %v284_v20 }
  0xc6   :  { %v293_v25 = vsub.f32 1.5, %v292_v22  ;;  %v304_v29 = vrot.slane %v288_v24, 6 }
  0xc8   :  { %v294_v27 = vmul.f32 %v441_v12, %v293_v25 }
  0xca   :  { %v298_v31 = vsel %vm297_vm12, %v441_v12, %v294_v27 }
  0xcb   :  { %v305_v32 = vrot.slane %v298_v31, 5 }
  0xcd   :  { %v309_v37 = vsel %vm308_vm15, %v304_v29, %v305_v32 }
  0xce   :  { %v310_v38 = vsel %vm166_vm1, %v307_v36, %v309_v37 }
  0xcf   :  { %v312_v39 = vmul.f32 %v310_v38, %v254_v34 }
  0xd1   :  { %v315_v40 = vperm.slane %v312_v39, 0  ;;  %v316_v41 = vperm.slane %v312_v39, 1  ;;  %v317_v42 = vperm.slane %v312_v39, 2  ;;  %v318_v43 = vperm.slane %v312_v39, 3 }
  0xd3   :  { %v324_v45 = vmul.f32 %v316_v41, %v595_v18  ;;  %v325_v46 = vmul.f32 %v317_v42, %v604_v44  ;;  %v326_v49 = vmul.f32 %v318_v43, %v607_v48  ;;  %v323_v51 = vmul.f32 %v315_v40, %v591_v14 }
  0xd4   :  { %v339_v61 = vmul.f32 %v315_v40, %v561_v30  ;;  %v340_v18 = vmul.f32 %v316_v41, %v567_v33  ;;  %v341_v44 = vmul.f32 %v317_v42, %v577_v50  ;;  %v342_v48 = vmul.f32 %v318_v43, %v583_v55 }
  0xd5   :  { %v331_v52 = vrot.slane %v324_v45, 7  ;;  %v332_v53 = vrot.slane %v325_v46, 6  ;;  %v333_v54 = vrot.slane %v326_v49, 5 }
  0xd7   :  { %v334_v57 = vsel %vm306_vm14, %v323_v51, %v331_v52  ;;  %v335_v58 = vsel %vm308_vm15, %v332_v53, %v333_v54 }
  0xd8   :  { %v336_v59 = vsel %vm166_vm1, %v334_v57, %v335_v58 }
  0xd9   :  { %v338_v60 = vsub.f32 %v313_v56, %v336_v59 }
  0xdb   :  { %v344_v14 = vperm.slane %v338_v60, 0  ;;  %v345_v62 = vperm.slane %v338_v60, 1  ;;  %v346_v63 = vperm.slane %v338_v60, 2  ;;  %v347_v0 = vperm.slane %v338_v60, 3 }
  0xdd   :  { %v352_v1 = vadd.f32 %v344_v14, %v339_v61  ;;  %v353_v2 = vadd.f32 %v345_v62, %v340_v18  ;;  %v354_v3 = vadd.f32 %v346_v63, %v341_v44  ;;  %v355_v4 = vadd.f32 %v347_v0, %v342_v48 }
  0xdf   :  { %v356_v5 = vmax.f32 %v352_v1, 0.0  ;;  %v357_v6 = vmax.f32 %v353_v2, 0.0  ;;  %v358_v7 = vmax.f32 %v354_v3, 0.0  ;;  %v359_v8 = vmax.f32 %v355_v4, 0.0 }
  0xe1   :  { %v360_v9 = vpack.c.bf16 %v357_v6, %v356_v5  ;;  %v361_v30 = vpack.c.bf16 %v359_v8, %v358_v7 }
  0xe3   :  { %v364_v10 = vrot.slane %v360_v9, 3  ;;  %v365_v33 = vrot.slane %v361_v30, 6  ;;  %v366_v11 = vrot.slane %v361_v30, 1 }
  0xe5   :  { %v369_v50 = vsel %vm306_vm14, %v360_v9, %v364_v10  ;;  %v372_v55 = vsel %vm308_vm15, %v365_v33, %v366_v11 }
  0xe6   :  { %v373_v12 = vsel %vm166_vm1, %v369_v50, %v372_v55 }
  0xe7   :  { %375 = vst [vmem:[%s639_s4] sm:$0xf] %v373_v12 }
  0xe8   :  { %380 = vsyncpa [#allocation3], 1 }
  0xe9   :  { %381 = vsyncpa [#allocation5], 1 }

// kernel: generator_forward.9
= control target key start
LH: loop header
LB: loop body
LE: loop exit
PB: predicated region body
PF: predicated region fallthrough
CT: control target
= control target key end

     0   :  { %10 = vsyncpa [#allocation4], 0  ;;  %s539_s18 = smov [#allocation3]   ;;  %s540_s20 = smov 64   ;;  %s623_s0 = inlined_call_operand.vmem [shape: bf16[32,288], index: 0, kind: input, shape index: {}]   ;;  %s624_s1 = inlined_call_operand.hbm [shape: bf16[288,128], index: 1, kind: input, shape index: {}]   ;;  %s625_s2 = inlined_call_operand.vmem [shape: bf16[32,128], index: 2, kind: output, shape index: {0}]   ;;  %s626_s3 = inlined_call_operand.vmem [shape: f32[1,1,128], index: 3, kind: output, shape index: {1}]   ;;  %s627_s4 = inlined_call_operand.vmem [shape: f32[1,1,128], index: 4, kind: output, shape index: {2}]  }
   0x1   :  { %s17_s17 = sshll.u32 %s624_s1, 4  ;;  %s19_s19 = sshll.u32 %s539_s18, 4  ;;  %s18_s17 = int_to_ptr.hbm [resolvable:$true] %s17_s17  ;;  %s20_s19 = int_to_ptr.vmem [resolvable:$true] %s19_s19 }
   0x2   :  { %s541_s21 = smov 4  }
   0x3   :  { %25 = dma.hbm_to_vmem [thread:$0]  %s18_s17, 2304, %s20_s19, [#allocation4], %s540_s20, %s540_s20, %s541_s21  }
   0x4   :  { %537 = dma.done.wait [#allocation4], 2304  }
   0x5   :  { %538 = vsyncadd [#allocation4], 4294964992  ;;  %v487_v0 = vld [vmem:[#allocation3 + $0x38] sm:$0xff]  ;;  %v486_v2 = vld [vmem:[#allocation3 + $0x30] sm:$0xff]  ;;  %vm225_vm0 = vcmask 261120   ;;  %v542_v59 = vmov 1.0  }
   0x6   :  { %v495_v1 = vld [vmem:[#allocation3 + $0x78] sm:$0xff]  ;;  %232 = vmatpush.bf16.msra.mxu0 %v487_v0  ;;  %v494_v3 = vld [vmem:[#allocation3 + $0x70] sm:$0xff]  ;;  %v497_v4 = vld [vmem:[#allocation3 + $0x88] sm:$0xff] }
   0x7   :  { %251 = vmatpush.bf16.msra.mxu1 %v495_v1  ;;  %276 = vmatpush.bf16.msra.mxu2 %v497_v4  ;;  %v496_v5 = vld [vmem:[#allocation3 + $0x80] sm:$0xff]  ;;  %v384_v6 = vld [vmem:[%s623_s0 + $0x8] sm:$0xf]  ;;  %v476_v7 = vld [vmem:[%s623_s0 + $0x10] sm:$0xf0] }
   0x8   :  { %v485_v8 = vld [vmem:[#allocation3 + $0x28] sm:$0xff]  ;;  %v385_v10 = vor.u32 %v476_v7, %v384_v6  ;;  %v484_v11 = vld [vmem:[#allocation3 + $0x20] sm:$0xff]  ;;  %v483_v13 = vld [vmem:[#allocation3 + $0x18] sm:$0xff] }
   0x9   :  { %v493_v9 = vld [vmem:[#allocation3 + $0x68] sm:$0xff]  ;;  %v492_v12 = vld [vmem:[#allocation3 + $0x60] sm:$0xff]  ;;  %v491_v14 = vld [vmem:[#allocation3 + $0x58] sm:$0xff] }
   0xa   :  { %233 = vmatpush.bf16.msra.mxu0 %v486_v2  ;;  %v482_v15 = vld [vmem:[#allocation3 + $0x10] sm:$0xff]  ;;  %v396_v17 = vld [vmem:[%s623_s0 + $0x20] sm:$0xf]  ;;  %v479_v18 = vld [vmem:[%s623_s0 + $0x28] sm:$0xf0] }
   0xb   :  { %252 = vmatpush.bf16.msra.mxu1 %v494_v3  ;;  %277 = vmatpush.bf16.msra.mxu2 %v496_v5  ;;  %v490_v16 = vld [vmem:[#allocation3 + $0x50] sm:$0xff]  ;;  %v481_v19 = vld [vmem:[#allocation3 + $0x8] sm:$0xff]  ;;  %v397_v21 = vor.u32 %v479_v18, %v396_v17  ;;  %v480_v22 = vld [vmem:[#allocation3] sm:$0xff] }
   0xc   :  { %v489_v20 = vld [vmem:[#allocation3 + $0x48] sm:$0xff]  ;;  %v488_v23 = vld [vmem:[#allocation3 + $0x40] sm:$0xff]  ;;  %v378_v27 = vld [vmem:[%s623_s0 + $0xc] sm:$0xf0] }
   0xd   :  { %v376_v24 = vld [vmem:[%s623_s0] sm:$0xf]  ;;  %v475_v25 = vld [vmem:[%s623_s0 + $0x8] sm:$0xf0]  ;;  %v474_v26 = vld [vmem:[%s623_s0 + $0x4] sm:$0xf] }
   0xe   :  { %234 = vmatpush.bf16.msra.mxu0 %v485_v8  ;;  %470 = vmatmul.msk.bf16.vlgmr.msra.gmra.mxu2 %vm225_vm0, %v385_v10  ;;  %v377_v28 = vor.u32 %v475_v25, %v376_v24  ;;  %v381_v29 = vor.u32 %v474_v26, %v378_v27  ;;  %v388_v30 = vld [vmem:[%s623_s0 + $0x18] sm:$0xf]  ;;  %v478_v31 = vld [vmem:[%s623_s0 + $0x20] sm:$0xf0]  ;;  %v477_v32 = vld [vmem:[%s623_s0 + $0x1c] sm:$0xf] }
   0xf   :  { %253 = vmatpush.bf16.msra.mxu1 %v493_v9  ;;  %v390_v33 = vld [vmem:[%s623_s0 + $0x24] sm:$0xf0]  ;;  %v389_v34 = vor.u32 %v478_v31, %v388_v30 }
  0x10   :  { %v393_v35 = vor.u32 %v477_v32, %v390_v33 }
  0x12   :  { %235 = vmatpush.bf16.msra.mxu0 %v484_v11 }
  0x13   :  { %254 = vmatpush.bf16.msra.mxu1 %v492_v12 }
  0x16   :  { %236 = vmatpush.bf16.msra.mxu0 %v483_v13 }
  0x17   :  { %255 = vmatpush.bf16.msra.mxu1 %v491_v14 }
  0x1a   :  { %237 = vmatpush.bf16.msra.mxu0 %v482_v15 }
  0x1b   :  { %256 = vmatpush.bf16.msra.mxu1 %v490_v16 }
  0x1e   :  { %238 = vmatpush.bf16.msra.mxu0 %v481_v19  ;;  %471 = vmatmul.msk.bf16.gmra.mxu2 %vm225_vm0, %v397_v21 }
  0x1f   :  { %257 = vmatpush.bf16.msra.mxu1 %v489_v20 }
  0x22   :  { %239 = vmatpush.bf16.msra.mxu0 %v480_v22 }
  0x23   :  { %258 = vmatpush.bf16.msra.mxu1 %v488_v23 }
  0x25   :  { %240 = vmatmul.bf16.vlgmr.msra.gmra.mxu0 %v377_v28 }
  0x26   :  { %259 = vmatmul.bf16.vlgmr.msra.gmra.mxu1 %v381_v29 }
  0x35   :  { %245 = vmatmul.bf16.gmra.mxu0 %v389_v34 }
  0x36   :  { %264 = vmatmul.bf16.gmra.mxu1 %v393_v35 }
  0x91   :  { %v279_v36 = vpop.f32.mrf.mxu2 }
  0x99   :  { %v281_v39 = vpop.f32.mrf.mxu2 }
  0xa1   :  { %v284_v47 = vpop.f32.mrf.mxu2 }
  0xa2   :  { %v241_v37 = vpop.f32.mrf.mxu0 }
  0xa3   :  { %v260_v38 = vpop.f32.mrf.mxu1 }
  0xa4   :  { %v261_v40 = vadd.f32 %v260_v38, %v241_v37 }
  0xa6   :  { %v280_v44 = vadd.f32 %v279_v36, %v261_v40 }
  0xa8   :  { %v335_v62 = vmul.f32 %v280_v44, %v280_v44 }
  0xa9   :  { %v286_v54 = vpop.f32.mrf.mxu2 }
  0xaa   :  { %v243_v41 = vpop.f32.mrf.mxu0 }
  0xab   :  { %v262_v42 = vpop.f32.mrf.mxu1 }
  0xac   :  { %v263_v43 = vadd.f32 %v262_v42, %v243_v41 }
  0xae   :  { %v282_v45 = vadd.f32 %v281_v39, %v263_v43 }
  0xb0   :  { %v501_v46 = vpack.c.bf16 %v282_v45, %v280_v44  ;;  %v336_v61 = vmul.f32 %v282_v45, %v282_v45 }
  0xb2   :  { %502 = vst [vmem:[%s625_s2] sm:$0xff] %v501_v46   ;;  %v246_v48 = vpop.f32.mrf.mxu0 }
  0xb3   :  { %v265_v49 = vpop.f32.mrf.mxu1 }
  0xb4   :  { %v266_v50 = vadd.f32 %v265_v49, %v246_v48 }
  0xb6   :  { %v285_v55 = vadd.f32 %v284_v47, %v266_v50 }
  0xb8   :  { %v337_v60 = vmul.f32 %v285_v55, %v285_v55 }
  0xba   :  { %v248_v51 = vpop.f32.mrf.mxu0 }
  0xbb   :  { %v267_v52 = vpop.f32.mrf.mxu1 }
  0xbc   :  { %v268_v53 = vadd.f32 %v267_v52, %v248_v51 }
  0xbe   :  { %v287_v56 = vadd.f32 %v286_v54, %v268_v53 }
  0xc0   :  { %v506_v57 = vpack.c.bf16 %v287_v56, %v285_v55  ;;  %327 = vmatpush.msra.mxu3 %v287_v56  ;;  %v338_v58 = vmul.f32 %v287_v56, %v287_v56 }
  0xc2   :  { %508 = vst [vmem:[%s625_s2 + $0x8] sm:$0xff] %v506_v57   ;;  %328 = vmatpush.msra.mxu3 %v285_v55 }
  0xc4   :  { %329 = vmatpush.msra.mxu3 %v282_v45 }
  0xc6   :  { %330 = vmatpush.msra.mxu3 %v280_v44 }
  0xc7   :  { %472 = vmatmul.msk.f32.vlgmr.msra.gmra.mxu3 %vm225_vm0, %v542_v59 }
  0xc8   :  { %351 = vmatpush.msrb.mxu3 %v338_v58 }
  0xca   :  { %352 = vmatpush.msrb.mxu3 %v337_v60 }
  0xcc   :  { %353 = vmatpush.msrb.mxu3 %v336_v61 }
  0xce   :  { %354 = vmatpush.msrb.mxu3 %v335_v62 }
  0xcf   :  { %473 = vmatmul.msk.f32.vlgmr.msrb.gmra.mxu3 %vm225_vm0, %v542_v59 }
 0x14a   :  { %v332_v63 = vpop.f32.mrf.mxu3 }
 0x14b   :  { %359 = vst [vmem:[%s626_s3] sm:$0x1] %v332_v63 }
 0x152   :  { %v356_v0 = vpop.f32.mrf.mxu3 }
 0x153   :  { %360 = vst [vmem:[%s627_s4] sm:$0x1] %v356_v0 }
 0x154   :  { %373 = vsyncpa [#allocation4], 1 }

// kernel: tile.38
= control target key start
LH: loop header
LB: loop body
LE: loop exit
PB: predicated region body
PF: predicated region fallthrough
CT: control target
= control target key end

     0   :  { %s22_s0 = inlined_call_operand.vmem [shape: f32[16], index: 0, kind: input, shape index: {}]   ;;  %s23_s1 = inlined_call_operand.vmem [shape: f32[4,16], index: 1, kind: output, shape index: {}]  }
   0x1   :  { %v4_v0 = vld [vmem:[%s22_s0] ss:$0 sm:$0xff] }
   0x2   :  { %5 = vst [vmem:[%s23_s1] sm:$0xf] %v4_v0 }

// kernel: tile.39
= control target key start
LH: loop header
LB: loop body
LE: loop exit
PB: predicated region body
PF: predicated region fallthrough
CT: control target
= control target key end

     0   :  { %s37_s8 = smov 16   ;;  %s38_s9 = smov 32   ;;  %vm7_vm0 = vcmask 130048   ;;  %vm13_vm1 = vcmask 523648   ;;  %vm19_vm2 = vcmask 392448   ;;  %vm25_vm3 = vcmask 261248   ;;  %s55_s0 = inlined_call_operand.vmem [shape: f32[4,16], index: 0, kind: input, shape index: {}]   ;;  %s56_s1 = inlined_call_operand.vmem [shape: f32[64], index: 1, kind: output, shape index: {}]  }
   0x1   :  { %v4_v0 = vld [vmem:[%s55_s0] sm:$0xf]  ;;  %s36_s0 = smov 48  }
   0x2   :  { %5 = vst [vmem:[#allocation1] sm:$0xf] %v4_v0 }
   0x9   :  { %v10_v1 = vld [vmem:[#allocation1 + $0x3] sm:$0x1]   ;;  %v22_v2 = vld [vmem:[#allocation1 + $0x1] sm:$0x1]   ;;  %v16_v3 = vld [vmem:[#allocation1 + $0x2] sm:$0x1]  }
   0xa   :  { %11 = vrot.lane.b32.xlu0 %v10_v1, %s36_s0  ;;  %23 = vrot.lane.b32.xlu1 %v22_v2, %s37_s8  ;;  %v6_v4 = vld [vmem:[#allocation1] sm:$0x1]  }
   0xb   :  { %8 = vst.msk [vmem:[#allocation0] sm:$0x1] %vm7_vm0, %v6_v4  }
  0x12   :  { %17 = vrot.lane.b32.xlu0 %v16_v3, %s38_s9 }
  0x7c   :  { %v12_v5 = vpop.permute.xlu0 %11   ;;  %v24_v6 = vpop.permute.xlu1 %23  }
  0x7d   :  { %14 = vst.msk [vmem:[#allocation0] sm:$0x1] %vm13_vm1, %v12_v5  }
  0x84   :  { %v18_v7 = vpop.permute.xlu0 %17  }
  0x85   :  { %20 = vst.msk [vmem:[#allocation0] sm:$0x1] %vm19_vm2, %v18_v7  }
  0x86   :  { %26 = vst.msk [vmem:[#allocation0] sm:$0x1] %vm25_vm3, %v24_v6  }
  0x8d   :  { %v29_v8 = vld [vmem:[#allocation0] sm:$0x1] }
  0x8e   :  { %32 = vst [vmem:[%s56_s1] sm:$0x1] %v29_v8 }

// kernel: generator_forward.10
= control target key start
LH: loop header
LB: loop body
LE: loop exit
PB: predicated region body
PF: predicated region fallthrough
CT: control target
= control target key end

     0   :  { %s114_s0 = inlined_call_operand.vmem [shape: bf16[32,128], index: 0, kind: input, shape index: {}]   ;;  %s115_s1 = inlined_call_operand.vmem [shape: f32[1,128], index: 1, kind: input, shape index: {}]   ;;  %s116_s2 = inlined_call_operand.vmem [shape: f32[1,128], index: 2, kind: input, shape index: {}]   ;;  %s117_s3 = inlined_call_operand.vmem [shape: bf16[32,128], index: 3, kind: output, shape index: {}]  }
   0x1   :  { %v55_v0 = vld [vmem:[%s114_s0] sm:$0xff]   ;;  %v72_v5 = vld [vmem:[%s114_s0 + $0x8] sm:$0xff]  }
   0x2   :  { %v74_v1 = vld [vmem:[%s115_s1] ss:$0 sm:$0xff]  ;;  %v56_v2 = vunpack.c.l.bf16 %v55_v0  ;;  %v57_v3 = vunpack.c.h.bf16 %v55_v0  ;;  %v60_v6 = vunpack.c.l.bf16 %v72_v5  ;;  %v61_v7 = vunpack.c.h.bf16 %v72_v5 }
   0x3   :  { %v75_v4 = vld [vmem:[%s116_s2] ss:$0 sm:$0xff] }
   0x4   :  { %v26_v8 = vmul.f32 %v74_v1, %v56_v2  ;;  %v27_v9 = vmul.f32 %v74_v1, %v57_v3  ;;  %v28_v10 = vmul.f32 %v74_v1, %v60_v6  ;;  %v29_v11 = vmul.f32 %v74_v1, %v61_v7 }
   0x6   :  { %v34_v12 = vadd.f32 %v75_v4, %v26_v8  ;;  %v35_v13 = vadd.f32 %v75_v4, %v27_v9  ;;  %v36_v14 = vadd.f32 %v75_v4, %v28_v10  ;;  %v37_v15 = vadd.f32 %v75_v4, %v29_v11 }
   0x8   :  { %v38_v16 = vmax.f32 %v34_v12, 0.0  ;;  %v39_v17 = vmax.f32 %v35_v13, 0.0  ;;  %v40_v18 = vmax.f32 %v36_v14, 0.0  ;;  %v41_v19 = vmax.f32 %v37_v15, 0.0 }
   0xa   :  { %v65_v20 = vpack.c.bf16 %v39_v17, %v38_v16  ;;  %v70_v21 = vpack.c.bf16 %v41_v19, %v40_v18 }
   0xc   :  { %66 = vst [vmem:[%s117_s3] sm:$0xff] %v65_v20  }
   0xd   :  { %73 = vst [vmem:[%s117_s3 + $0x8] sm:$0xff] %v70_v21  }

// kernel: tile.48
= control target key start
LH: loop header
LB: loop body
LE: loop exit
PB: predicated region body
PF: predicated region fallthrough
CT: control target
= control target key end

     0   :  { %s22_s0 = inlined_call_operand.vmem [shape: f32[8], index: 0, kind: input, shape index: {}]   ;;  %s23_s1 = inlined_call_operand.vmem [shape: f32[4,8], index: 1, kind: output, shape index: {}]  }
   0x1   :  { %v4_v0 = vld [vmem:[%s22_s0] ss:$0 sm:$0xff] }
   0x2   :  { %5 = vst [vmem:[%s23_s1] sm:$0xf] %v4_v0 }

// kernel: tile.49
= control target key start
LH: loop header
LB: loop body
LE: loop exit
PB: predicated region body
PF: predicated region fallthrough
CT: control target
= control target key end

     0   :  { %s37_s8 = smov 8   ;;  %s38_s9 = smov 16   ;;  %vm7_vm0 = vcmask 64512   ;;  %vm13_vm1 = vcmask 261312   ;;  %vm19_vm2 = vcmask 195712   ;;  %vm25_vm3 = vcmask 130112   ;;  %s55_s0 = inlined_call_operand.vmem [shape: f32[4,8], index: 0, kind: input, shape index: {}]   ;;  %s56_s1 = inlined_call_operand.vmem [shape: f32[32], index: 1, kind: output, shape index: {}]  }
   0x1   :  { %v4_v0 = vld [vmem:[%s55_s0] sm:$0xf]  ;;  %s36_s0 = smov 24  }
   0x2   :  { %5 = vst [vmem:[#allocation1] sm:$0xf] %v4_v0 }
   0x9   :  { %v10_v1 = vld [vmem:[#allocation1 + $0x3] sm:$0x1]   ;;  %v22_v2 = vld [vmem:[#allocation1 + $0x1] sm:$0x1]   ;;  %v16_v3 = vld [vmem:[#allocation1 + $0x2] sm:$0x1]  }
   0xa   :  { %11 = vrot.lane.b32.xlu0 %v10_v1, %s36_s0  ;;  %23 = vrot.lane.b32.xlu1 %v22_v2, %s37_s8  ;;  %v6_v4 = vld [vmem:[#allocation1] sm:$0x1]  }
   0xb   :  { %8 = vst.msk [vmem:[#allocation0] sm:$0x1] %vm7_vm0, %v6_v4  }
  0x12   :  { %17 = vrot.lane.b32.xlu0 %v16_v3, %s38_s9 }
  0x7c   :  { %v12_v5 = vpop.permute.xlu0 %11   ;;  %v24_v6 = vpop.permute.xlu1 %23  }
  0x7d   :  { %14 = vst.msk [vmem:[#allocation0] sm:$0x1] %vm13_vm1, %v12_v5  }
  0x84   :  { %v18_v7 = vpop.permute.xlu0 %17  }
  0x85   :  { %20 = vst.msk [vmem:[#allocation0] sm:$0x1] %vm19_vm2, %v18_v7  }
  0x86   :  { %26 = vst.msk [vmem:[#allocation0] sm:$0x1] %vm25_vm3, %v24_v6  }
  0x8d   :  { %v29_v8 = vld [vmem:[#allocation0] sm:$0x1] }
  0x8e   :  { %32 = vst [vmem:[%s56_s1] sm:$0x1] %v29_v8 }

// kernel: generator_forward.11
= control target key start
LH: loop header
LB: loop body
LE: loop exit
PB: predicated region body
PF: predicated region fallthrough
CT: control target
= control target key end

     0   :  { %10 = vsyncpa [#allocation4], 0  ;;  %s723_s18 = smov [#allocation3]   ;;  %s724_s20 = smov 64   ;;  %s925_s0 = inlined_call_operand.vmem [shape: bf16[128,144], index: 0, kind: input, shape index: {}]   ;;  %s926_s1 = inlined_call_operand.hbm [shape: bf16[144,128], index: 1, kind: input, shape index: {}]   ;;  %s927_s2 = inlined_call_operand.vmem [shape: bf16[128,128], index: 2, kind: output, shape index: {0}]   ;;  %s928_s3 = inlined_call_operand.vmem [shape: f32[1,1,128], index: 3, kind: output, shape index: {1}]   ;;  %s929_s4 = inlined_call_operand.vmem [shape: f32[1,1,128], index: 4, kind: output, shape index: {2}]  }
   0x1   :  { %s17_s17 = sshll.u32 %s926_s1, 4  ;;  %s19_s19 = sshll.u32 %s723_s18, 4  ;;  %s18_s17 = int_to_ptr.hbm [resolvable:$true] %s17_s17  ;;  %s20_s19 = int_to_ptr.vmem [resolvable:$true] %s19_s19 }
   0x2   :  { %s725_s21 = smov 4  }
   0x3   :  { %25 = dma.hbm_to_vmem [thread:$0]  %s18_s17, 1152, %s20_s19, [#allocation4], %s724_s20, %s724_s20, %s725_s21  }
   0x4   :  { %721 = dma.done.wait [#allocation4], 1152  }
   0x5   :  { %722 = vsyncadd [#allocation4], 4294966144  ;;  %v635_v0 = vld [vmem:[#allocation3 + $0x38] sm:$0xff]  ;;  %v636_v1 = vld [vmem:[#allocation3 + $0x40] sm:$0xff]  ;;  %vm227_vm0 = vcmask 130048  }
   0x6   :  { %v612_v2 = vld [vmem:[%s925_s0 + $0x4] sm:$0xf]  ;;  %v508_v3 = vld [vmem:[%s925_s0 + $0x8] sm:$0xf0]  ;;  %252 = vmatpush.bf16.msra.mxu0 %v635_v0  ;;  %684 = vmatpush.bf16.msra.mxu2 %v635_v0  ;;  %v634_v5 = vld [vmem:[#allocation3 + $0x30] sm:$0xff] }
   0x7   :  { %v511_v4 = vor.u32 %v612_v2, %v508_v3  ;;  %308 = vmatpush.bf16.msra.mxu1 %v636_v1  ;;  %692 = vmatpush.bf16.msra.mxu3 %v636_v1  ;;  %v633_v6 = vld [vmem:[#allocation3 + $0x28] sm:$0xff]  ;;  %v632_v7 = vld [vmem:[#allocation3 + $0x20] sm:$0xff]  ;;  %v631_v8 = vld [vmem:[#allocation3 + $0x18] sm:$0xff] }
   0x8   :  { %v614_v9 = vld [vmem:[%s925_s0 + $0x14] sm:$0xf]  ;;  %v516_v10 = vld [vmem:[%s925_s0 + $0x18] sm:$0xf0]  ;;  %v629_v13 = vld [vmem:[#allocation3 + $0x8] sm:$0xff] }
   0x9   :  { %v519_v11 = vor.u32 %v614_v9, %v516_v10  ;;  %v630_v12 = vld [vmem:[#allocation3 + $0x10] sm:$0xff]  ;;  %v624_v14 = vld [vmem:[%s925_s0 + $0x64] sm:$0xf]  ;;  %v556_v15 = vld [vmem:[%s925_s0 + $0x68] sm:$0xf0] }
   0xa   :  { %604 = vmatmul.msk.bf16.vlgmr.msra.gmra.mxu1 %vm227_vm0, %v511_v4  ;;  %253 = vmatpush.bf16.msra.mxu0 %v634_v5  ;;  %v559_v16 = vor.u32 %v624_v14, %v556_v15  ;;  %v628_v17 = vld [vmem:[#allocation3] sm:$0xff]  ;;  %v613_v19 = vld [vmem:[%s925_s0 + $0x4] sm:$0xf0]  ;;  %v524_v25 = vld [vmem:[%s925_s0 + $0x28] sm:$0xf0] }
   0xb   :  { %685 = vmatpush.bf16.msra.mxu2 %v634_v5  ;;  %v506_v18 = vld [vmem:[%s925_s0] sm:$0xf]  ;;  %v621_v21 = vld [vmem:[%s925_s0 + $0x44] sm:$0xf0]  ;;  %v616_v24 = vld [vmem:[%s925_s0 + $0x24] sm:$0xf] }
   0xc   :  { %610 = vmatmul.msk.bf16.vlgmr.msra.gmra.mxu3 %vm227_vm0, %v559_v16  ;;  %v538_v20 = vld [vmem:[%s925_s0 + $0x40] sm:$0xf]  ;;  %v507_v22 = vor.u32 %v613_v19, %v506_v18  ;;  %v527_v26 = vor.u32 %v616_v24, %v524_v25  ;;  %v626_v27 = vld [vmem:[%s925_s0 + $0x74] sm:$0xf]  ;;  %v564_v28 = vld [vmem:[%s925_s0 + $0x78] sm:$0xf0] }
   0xd   :  { %v539_v23 = vor.u32 %v621_v21, %v538_v20  ;;  %v567_v29 = vor.u32 %v626_v27, %v564_v28  ;;  %v514_v30 = vld [vmem:[%s925_s0 + $0x10] sm:$0xf]  ;;  %v615_v31 = vld [vmem:[%s925_s0 + $0x14] sm:$0xf0]  ;;  %v618_v36 = vld [vmem:[%s925_s0 + $0x34] sm:$0xf] }
   0xe   :  { %254 = vmatpush.bf16.msra.mxu0 %v633_v6  ;;  %v546_v32 = vld [vmem:[%s925_s0 + $0x50] sm:$0xf]  ;;  %v623_v33 = vld [vmem:[%s925_s0 + $0x54] sm:$0xf0]  ;;  %v515_v34 = vor.u32 %v615_v31, %v514_v30  ;;  %v532_v37 = vld [vmem:[%s925_s0 + $0x38] sm:$0xf0] }
   0xf   :  { %686 = vmatpush.bf16.msra.mxu2 %v633_v6  ;;  %v547_v35 = vor.u32 %v623_v33, %v546_v32  ;;  %v535_v38 = vor.u32 %v618_v36, %v532_v37  ;;  %v522_v39 = vld [vmem:[%s925_s0 + $0x20] sm:$0xf]  ;;  %v617_v40 = vld [vmem:[%s925_s0 + $0x24] sm:$0xf0]  ;;  %v620_v45 = vld [vmem:[%s925_s0 + $0x44] sm:$0xf] }
  0x10   :  { %v554_v41 = vld [vmem:[%s925_s0 + $0x60] sm:$0xf]  ;;  %v625_v42 = vld [vmem:[%s925_s0 + $0x64] sm:$0xf0]  ;;  %v523_v43 = vor.u32 %v617_v40, %v522_v39  ;;  %v540_v46 = vld [vmem:[%s925_s0 + $0x48] sm:$0xf0] }
  0x11   :  { %v555_v44 = vor.u32 %v625_v42, %v554_v41  ;;  %v543_v47 = vor.u32 %v620_v45, %v540_v46  ;;  %v530_v48 = vld [vmem:[%s925_s0 + $0x30] sm:$0xf]  ;;  %v619_v49 = vld [vmem:[%s925_s0 + $0x34] sm:$0xf0]  ;;  %v622_v54 = vld [vmem:[%s925_s0 + $0x54] sm:$0xf] }
  0x12   :  { %255 = vmatpush.bf16.msra.mxu0 %v632_v7  ;;  %v562_v50 = vld [vmem:[%s925_s0 + $0x70] sm:$0xf]  ;;  %v627_v51 = vld [vmem:[%s925_s0 + $0x74] sm:$0xf0]  ;;  %v531_v52 = vor.u32 %v619_v49, %v530_v48  ;;  %v548_v55 = vld [vmem:[%s925_s0 + $0x58] sm:$0xf0] }
  0x13   :  { %687 = vmatpush.bf16.msra.mxu2 %v632_v7  ;;  %v563_v53 = vor.u32 %v627_v51, %v562_v50  ;;  %v551_v56 = vor.u32 %v622_v54, %v548_v55  ;;  %v726_v51 = vmov 1.0  }
  0x16   :  { %256 = vmatpush.bf16.msra.mxu0 %v631_v8 }
  0x17   :  { %688 = vmatpush.bf16.msra.mxu2 %v631_v8 }
  0x1a   :  { %605 = vmatmul.msk.bf16.gmra.mxu1 %vm227_vm0, %v519_v11  ;;  %257 = vmatpush.bf16.msra.mxu0 %v630_v12 }
  0x1b   :  { %689 = vmatpush.bf16.msra.mxu2 %v630_v12 }
  0x1c   :  { %611 = vmatmul.msk.bf16.gmra.mxu3 %vm227_vm0, %v567_v29 }
  0x1e   :  { %258 = vmatpush.bf16.msra.mxu0 %v629_v13 }
  0x1f   :  { %690 = vmatpush.bf16.msra.mxu2 %v629_v13 }
  0x22   :  { %259 = vmatpush.bf16.msra.mxu0 %v628_v17 }
  0x23   :  { %691 = vmatpush.bf16.msra.mxu2 %v628_v17 }
  0x25   :  { %260 = vmatmul.bf16.vlgmr.msra.gmra.mxu0 %v507_v22 }
  0x26   :  { %280 = vmatmul.bf16.vlgmr.msra.gmra.mxu2 %v539_v23 }
  0x2a   :  { %606 = vmatmul.msk.bf16.gmra.mxu1 %vm227_vm0, %v527_v26 }
  0x35   :  { %265 = vmatmul.bf16.gmra.mxu0 %v515_v34 }
  0x36   :  { %285 = vmatmul.bf16.gmra.mxu2 %v547_v35 }
  0x3a   :  { %607 = vmatmul.msk.bf16.gmra.mxu1 %vm227_vm0, %v535_v38 }
  0x45   :  { %270 = vmatmul.bf16.gmra.mxu0 %v523_v43 }
  0x46   :  { %290 = vmatmul.bf16.gmra.mxu2 %v555_v44 }
  0x4a   :  { %608 = vmatmul.msk.bf16.gmra.mxu1 %vm227_vm0, %v543_v47 }
  0x55   :  { %275 = vmatmul.bf16.gmra.mxu0 %v531_v52 }
  0x56   :  { %295 = vmatmul.bf16.gmra.mxu2 %v563_v53 }
  0x5a   :  { %609 = vmatmul.msk.bf16.gmra.mxu1 %vm227_vm0, %v551_v56 }
  0x87   :  { %v310_v57 = vpop.f32.mrf.mxu1 }
  0x8f   :  { %v312_v58 = vpop.f32.mrf.mxu1  ;;  %v340_v16 = vpop.f32.mrf.mxu3 }
  0x97   :  { %v315_v59 = vpop.f32.mrf.mxu1  ;;  %v342_v22 = vpop.f32.mrf.mxu3 }
  0x9f   :  { %v317_v60 = vpop.f32.mrf.mxu1  ;;  %v345_v33 = vpop.f32.mrf.mxu3 }
  0xa2   :  { %v261_v61 = vpop.f32.mrf.mxu0 }
  0xa3   :  { %v859_v1 = vadd.f32 %v310_v57, %v261_v61 }
  0xa7   :  { %v320_v62 = vpop.f32.mrf.mxu1  ;;  %v347_v43 = vpop.f32.mrf.mxu3 }
  0xa9   :  { %v281_v63 = vpop.f32.mrf.mxu2 }
  0xaa   :  { %v263_v0 = vpop.f32.mrf.mxu0 }
  0xab   :  { %v861_v2 = vadd.f32 %v312_v58, %v263_v0 }
  0xad   :  { %v640_v3 = vpack.c.bf16 %v861_v2, %v859_v1  ;;  %v454_v0 = vmul.f32 %v861_v2, %v861_v2 }
  0xaf   :  { %641 = vst [vmem:[%s927_s2] sm:$0xff] %v640_v3   ;;  %v322_v4 = vpop.f32.mrf.mxu1  ;;  %v453_v3 = vmul.f32 %v859_v1, %v859_v1 }
  0xb1   :  { %v283_v5 = vpop.f32.mrf.mxu2 }
  0xb2   :  { %v266_v6 = vpop.f32.mrf.mxu0 }
  0xb3   :  { %v868_v10 = vadd.f32 %v315_v59, %v266_v6 }
  0xb7   :  { %v325_v7 = vpop.f32.mrf.mxu1 }
  0xb9   :  { %v286_v8 = vpop.f32.mrf.mxu2 }
  0xba   :  { %v268_v9 = vpop.f32.mrf.mxu0 }
  0xbb   :  { %v870_v11 = vadd.f32 %v317_v60, %v268_v9 }
  0xbd   :  { %v645_v12 = vpack.c.bf16 %v870_v11, %v868_v10 }
  0xbf   :  { %677 = vst [vmem:[%s927_s2 + $0x8] sm:$0xff] %v645_v12   ;;  %v327_v13 = vpop.f32.mrf.mxu1 }
  0xc1   :  { %v288_v14 = vpop.f32.mrf.mxu2 }
  0xc2   :  { %v271_v15 = vpop.f32.mrf.mxu0 }
  0xc3   :  { %v877_v20 = vadd.f32 %v320_v62, %v271_v15  ;;  %v456_v62 = vmul.f32 %v870_v11, %v870_v11 }
  0xc5   :  { %v457_v61 = vmul.f32 %v877_v20, %v877_v20 }
  0xc7   :  { %v330_v17 = vpop.f32.mrf.mxu1 }
  0xc8   :  { %v331_v25 = vadd.f32 %v330_v17, %v281_v63  ;;  %v455_v63 = vmul.f32 %v868_v10, %v868_v10 }
  0xc9   :  { %v291_v18 = vpop.f32.mrf.mxu2 }
  0xca   :  { %v273_v19 = vpop.f32.mrf.mxu0  ;;  %v341_v28 = vadd.f32 %v340_v16, %v291_v18  ;;  %v461_v57 = vmul.f32 %v331_v25, %v331_v25 }
  0xcb   :  { %v879_v21 = vadd.f32 %v322_v4, %v273_v19 }
  0xcc   :  { %v465_v53 = vmul.f32 %v341_v28, %v341_v28 }
  0xcd   :  { %v650_v23 = vpack.c.bf16 %v879_v21, %v877_v20  ;;  %v458_v60 = vmul.f32 %v879_v21, %v879_v21 }
  0xcf   :  { %678 = vst [vmem:[%s927_s2 + $0x10] sm:$0xff] %v650_v23   ;;  %v332_v24 = vpop.f32.mrf.mxu1 }
  0xd0   :  { %v333_v26 = vadd.f32 %v332_v24, %v283_v5 }
  0xd1   :  { %v293_v27 = vpop.f32.mrf.mxu2 }
  0xd2   :  { %v660_v29 = vpack.c.bf16 %v333_v26, %v331_v25  ;;  %v343_v30 = vadd.f32 %v342_v22, %v293_v27  ;;  %v276_v31 = vpop.f32.mrf.mxu0  ;;  %v462_v56 = vmul.f32 %v333_v26, %v333_v26 }
  0xd3   :  { %v326_v37 = vadd.f32 %v325_v7, %v276_v31 }
  0xd4   :  { %680 = vst [vmem:[%s927_s2 + $0x20] sm:$0xff] %v660_v29   ;;  %v670_v32 = vpack.c.bf16 %v343_v30, %v341_v28  ;;  %v466_v52 = vmul.f32 %v343_v30, %v343_v30 }
  0xd5   :  { %v459_v59 = vmul.f32 %v326_v37, %v326_v37 }
  0xd6   :  { %682 = vst [vmem:[%s927_s2 + $0x30] sm:$0xff] %v670_v32  }
  0xd7   :  { %v335_v34 = vpop.f32.mrf.mxu1 }
  0xd8   :  { %v336_v41 = vadd.f32 %v335_v34, %v286_v8 }
  0xd9   :  { %v296_v35 = vpop.f32.mrf.mxu2 }
  0xda   :  { %v278_v36 = vpop.f32.mrf.mxu0  ;;  %v346_v45 = vadd.f32 %v345_v33, %v296_v35  ;;  %v463_v55 = vmul.f32 %v336_v41, %v336_v41 }
  0xdb   :  { %v328_v38 = vadd.f32 %v327_v13, %v278_v36 }
  0xdc   :  { %v467_v50 = vmul.f32 %v346_v45, %v346_v45 }
  0xdd   :  { %v655_v39 = vpack.c.bf16 %v328_v38, %v326_v37  ;;  %v460_v58 = vmul.f32 %v328_v38, %v328_v38 }
  0xdf   :  { %679 = vst [vmem:[%s927_s2 + $0x18] sm:$0xff] %v655_v39   ;;  %v337_v40 = vpop.f32.mrf.mxu1 }
  0xe0   :  { %v338_v42 = vadd.f32 %v337_v40, %v288_v14 }
  0xe1   :  { %v298_v44 = vpop.f32.mrf.mxu2 }
  0xe2   :  { %v665_v46 = vpack.c.bf16 %v338_v42, %v336_v41  ;;  %v348_v47 = vadd.f32 %v347_v43, %v298_v44  ;;  %v464_v54 = vmul.f32 %v338_v42, %v338_v42 }
  0xe4   :  { %681 = vst [vmem:[%s927_s2 + $0x28] sm:$0xff] %v665_v46   ;;  %v675_v48 = vpack.c.bf16 %v348_v47, %v346_v45  ;;  %433 = vmatpush.msrb.mxu3 %v348_v47  ;;  %v468_v49 = vmul.f32 %v348_v47, %v348_v47 }
  0xe6   :  { %683 = vst [vmem:[%s927_s2 + $0x38] sm:$0xff] %v675_v48   ;;  %434 = vmatpush.msrb.mxu3 %v346_v45 }
  0xe8   :  { %435 = vmatpush.msrb.mxu3 %v343_v30 }
  0xea   :  { %436 = vmatpush.msrb.mxu3 %v341_v28 }
  0xec   :  { %437 = vmatpush.msrb.mxu3 %v338_v42 }
  0xee   :  { %438 = vmatpush.msrb.mxu3 %v336_v41 }
  0xf0   :  { %439 = vmatpush.msrb.mxu3 %v333_v26 }
  0xf2   :  { %440 = vmatpush.msrb.mxu3 %v331_v25 }
  0xf4   :  { %441 = vmatpush.msrb.mxu3 %v328_v38 }
  0xf6   :  { %442 = vmatpush.msrb.mxu3 %v326_v37 }
  0xf8   :  { %443 = vmatpush.msrb.mxu3 %v879_v21 }
  0xfa   :  { %444 = vmatpush.msrb.mxu3 %v877_v20 }
  0xfc   :  { %445 = vmatpush.msrb.mxu3 %v870_v11 }
  0xfe   :  { %446 = vmatpush.msrb.mxu3 %v868_v10 }
 0x100   :  { %447 = vmatpush.msrb.mxu3 %v861_v2 }
 0x102   :  { %448 = vmatpush.msrb.mxu3 %v859_v1 }
 0x103   :  { %449 = vmatmul.f32.vlgmr.msrb.gmra.mxu3 %v726_v51 }
 0x104   :  { %469 = vmatpush.msra.mxu3 %v468_v49 }
 0x106   :  { %470 = vmatpush.msra.mxu3 %v467_v50 }
 0x108   :  { %471 = vmatpush.msra.mxu3 %v466_v52 }
 0x10a   :  { %472 = vmatpush.msra.mxu3 %v465_v53 }
 0x10c   :  { %473 = vmatpush.msra.mxu3 %v464_v54 }
 0x10e   :  { %474 = vmatpush.msra.mxu3 %v463_v55 }
 0x110   :  { %475 = vmatpush.msra.mxu3 %v462_v56 }
 0x112   :  { %476 = vmatpush.msra.mxu3 %v461_v57 }
 0x114   :  { %477 = vmatpush.msra.mxu3 %v460_v58 }
 0x116   :  { %478 = vmatpush.msra.mxu3 %v459_v59 }
 0x118   :  { %479 = vmatpush.msra.mxu3 %v458_v60 }
 0x11a   :  { %480 = vmatpush.msra.mxu3 %v457_v61 }
 0x11c   :  { %481 = vmatpush.msra.mxu3 %v456_v62 }
 0x11e   :  { %482 = vmatpush.msra.mxu3 %v455_v63 }
 0x120   :  { %483 = vmatpush.msra.mxu3 %v454_v0 }
 0x122   :  { %484 = vmatpush.msra.mxu3 %v453_v3 }
 0x123   :  { %485 = vmatmul.f32.vlgmr.msra.gmra.mxu3 %v726_v51 }
 0x186   :  { %v450_v4 = vpop.f32.mrf.mxu3 }
 0x187   :  { %489 = vst [vmem:[%s928_s3] sm:$0x1] %v450_v4 }
 0x1a6   :  { %v486_v5 = vpop.f32.mrf.mxu3 }
 0x1a7   :  { %490 = vst [vmem:[%s929_s4] sm:$0x1] %v486_v5 }
 0x1a8   :  { %503 = vsyncpa [#allocation4], 1 }

// kernel: generator_forward.12
= control target key start
LH: loop header
LB: loop body
LE: loop exit
PB: predicated region body
PF: predicated region fallthrough
CT: control target
= control target key end

     0   :  { %s336_s0 = inlined_call_operand.vmem [shape: bf16[128,128], index: 0, kind: input, shape index: {}]   ;;  %s337_s1 = inlined_call_operand.vmem [shape: f32[1,128], index: 1, kind: input, shape index: {}]   ;;  %s338_s2 = inlined_call_operand.vmem [shape: f32[1,128], index: 2, kind: input, shape index: {}]   ;;  %s339_s3 = inlined_call_operand.vmem [shape: bf16[128,128], index: 3, kind: output, shape index: {}]  }
   0x1   :  { %v139_v0 = vld [vmem:[%s336_s0] sm:$0xff]   ;;  %v210_v5 = vld [vmem:[%s336_s0 + $0x8] sm:$0xff]   ;;  %v211_v8 = vld [vmem:[%s336_s0 + $0x10] sm:$0xff]  }
   0x2   :  { %v252_v1 = vld [vmem:[%s337_s1] ss:$0 sm:$0xff]  ;;  %v140_v2 = vunpack.c.l.bf16 %v139_v0  ;;  %v141_v3 = vunpack.c.h.bf16 %v139_v0  ;;  %v144_v6 = vunpack.c.l.bf16 %v210_v5  ;;  %v145_v7 = vunpack.c.h.bf16 %v210_v5  ;;  %v212_v9 = vld [vmem:[%s336_s0 + $0x18] sm:$0xff]   ;;  %v214_v35 = vld [vmem:[%s336_s0 + $0x28] sm:$0xff]  }
   0x3   :  { %v257_v4 = vld [vmem:[%s338_s2] ss:$0 sm:$0xff]  ;;  %v148_v12 = vunpack.c.l.bf16 %v211_v8  ;;  %v149_v13 = vunpack.c.h.bf16 %v211_v8  ;;  %v152_v16 = vunpack.c.l.bf16 %v212_v9  ;;  %v153_v17 = vunpack.c.h.bf16 %v212_v9  ;;  %v215_v40 = vld [vmem:[%s336_s0 + $0x30] sm:$0xff]   ;;  %v216_v45 = vld [vmem:[%s336_s0 + $0x38] sm:$0xff]  }
   0x4   :  { %v50_v10 = vmul.f32 %v252_v1, %v140_v2  ;;  %v51_v11 = vmul.f32 %v252_v1, %v141_v3  ;;  %v52_v14 = vmul.f32 %v252_v1, %v144_v6  ;;  %v53_v15 = vmul.f32 %v252_v1, %v145_v7  ;;  %v213_v26 = vld [vmem:[%s336_s0 + $0x20] sm:$0xff]  }
   0x5   :  { %v54_v20 = vmul.f32 %v252_v1, %v148_v12  ;;  %v55_v21 = vmul.f32 %v252_v1, %v149_v13  ;;  %v56_v24 = vmul.f32 %v252_v1, %v152_v16  ;;  %v57_v25 = vmul.f32 %v252_v1, %v153_v17 }
   0x6   :  { %v70_v18 = vadd.f32 %v257_v4, %v50_v10  ;;  %v71_v19 = vadd.f32 %v257_v4, %v51_v11  ;;  %v72_v22 = vadd.f32 %v257_v4, %v52_v14  ;;  %v73_v23 = vadd.f32 %v257_v4, %v53_v15 }
   0x7   :  { %v74_v29 = vadd.f32 %v257_v4, %v54_v20  ;;  %v75_v30 = vadd.f32 %v257_v4, %v55_v21  ;;  %v76_v33 = vadd.f32 %v257_v4, %v56_v24  ;;  %v77_v34 = vadd.f32 %v257_v4, %v57_v25 }
   0x8   :  { %v86_v27 = vmax.f32 %v70_v18, 0.0  ;;  %v87_v28 = vmax.f32 %v71_v19, 0.0  ;;  %v88_v31 = vmax.f32 %v72_v22, 0.0  ;;  %v89_v32 = vmax.f32 %v73_v23, 0.0 }
   0x9   :  { %v90_v37 = vmax.f32 %v74_v29, 0.0  ;;  %v91_v38 = vmax.f32 %v75_v30, 0.0  ;;  %v156_v39 = vunpack.c.l.bf16 %v213_v26  ;;  %v92_v42 = vmax.f32 %v76_v33, 0.0 }
   0xa   :  { %v173_v36 = vpack.c.bf16 %v87_v28, %v86_v27  ;;  %v178_v41 = vpack.c.bf16 %v89_v32, %v88_v31  ;;  %v93_v43 = vmax.f32 %v77_v34, 0.0  ;;  %v157_v44 = vunpack.c.h.bf16 %v213_v26 }
   0xb   :  { %v183_v46 = vpack.c.bf16 %v91_v38, %v90_v37  ;;  %v58_v47 = vmul.f32 %v252_v1, %v156_v39  ;;  %v160_v48 = vunpack.c.l.bf16 %v214_v35  ;;  %v161_v49 = vunpack.c.h.bf16 %v214_v35 }
   0xc   :  { %174 = vst [vmem:[%s339_s3] sm:$0xff] %v173_v36   ;;  %v188_v50 = vpack.c.bf16 %v93_v43, %v92_v42  ;;  %v59_v51 = vmul.f32 %v252_v1, %v157_v44  ;;  %v164_v52 = vunpack.c.l.bf16 %v215_v40  ;;  %v165_v53 = vunpack.c.h.bf16 %v215_v40 }
   0xd   :  { %217 = vst [vmem:[%s339_s3 + $0x8] sm:$0xff] %v178_v41   ;;  %v78_v54 = vadd.f32 %v257_v4, %v58_v47  ;;  %v60_v55 = vmul.f32 %v252_v1, %v160_v48  ;;  %v61_v56 = vmul.f32 %v252_v1, %v161_v49  ;;  %v168_v57 = vunpack.c.l.bf16 %v216_v45 }
   0xe   :  { %218 = vst [vmem:[%s339_s3 + $0x10] sm:$0xff] %v183_v46   ;;  %v79_v58 = vadd.f32 %v257_v4, %v59_v51  ;;  %v62_v59 = vmul.f32 %v252_v1, %v164_v52  ;;  %v63_v60 = vmul.f32 %v252_v1, %v165_v53  ;;  %v169_v61 = vunpack.c.h.bf16 %v216_v45 }
   0xf   :  { %219 = vst [vmem:[%s339_s3 + $0x18] sm:$0xff] %v188_v50   ;;  %v94_v62 = vmax.f32 %v78_v54, 0.0  ;;  %v80_v63 = vadd.f32 %v257_v4, %v60_v55  ;;  %v81_v0 = vadd.f32 %v257_v4, %v61_v56  ;;  %v64_v2 = vmul.f32 %v252_v1, %v168_v57 }
  0x10   :  { %v95_v3 = vmax.f32 %v79_v58, 0.0  ;;  %v82_v5 = vadd.f32 %v257_v4, %v62_v59  ;;  %v83_v6 = vadd.f32 %v257_v4, %v63_v60  ;;  %v65_v7 = vmul.f32 %v252_v1, %v169_v61 }
  0x11   :  { %v96_v8 = vmax.f32 %v80_v63, 0.0  ;;  %v97_v9 = vmax.f32 %v81_v0, 0.0  ;;  %v84_v10 = vadd.f32 %v257_v4, %v64_v2 }
  0x12   :  { %v193_v11 = vpack.c.bf16 %v95_v3, %v94_v62  ;;  %v98_v12 = vmax.f32 %v82_v5, 0.0  ;;  %v99_v13 = vmax.f32 %v83_v6, 0.0  ;;  %v85_v14 = vadd.f32 %v257_v4, %v65_v7 }
  0x13   :  { %v198_v15 = vpack.c.bf16 %v97_v9, %v96_v8  ;;  %v100_v16 = vmax.f32 %v84_v10, 0.0 }
  0x14   :  { %220 = vst [vmem:[%s339_s3 + $0x20] sm:$0xff] %v193_v11   ;;  %v203_v17 = vpack.c.bf16 %v99_v13, %v98_v12  ;;  %v101_v18 = vmax.f32 %v85_v14, 0.0 }
  0x15   :  { %221 = vst [vmem:[%s339_s3 + $0x28] sm:$0xff] %v198_v15  }
  0x16   :  { %222 = vst [vmem:[%s339_s3 + $0x30] sm:$0xff] %v203_v17   ;;  %v208_v1 = vpack.c.bf16 %v101_v18, %v100_v16 }
  0x18   :  { %223 = vst [vmem:[%s339_s3 + $0x38] sm:$0xff] %v208_v1  }

// kernel: tile.58
= control target key start
LH: loop header
LB: loop body
LE: loop exit
PB: predicated region body
PF: predicated region fallthrough
CT: control target
= control target key end

     0   :  { %s22_s0 = inlined_call_operand.vmem [shape: f32[4], index: 0, kind: input, shape index: {}]   ;;  %s23_s1 = inlined_call_operand.vmem [shape: f32[4,4], index: 1, kind: output, shape index: {}]  }
   0x1   :  { %v4_v0 = vld [vmem:[%s22_s0] ss:$0 sm:$0xff] }
   0x2   :  { %5 = vst [vmem:[%s23_s1] sm:$0xf] %v4_v0 }

// kernel: tile.59
= control target key start
LH: loop header
LB: loop body
LE: loop exit
PB: predicated region body
PF: predicated region fallthrough
CT: control target
= control target key end

     0   :  { %s37_s8 = smov 4   ;;  %s38_s9 = smov 8   ;;  %vm7_vm0 = vcmask 31744   ;;  %vm13_vm1 = vcmask 130144   ;;  %vm19_vm2 = vcmask 97344   ;;  %vm25_vm3 = vcmask 64544   ;;  %s55_s0 = inlined_call_operand.vmem [shape: f32[4,4], index: 0, kind: input, shape index: {}]   ;;  %s56_s1 = inlined_call_operand.vmem [shape: f32[16], index: 1, kind: output, shape index: {}]  }
   0x1   :  { %v4_v0 = vld [vmem:[%s55_s0] sm:$0xf]  ;;  %s36_s0 = smov 12  }
   0x2   :  { %5 = vst [vmem:[#allocation1] sm:$0xf] %v4_v0 }
   0x9   :  { %v10_v1 = vld [vmem:[#allocation1 + $0x3] sm:$0x1]   ;;  %v22_v2 = vld [vmem:[#allocation1 + $0x1] sm:$0x1]   ;;  %v16_v3 = vld [vmem:[#allocation1 + $0x2] sm:$0x1]  }
   0xa   :  { %11 = vrot.lane.b32.xlu0 %v10_v1, %s36_s0  ;;  %23 = vrot.lane.b32.xlu1 %v22_v2, %s37_s8  ;;  %v6_v4 = vld [vmem:[#allocation1] sm:$0x1]  }
   0xb   :  { %8 = vst.msk [vmem:[#allocation0] sm:$0x1] %vm7_vm0, %v6_v4  }
  0x12   :  { %17 = vrot.lane.b32.xlu0 %v16_v3, %s38_s9 }
  0x7c   :  { %v12_v5 = vpop.permute.xlu0 %11   ;;  %v24_v6 = vpop.permute.xlu1 %23  }
  0x7d   :  { %14 = vst.msk [vmem:[#allocation0] sm:$0x1] %vm13_vm1, %v12_v5  }
  0x84   :  { %v18_v7 = vpop.permute.xlu0 %17  }
  0x85   :  { %20 = vst.msk [vmem:[#allocation0] sm:$0x1] %vm19_vm2, %v18_v7  }
  0x86   :  { %26 = vst.msk [vmem:[#allocation0] sm:$0x1] %vm25_vm3, %v24_v6  }
  0x8d   :  { %v29_v8 = vld [vmem:[#allocation0] sm:$0x1] }
  0x8e   :  { %32 = vst [vmem:[%s56_s1] sm:$0x1] %v29_v8 }

// kernel: generator_forward.13
= control target key start
LH: loop header
LB: loop body
LE: loop exit
PB: predicated region body
PF: predicated region fallthrough
CT: control target
= control target key end

     0   :  { %10 = vsyncpa [#allocation4], 0  ;;  %s1703_s18 = smov [#allocation3]   ;;  %s1704_s20 = smov 64   ;;  %s2327_s0 = inlined_call_operand.vmem [shape: bf16[512,72], index: 0, kind: input, shape index: {}]   ;;  %s2328_s1 = inlined_call_operand.hbm [shape: bf16[72,128], index: 1, kind: input, shape index: {}]   ;;  %s2329_s2 = inlined_call_operand.vmem [shape: bf16[512,128], index: 2, kind: output, shape index: {0}]   ;;  %s2330_s3 = inlined_call_operand.vmem [shape: f32[1,1,128], index: 3, kind: output, shape index: {1}]   ;;  %s2331_s4 = inlined_call_operand.vmem [shape: f32[1,1,128], index: 4, kind: output, shape index: {2}]  }
   0x1   :  { %s17_s17 = sshll.u32 %s2328_s1, 4  ;;  %s19_s19 = sshll.u32 %s1703_s18, 4  ;;  %s18_s17 = int_to_ptr.hbm [resolvable:$true] %s17_s17  ;;  %s20_s19 = int_to_ptr.vmem [resolvable:$true] %s19_s19 }
   0x2   :  { %s1705_s21 = smov 4  }
   0x3   :  { %25 = dma.hbm_to_vmem [thread:$0]  %s18_s17, 576, %s20_s19, [#allocation4], %s1704_s20, %s1704_s20, %s1705_s21  }
   0x4   :  { %1701 = dma.done.wait [#allocation4], 576  }
   0x5   :  { %1702 = vsyncadd [#allocation4], 4294966720  ;;  %v235_v0 = vld [vmem:[#allocation3 + $0x20] sm:$0xf]  ;;  %vm520_vm0 = vcmask 1043456   ;;  %v1466_v4 = vld [vmem:[#allocation3 + $0x18] sm:$0xff] }
   0x6   :  { %v413_v1 = vunpack.c.l.b16 %v235_v0  ;;  %v1465_v5 = vld [vmem:[#allocation3 + $0x10] sm:$0xff]  ;;  %v1464_v6 = vld [vmem:[#allocation3 + $0x8] sm:$0xff]  ;;  %v1463_v7 = vld [vmem:[#allocation3] sm:$0xff]  ;;  %vm423_vm1 = vcmask 588800  }
   0x7   :  { %v1431_v8 = vld [vmem:[%s2327_s0] sm:$0xff]  ;;  %v1450_v10 = vld [vmem:[%s2327_s0 + $0x98] sm:$0xff]  ;;  %v1432_v12 = vld [vmem:[%s2327_s0 + $0x8] sm:$0xff] }
   0x8   :  { %v418_v2 = vpack.c.b16 %v413_v1, %v413_v1  ;;  %v1443_v9 = vld [vmem:[%s2327_s0 + $0x60] sm:$0xff]  ;;  %v1454_v11 = vld [vmem:[%s2327_s0 + $0xb8] sm:$0xff]  ;;  %v1444_v13 = vld [vmem:[%s2327_s0 + $0x68] sm:$0xff] }
   0x9   :  { %v1451_v14 = vld [vmem:[%s2327_s0 + $0xa0] sm:$0xff]  ;;  %v1433_v16 = vld [vmem:[%s2327_s0 + $0x10] sm:$0xff]  ;;  %v1452_v18 = vld [vmem:[%s2327_s0 + $0xa8] sm:$0xff] }
   0xa   :  { %v522_v3 = vsel %vm520_vm0, %v418_v2, 0  ;;  %v1455_v15 = vld [vmem:[%s2327_s0 + $0xc0] sm:$0xff]  ;;  %v1445_v17 = vld [vmem:[%s2327_s0 + $0x70] sm:$0xff]  ;;  %v1456_v19 = vld [vmem:[%s2327_s0 + $0xc8] sm:$0xff] }
   0xb   :  { %527 = vmatpush.bf16.msra.mxu0 %v522_v3  ;;  %1658 = vmatpush.bf16.msra.mxu1 %v522_v3  ;;  %v1434_v20 = vld [vmem:[%s2327_s0 + $0x18] sm:$0xff]  ;;  %v1453_v22 = vld [vmem:[%s2327_s0 + $0xb0] sm:$0xff]  ;;  %v1435_v24 = vld [vmem:[%s2327_s0 + $0x20] sm:$0xff] }
   0xc   :  { %1659 = vmatpush.bf16.msra.mxu2 %v522_v3  ;;  %1660 = vmatpush.bf16.msra.mxu3 %v522_v3  ;;  %v1446_v21 = vld [vmem:[%s2327_s0 + $0x78] sm:$0xff]  ;;  %v1457_v23 = vld [vmem:[%s2327_s0 + $0xd0] sm:$0xff]  ;;  %v1447_v25 = vld [vmem:[%s2327_s0 + $0x80] sm:$0xff] }
   0xd   :  { %v1458_v26 = vld [vmem:[%s2327_s0 + $0xd8] sm:$0xff]  ;;  %v1436_v27 = vld [vmem:[%s2327_s0 + $0x28] sm:$0xff]  ;;  %v1459_v29 = vld [vmem:[%s2327_s0 + $0xe0] sm:$0xff] }
   0xe   :  { %v1448_v28 = vld [vmem:[%s2327_s0 + $0x88] sm:$0xff]  ;;  %v1437_v30 = vld [vmem:[%s2327_s0 + $0x30] sm:$0xff]  ;;  %v1438_v33 = vld [vmem:[%s2327_s0 + $0x38] sm:$0xff] }
   0xf   :  { %528 = vmatpush.bf16.msra.mxu0 %v1466_v4  ;;  %1661 = vmatpush.bf16.msra.mxu1 %v1466_v4  ;;  %v1449_v31 = vld [vmem:[%s2327_s0 + $0x90] sm:$0xff]  ;;  %v1460_v32 = vld [vmem:[%s2327_s0 + $0xe8] sm:$0xff]  ;;  %v1439_v35 = vld [vmem:[%s2327_s0 + $0x40] sm:$0xff] }
  0x10   :  { %1662 = vmatpush.bf16.msra.mxu2 %v1466_v4  ;;  %1663 = vmatpush.bf16.msra.mxu3 %v1466_v4  ;;  %v1461_v34 = vld [vmem:[%s2327_s0 + $0xf0] sm:$0xff]  ;;  %v1462_v38 = vld [vmem:[%s2327_s0 + $0xf8] sm:$0xff]  ;;  %v1440_v46 = vld [vmem:[%s2327_s0 + $0x48] sm:$0xff] }
  0x11   :  { %v1441_v59 = vld [vmem:[%s2327_s0 + $0x50] sm:$0xff] }
  0x13   :  { %529 = vmatpush.bf16.msra.mxu0 %v1465_v5  ;;  %1664 = vmatpush.bf16.msra.mxu1 %v1465_v5 }
  0x14   :  { %1665 = vmatpush.bf16.msra.mxu2 %v1465_v5  ;;  %1666 = vmatpush.bf16.msra.mxu3 %v1465_v5 }
  0x17   :  { %530 = vmatpush.bf16.msra.mxu0 %v1464_v6  ;;  %1667 = vmatpush.bf16.msra.mxu1 %v1464_v6 }
  0x18   :  { %1668 = vmatpush.bf16.msra.mxu2 %v1464_v6  ;;  %1669 = vmatpush.bf16.msra.mxu3 %v1464_v6 }
  0x1b   :  { %531 = vmatpush.bf16.msra.mxu0 %v1463_v7  ;;  %1670 = vmatpush.bf16.msra.mxu1 %v1463_v7 }
  0x1c   :  { %1671 = vmatpush.bf16.msra.mxu2 %v1463_v7  ;;  %1672 = vmatpush.bf16.msra.mxu3 %v1463_v7 }
  0x1e   :  { %1399 = vmatmul.msk.bf16.vlgmr.msra.gmra.mxu0 %vm423_vm1, %v1431_v8  ;;  %1411 = vmatmul.msk.bf16.vlgmr.msra.gmra.mxu1 %vm423_vm1, %v1443_v9  ;;  %v1442_v8 = vld [vmem:[%s2327_s0 + $0x58] sm:$0xff] }
  0x1f   :  { %1418 = vmatmul.msk.bf16.vlgmr.msra.gmra.mxu2 %vm423_vm1, %v1450_v10  ;;  %1422 = vmatmul.msk.bf16.vlgmr.msra.gmra.mxu3 %vm423_vm1, %v1454_v11 }
  0x2e   :  { %1400 = vmatmul.msk.bf16.gmra.mxu0 %vm423_vm1, %v1432_v12  ;;  %1412 = vmatmul.msk.bf16.gmra.mxu1 %vm423_vm1, %v1444_v13 }
  0x2f   :  { %1419 = vmatmul.msk.bf16.gmra.mxu2 %vm423_vm1, %v1451_v14  ;;  %1423 = vmatmul.msk.bf16.gmra.mxu3 %vm423_vm1, %v1455_v15 }
  0x3e   :  { %1401 = vmatmul.msk.bf16.gmra.mxu0 %vm423_vm1, %v1433_v16  ;;  %1413 = vmatmul.msk.bf16.gmra.mxu1 %vm423_vm1, %v1445_v17 }
  0x3f   :  { %1420 = vmatmul.msk.bf16.gmra.mxu2 %vm423_vm1, %v1452_v18  ;;  %1424 = vmatmul.msk.bf16.gmra.mxu3 %vm423_vm1, %v1456_v19 }
  0x4e   :  { %1402 = vmatmul.msk.bf16.gmra.mxu0 %vm423_vm1, %v1434_v20  ;;  %1414 = vmatmul.msk.bf16.gmra.mxu1 %vm423_vm1, %v1446_v21 }
  0x4f   :  { %1421 = vmatmul.msk.bf16.gmra.mxu2 %vm423_vm1, %v1453_v22  ;;  %1425 = vmatmul.msk.bf16.gmra.mxu3 %vm423_vm1, %v1457_v23 }
  0x5e   :  { %1403 = vmatmul.msk.bf16.gmra.mxu0 %vm423_vm1, %v1435_v24  ;;  %1415 = vmatmul.msk.bf16.gmra.mxu1 %vm423_vm1, %v1447_v25 }
  0x5f   :  { %1426 = vmatmul.msk.bf16.gmra.mxu3 %vm423_vm1, %v1458_v26 }
  0x6e   :  { %1404 = vmatmul.msk.bf16.gmra.mxu0 %vm423_vm1, %v1436_v27  ;;  %1416 = vmatmul.msk.bf16.gmra.mxu1 %vm423_vm1, %v1448_v28 }
  0x6f   :  { %1427 = vmatmul.msk.bf16.gmra.mxu3 %vm423_vm1, %v1459_v29 }
  0x7e   :  { %1405 = vmatmul.msk.bf16.gmra.mxu0 %vm423_vm1, %v1437_v30  ;;  %1417 = vmatmul.msk.bf16.gmra.mxu1 %vm423_vm1, %v1449_v31 }
  0x7f   :  { %1428 = vmatmul.msk.bf16.gmra.mxu3 %vm423_vm1, %v1460_v32 }
  0x8e   :  { %1406 = vmatmul.msk.bf16.gmra.mxu0 %vm423_vm1, %v1438_v33 }
  0x8f   :  { %1429 = vmatmul.msk.bf16.gmra.mxu3 %vm423_vm1, %v1461_v34 }
  0x9b   :  { %v1846_v36 = vpop.f32.mrf.mxu0  ;;  %v1848_v37 = vpop.f32.mrf.mxu1 }
  0x9e   :  { %1407 = vmatmul.msk.bf16.gmra.mxu0 %vm423_vm1, %v1439_v35 }
  0x9f   :  { %1430 = vmatmul.msk.bf16.gmra.mxu3 %vm423_vm1, %v1462_v38 }
  0xa2   :  { %v1855_v39 = vpop.f32.mrf.mxu2  ;;  %v1857_v40 = vpop.f32.mrf.mxu3 }
  0xa3   :  { %v1859_v41 = vpop.f32.mrf.mxu0  ;;  %v1861_v42 = vpop.f32.mrf.mxu1 }
  0xa4   :  { %v1470_v43 = vpack.c.bf16 %v1859_v41, %v1846_v36  ;;  %v1530_v44 = vpack.c.bf16 %v1861_v42, %v1848_v37 }
  0xa6   :  { %1471 = vst [vmem:[%s2329_s2] sm:$0xff] %v1470_v43  }
  0xa7   :  { %1638 = vst [vmem:[%s2329_s2 + $0x60] sm:$0xff] %v1530_v44  }
  0xaa   :  { %v1873_v45 = vpop.f32.mrf.mxu2  ;;  %v1878_v47 = vpop.f32.mrf.mxu3 }
  0xab   :  { %v1565_v48 = vpack.c.bf16 %v1873_v45, %v1855_v39  ;;  %v1882_v49 = vpop.f32.mrf.mxu0  ;;  %v1884_v50 = vpop.f32.mrf.mxu1  ;;  %v1585_v51 = vpack.c.bf16 %v1878_v47, %v1857_v40  ;;  %1056 = vmatpush.msrb.mxu3 %v1878_v47 }
  0xad   :  { %1645 = vst [vmem:[%s2329_s2 + $0x98] sm:$0xff] %v1565_v48   ;;  %1057 = vmatpush.msrb.mxu3 %v1857_v40 }
  0xae   :  { %1408 = vmatmul.msk.bf16.gmra.mxu0 %vm423_vm1, %v1440_v46  ;;  %1649 = vst [vmem:[%s2329_s2 + $0xb8] sm:$0xff] %v1585_v51  }
  0xb2   :  { %v1897_v52 = vpop.f32.mrf.mxu2  ;;  %v1899_v53 = vpop.f32.mrf.mxu3 }
  0xb3   :  { %v1901_v54 = vpop.f32.mrf.mxu0  ;;  %v1903_v55 = vpop.f32.mrf.mxu1 }
  0xb4   :  { %v1475_v56 = vpack.c.bf16 %v1901_v54, %v1882_v49  ;;  %v1535_v57 = vpack.c.bf16 %v1903_v55, %v1884_v50 }
  0xb6   :  { %1627 = vst [vmem:[%s2329_s2 + $0x8] sm:$0xff] %v1475_v56  }
  0xb7   :  { %1639 = vst [vmem:[%s2329_s2 + $0x68] sm:$0xff] %v1535_v57  }
  0xba   :  { %v1915_v58 = vpop.f32.mrf.mxu2  ;;  %v1920_v60 = vpop.f32.mrf.mxu3 }
  0xbb   :  { %v1570_v61 = vpack.c.bf16 %v1915_v58, %v1897_v52  ;;  %v1924_v62 = vpop.f32.mrf.mxu0  ;;  %v1926_v63 = vpop.f32.mrf.mxu1  ;;  %v1590_v0 = vpack.c.bf16 %v1920_v60, %v1899_v53 }
  0xbd   :  { %1646 = vst [vmem:[%s2329_s2 + $0xa0] sm:$0xff] %v1570_v61  }
  0xbe   :  { %1409 = vmatmul.msk.bf16.gmra.mxu0 %vm423_vm1, %v1441_v59  ;;  %1650 = vst [vmem:[%s2329_s2 + $0xc0] sm:$0xff] %v1590_v0  }
  0xc2   :  { %v1937_v1 = vpop.f32.mrf.mxu2  ;;  %v1939_v2 = vpop.f32.mrf.mxu3 }
  0xc3   :  { %v1941_v3 = vpop.f32.mrf.mxu0  ;;  %v1943_v4 = vpop.f32.mrf.mxu1 }
  0xc4   :  { %v1480_v5 = vpack.c.bf16 %v1941_v3, %v1924_v62  ;;  %v1540_v6 = vpack.c.bf16 %v1943_v4, %v1926_v63 }
  0xc6   :  { %1628 = vst [vmem:[%s2329_s2 + $0x10] sm:$0xff] %v1480_v5  }
  0xc7   :  { %1640 = vst [vmem:[%s2329_s2 + $0x70] sm:$0xff] %v1540_v6  }
  0xca   :  { %v1955_v7 = vpop.f32.mrf.mxu2  ;;  %v1960_v9 = vpop.f32.mrf.mxu3 }
  0xcb   :  { %v1575_v10 = vpack.c.bf16 %v1955_v7, %v1937_v1  ;;  %v1964_v11 = vpop.f32.mrf.mxu0  ;;  %v1966_v12 = vpop.f32.mrf.mxu1  ;;  %v1595_v13 = vpack.c.bf16 %v1960_v9, %v1939_v2 }
  0xcd   :  { %1647 = vst [vmem:[%s2329_s2 + $0xa8] sm:$0xff] %v1575_v10  }
  0xce   :  { %1410 = vmatmul.msk.bf16.gmra.mxu0 %vm423_vm1, %v1442_v8  ;;  %1651 = vst [vmem:[%s2329_s2 + $0xc8] sm:$0xff] %v1595_v13  }
  0xd2   :  { %v1977_v14 = vpop.f32.mrf.mxu2  ;;  %v1979_v15 = vpop.f32.mrf.mxu3 }
  0xd3   :  { %v1981_v16 = vpop.f32.mrf.mxu0  ;;  %v1983_v17 = vpop.f32.mrf.mxu1 }
  0xd4   :  { %v1485_v18 = vpack.c.bf16 %v1981_v16, %v1964_v11  ;;  %v1545_v19 = vpack.c.bf16 %v1983_v17, %v1966_v12  ;;  %1036 = vmatpush.msrb.mxu2 %v1983_v17  ;;  %v1127_v10 = vmul.f32 %v1983_v17, %v1983_v17  ;;  %v1124_v17 = vmul.f32 %v1926_v63, %v1926_v63 }
  0xd6   :  { %1629 = vst [vmem:[%s2329_s2 + $0x18] sm:$0xff] %v1485_v18   ;;  %1037 = vmatpush.msrb.mxu2 %v1966_v12 }
  0xd7   :  { %1641 = vst [vmem:[%s2329_s2 + $0x78] sm:$0xff] %v1545_v19   ;;  %v1126_v19 = vmul.f32 %v1966_v12, %v1966_v12 }
  0xd8   :  { %1038 = vmatpush.msrb.mxu2 %v1943_v4 }
  0xda   :  { %v1998_v20 = vpop.f32.mrf.mxu2  ;;  %v2000_v21 = vpop.f32.mrf.mxu3  ;;  %1039 = vmatpush.msrb.mxu2 %v1926_v63 }
  0xdb   :  { %v1580_v22 = vpack.c.bf16 %v1998_v20, %v1977_v14  ;;  %1058 = vmatpush.msrb.mxu3 %v1998_v20  ;;  %v2006_v23 = vpop.f32.mrf.mxu0  ;;  %v2008_v24 = vpop.f32.mrf.mxu1  ;;  %v1600_v25 = vpack.c.bf16 %v2000_v21, %v1979_v15 }
  0xdc   :  { %1040 = vmatpush.msrb.mxu2 %v1903_v55 }
  0xdd   :  { %1648 = vst [vmem:[%s2329_s2 + $0xb0] sm:$0xff] %v1580_v22   ;;  %1059 = vmatpush.msrb.mxu3 %v1977_v14  ;;  %v1125_v22 = vmul.f32 %v1943_v4, %v1943_v4  ;;  %v1122_v4 = vmul.f32 %v1884_v50, %v1884_v50 }
  0xde   :  { %1652 = vst [vmem:[%s2329_s2 + $0xd0] sm:$0xff] %v1600_v25   ;;  %1041 = vmatpush.msrb.mxu2 %v1884_v50  ;;  %v1120_v50 = vmul.f32 %v1848_v37, %v1848_v37 }
  0xdf   :  { %1060 = vmatpush.msrb.mxu3 %v1955_v7 }
  0xe0   :  { %1042 = vmatpush.msrb.mxu2 %v1861_v42 }
  0xe1   :  { %1061 = vmatpush.msrb.mxu3 %v1937_v1 }
  0xe2   :  { %v2024_v26 = vpop.f32.mrf.mxu3  ;;  %1043 = vmatpush.msrb.mxu2 %v1848_v37 }
  0xe3   :  { %1062 = vmatpush.msrb.mxu3 %v1915_v58  ;;  %v2028_v27 = vpop.f32.mrf.mxu0  ;;  %v2030_v28 = vpop.f32.mrf.mxu1 }
  0xe4   :  { %v1490_v29 = vpack.c.bf16 %v2028_v27, %v2006_v23  ;;  %v1550_v30 = vpack.c.bf16 %v2030_v28, %v2008_v24 }
  0xe5   :  { %1063 = vmatpush.msrb.mxu3 %v1897_v52 }
  0xe6   :  { %1630 = vst [vmem:[%s2329_s2 + $0x20] sm:$0xff] %v1490_v29   ;;  %v1123_v29 = vmul.f32 %v1903_v55, %v1903_v55  ;;  %v1121_v55 = vmul.f32 %v1861_v42, %v1861_v42 }
  0xe7   :  { %1642 = vst [vmem:[%s2329_s2 + $0x80] sm:$0xff] %v1550_v30   ;;  %1064 = vmatpush.msrb.mxu3 %v1873_v45 }
  0xe9   :  { %1065 = vmatpush.msrb.mxu3 %v1855_v39 }
  0xea   :  { %v2045_v31 = vpop.f32.mrf.mxu3 }
  0xeb   :  { %v2047_v32 = vpop.f32.mrf.mxu0  ;;  %v2049_v33 = vpop.f32.mrf.mxu1  ;;  %v1605_v34 = vpack.c.bf16 %v2045_v31, %v2024_v26 }
  0xed   :  { %1653 = vst [vmem:[%s2329_s2 + $0xd8] sm:$0xff] %v1605_v34  }
  0xf2   :  { %v2056_v35 = vpop.f32.mrf.mxu3 }
  0xf3   :  { %v2058_v38 = vpop.f32.mrf.mxu0  ;;  %v2060_v43 = vpop.f32.mrf.mxu1 }
  0xf4   :  { %v1495_v44 = vpack.c.bf16 %v2058_v38, %v2047_v32  ;;  %v1555_v46 = vpack.c.bf16 %v2060_v43, %v2049_v33 }
  0xf6   :  { %1631 = vst [vmem:[%s2329_s2 + $0x28] sm:$0xff] %v1495_v44  }
  0xf7   :  { %1643 = vst [vmem:[%s2329_s2 + $0x88] sm:$0xff] %v1555_v46  }
  0xfa   :  { %v2072_v48 = vpop.f32.mrf.mxu3 }
  0xfb   :  { %v2074_v51 = vpop.f32.mrf.mxu0  ;;  %v2076_v56 = vpop.f32.mrf.mxu1  ;;  %v1610_v57 = vpack.c.bf16 %v2072_v48, %v2056_v35 }
  0xfd   :  { %1654 = vst [vmem:[%s2329_s2 + $0xe0] sm:$0xff] %v1610_v57  }
 0x102   :  { %v2083_v59 = vpop.f32.mrf.mxu3 }
 0x103   :  { %v2085_v61 = vpop.f32.mrf.mxu0  ;;  %v2087_v0 = vpop.f32.mrf.mxu1 }
 0x104   :  { %v1500_v5 = vpack.c.bf16 %v2085_v61, %v2074_v51  ;;  %v1560_v6 = vpack.c.bf16 %v2087_v0, %v2076_v56  ;;  %1066 = vmatpush.msrb.mxu3 %v2087_v0 }
 0x106   :  { %1632 = vst [vmem:[%s2329_s2 + $0x30] sm:$0xff] %v1500_v5   ;;  %1067 = vmatpush.msrb.mxu3 %v2076_v56 }
 0x107   :  { %1644 = vst [vmem:[%s2329_s2 + $0x90] sm:$0xff] %v1560_v6  }
 0x108   :  { %1068 = vmatpush.msrb.mxu3 %v2060_v43 }
 0x10a   :  { %1069 = vmatpush.msrb.mxu3 %v2049_v33  ;;  %v2103_v8 = vpop.f32.mrf.mxu3 }
 0x10b   :  { %v2107_v13 = vpop.f32.mrf.mxu0  ;;  %v1615_v18 = vpack.c.bf16 %v2103_v8, %v2083_v59 }
 0x10c   :  { %1070 = vmatpush.msrb.mxu3 %v2030_v28 }
 0x10d   :  { %1655 = vst [vmem:[%s2329_s2 + $0xe8] sm:$0xff] %v1615_v18  }
 0x10e   :  { %1071 = vmatpush.msrb.mxu3 %v2008_v24 }
 0x110   :  { %1180 = vmatpush.msra.mxu3 %v1127_v10  ;;  %v1706_v10 = vmov 1.0  }
 0x111   :  { %1072 = vmatmul.f32.vlgmr.msrb.gmra.mxu3 %v1706_v10 }
 0x112   :  { %1181 = vmatpush.msra.mxu3 %v1126_v19  ;;  %v2122_v25 = vpop.f32.mrf.mxu3 }
 0x113   :  { %v2126_v12 = vpop.f32.mrf.mxu0 }
 0x114   :  { %1182 = vmatpush.msra.mxu3 %v1125_v22  ;;  %v1505_v30 = vpack.c.bf16 %v2126_v12, %v2107_v13  ;;  %1016 = vmatpush.msrb.mxu1 %v2126_v12 }
 0x116   :  { %1183 = vmatpush.msra.mxu3 %v1124_v17  ;;  %1633 = vst [vmem:[%s2329_s2 + $0x38] sm:$0xff] %v1505_v30   ;;  %1017 = vmatpush.msrb.mxu1 %v2107_v13 }
 0x118   :  { %1184 = vmatpush.msra.mxu3 %v1123_v29  ;;  %1018 = vmatpush.msrb.mxu1 %v2085_v61 }
 0x11a   :  { %1185 = vmatpush.msra.mxu3 %v1122_v4  ;;  %1019 = vmatpush.msrb.mxu1 %v2074_v51  ;;  %v2141_v63 = vpop.f32.mrf.mxu3  ;;  %v1143_v4 = vmul.f32 %v1878_v47, %v1878_v47 }
 0x11b   :  { %v2145_v34 = vpop.f32.mrf.mxu0  ;;  %v1620_v44 = vpack.c.bf16 %v2141_v63, %v2122_v25 }
 0x11c   :  { %1186 = vmatpush.msra.mxu3 %v1121_v55  ;;  %1020 = vmatpush.msrb.mxu1 %v2058_v38  ;;  %v1142_v55 = vmul.f32 %v1857_v40, %v1857_v40 }
 0x11d   :  { %1656 = vst [vmem:[%s2329_s2 + $0xf0] sm:$0xff] %v1620_v44  }
 0x11e   :  { %1187 = vmatpush.msra.mxu3 %v1120_v50  ;;  %1021 = vmatpush.msrb.mxu1 %v2047_v32  ;;  %v1141_v50 = vmul.f32 %v1998_v20, %v1998_v20  ;;  %v1139_v20 = vmul.f32 %v1955_v7, %v1955_v7  ;;  %v1136_v7 = vmul.f32 %v1897_v52, %v1897_v52 }
 0x11f   :  { %v1134_v52 = vmul.f32 %v1855_v39, %v1855_v39  ;;  %v1108_v39 = vmul.f32 %v2074_v51, %v2074_v51  ;;  %v1105_v51 = vmul.f32 %v2028_v27, %v2028_v27 }
 0x120   :  { %1022 = vmatpush.msrb.mxu1 %v2028_v27  ;;  %v1102_v27 = vmul.f32 %v1964_v11, %v1964_v11 }
 0x122   :  { %1023 = vmatpush.msrb.mxu1 %v2006_v23  ;;  %v2156_v37 = vpop.f32.mrf.mxu3 }
 0x123   :  { %v2158_v42 = vpop.f32.mrf.mxu0 }
 0x124   :  { %v1510_v46 = vpack.c.bf16 %v2158_v42, %v2145_v34  ;;  %1024 = vmatpush.msrb.mxu1 %v1981_v16 }
 0x126   :  { %1634 = vst [vmem:[%s2329_s2 + $0x40] sm:$0xff] %v1510_v46   ;;  %1025 = vmatpush.msrb.mxu1 %v1964_v11  ;;  %v1097_v11 = vmul.f32 %v1859_v41, %v1859_v41 }
 0x128   :  { %1026 = vmatpush.msrb.mxu1 %v1941_v3 }
 0x12a   :  { %1027 = vmatpush.msrb.mxu1 %v1924_v62  ;;  %v2169_v57 = vpop.f32.mrf.mxu3 }
 0x12b   :  { %v2171_v5 = vpop.f32.mrf.mxu0  ;;  %v1625_v6 = vpack.c.bf16 %v2169_v57, %v2156_v37 }
 0x12c   :  { %1028 = vmatpush.msrb.mxu1 %v1901_v54 }
 0x12d   :  { %1657 = vst [vmem:[%s2329_s2 + $0xf8] sm:$0xff] %v1625_v6  }
 0x12e   :  { %1029 = vmatpush.msrb.mxu1 %v1882_v49 }
 0x130   :  { %1030 = vmatpush.msrb.mxu1 %v1859_v41  ;;  %v1156_v41 = vmul.f32 %v2122_v25, %v2122_v25 }
 0x132   :  { %1031 = vmatpush.msrb.mxu1 %v1846_v36 }
 0x133   :  { %v580_v18 = vpop.f32.mrf.mxu0  ;;  %1032 = vmatmul.f32.vlgmr.msrb.gmra.mxu1 %v1706_v10 }
 0x134   :  { %1076 = vmatpush.msra.mxu1 %v2169_v57  ;;  %v1515_v19 = vpack.c.bf16 %v580_v18, %v2171_v5 }
 0x136   :  { %1077 = vmatpush.msra.mxu1 %v2156_v37  ;;  %1635 = vst [vmem:[%s2329_s2 + $0x48] sm:$0xff] %v1515_v19   ;;  %v1140_v19 = vmul.f32 %v1977_v14, %v1977_v14  ;;  %v1138_v14 = vmul.f32 %v1937_v1, %v1937_v1  ;;  %v1113_v1 = vmul.f32 %v2158_v42, %v2158_v42 }
 0x138   :  { %1078 = vmatpush.msra.mxu1 %v2141_v63 }
 0x13a   :  { %1079 = vmatpush.msra.mxu1 %v2122_v25  ;;  %v1151_v25 = vmul.f32 %v2045_v31, %v2045_v31 }
 0x13b   :  { %v583_v22 = vpop.f32.mrf.mxu0 }
 0x13c   :  { %1080 = vmatpush.msra.mxu1 %v2103_v8 }
 0x13e   :  { %1081 = vmatpush.msra.mxu1 %v2083_v59 }
 0x140   :  { %1082 = vmatpush.msra.mxu1 %v2072_v48 }
 0x142   :  { %1083 = vmatpush.msra.mxu1 %v2056_v35 }
 0x143   :  { %v585_v17 = vpop.f32.mrf.mxu0 }
 0x144   :  { %1084 = vmatpush.msra.mxu1 %v2045_v31  ;;  %v1520_v29 = vpack.c.bf16 %v585_v17, %v583_v22  ;;  %v1117_v40 = vmul.f32 %v585_v17, %v585_v17  ;;  %v1146_v31 = vmul.f32 %v1939_v2, %v1939_v2 }
 0x146   :  { %1085 = vmatpush.msra.mxu1 %v2024_v26  ;;  %1636 = vst [vmem:[%s2329_s2 + $0x50] sm:$0xff] %v1520_v29   ;;  %v1116_v29 = vmul.f32 %v583_v22, %v583_v22 }
 0x148   :  { %1086 = vmatpush.msra.mxu1 %v2000_v21 }
 0x14a   :  { %1087 = vmatpush.msra.mxu1 %v1979_v15 }
 0x14b   :  { %v588_v30 = vpop.f32.mrf.mxu0 }
 0x14c   :  { %1088 = vmatpush.msra.mxu1 %v1960_v9  ;;  %v1118_v47 = vmul.f32 %v588_v30, %v588_v30 }
 0x14e   :  { %1089 = vmatpush.msra.mxu1 %v1939_v2 }
 0x150   :  { %1090 = vmatpush.msra.mxu1 %v1920_v60 }
 0x152   :  { %1091 = vmatpush.msra.mxu1 %v1899_v53 }
 0x153   :  { %v590_v44 = vpop.f32.mrf.mxu0  ;;  %1092 = vmatmul.f32.vlgmr.msra.gmra.mxu1 %v1706_v10 }
 0x154   :  { %1200 = vmatpush.msrb.mxu1 %v1143_v4  ;;  %v1525_v46 = vpack.c.bf16 %v590_v44, %v588_v30  ;;  %v1119_v6 = vmul.f32 %v590_v44, %v590_v44  ;;  %1044 = vmatpush.msrb.mxu2 %v590_v44  ;;  %v1115_v4 = vmul.f32 %v580_v18, %v580_v18 }
 0x156   :  { %1201 = vmatpush.msrb.mxu1 %v1142_v55  ;;  %1637 = vst [vmem:[%s2329_s2 + $0x58] sm:$0xff] %v1525_v46   ;;  %1045 = vmatpush.msrb.mxu2 %v588_v30  ;;  %v1137_v30 = vmul.f32 %v1915_v58, %v1915_v58  ;;  %v1135_v58 = vmul.f32 %v1873_v45, %v1873_v45 }
 0x157   :  { %1188 = vmatpush.msra.mxu3 %v1119_v6  ;;  %v1132_v45 = vmul.f32 %v2076_v56, %v2076_v56  ;;  %v1106_v56 = vmul.f32 %v2047_v32, %v2047_v32  ;;  %v1103_v32 = vmul.f32 %v1981_v16, %v1981_v16  ;;  %v1098_v16 = vmul.f32 %v1882_v49, %v1882_v49 }
 0x158   :  { %1202 = vmatpush.msrb.mxu1 %v1141_v50  ;;  %1046 = vmatpush.msrb.mxu2 %v585_v17  ;;  %v1114_v17 = vmul.f32 %v2171_v5, %v2171_v5  ;;  %v1157_v49 = vmul.f32 %v2141_v63, %v2141_v63  ;;  %v1152_v63 = vmul.f32 %v2056_v35, %v2056_v35 }
 0x159   :  { %1189 = vmatpush.msra.mxu3 %v1118_v47  ;;  %v1147_v35 = vmul.f32 %v1960_v9, %v1960_v9 }
 0x15a   :  { %1203 = vmatpush.msrb.mxu1 %v1140_v19  ;;  %1047 = vmatpush.msrb.mxu2 %v583_v22  ;;  %v1110_v22 = vmul.f32 %v2107_v13, %v2107_v13  ;;  %v1131_v13 = vmul.f32 %v2060_v43, %v2060_v43  ;;  %v1128_v43 = vmul.f32 %v2008_v24, %v2008_v24 }
 0x15b   :  { %1190 = vmatpush.msra.mxu3 %v1117_v40  ;;  %v1099_v24 = vmul.f32 %v1901_v54, %v1901_v54  ;;  %v1158_v54 = vmul.f32 %v2156_v37, %v2156_v37  ;;  %v1153_v37 = vmul.f32 %v2072_v48, %v2072_v48  ;;  %v1148_v48 = vmul.f32 %v1979_v15, %v1979_v15 }
 0x15c   :  { %1204 = vmatpush.msrb.mxu1 %v1139_v20  ;;  %1048 = vmatpush.msrb.mxu2 %v580_v18  ;;  %v1111_v18 = vmul.f32 %v2126_v12, %v2126_v12  ;;  %v1109_v12 = vmul.f32 %v2085_v61, %v2085_v61  ;;  %v1130_v61 = vmul.f32 %v2049_v33, %v2049_v33 }
 0x15d   :  { %1191 = vmatpush.msra.mxu3 %v1116_v29  ;;  %v1154_v33 = vmul.f32 %v2083_v59, %v2083_v59  ;;  %v1149_v59 = vmul.f32 %v2000_v21, %v2000_v21  ;;  %v1144_v21 = vmul.f32 %v1899_v53, %v1899_v53 }
 0x15e   :  { %1205 = vmatpush.msrb.mxu1 %v1138_v14  ;;  %1049 = vmatpush.msrb.mxu2 %v2171_v5  ;;  %v1112_v5 = vmul.f32 %v2145_v34, %v2145_v34 }
 0x15f   :  { %1192 = vmatpush.msra.mxu3 %v1115_v4 }
 0x160   :  { %1206 = vmatpush.msrb.mxu1 %v1137_v30  ;;  %1050 = vmatpush.msrb.mxu2 %v2158_v42  ;;  %v1133_v42 = vmul.f32 %v2087_v0, %v2087_v0  ;;  %v1107_v0 = vmul.f32 %v2058_v38, %v2058_v38  ;;  %v1104_v38 = vmul.f32 %v2006_v23, %v2006_v23 }
 0x161   :  { %1193 = vmatpush.msra.mxu3 %v1114_v17  ;;  %v1100_v23 = vmul.f32 %v1924_v62, %v1924_v62  ;;  %v1159_v62 = vmul.f32 %v2169_v57, %v2169_v57 }
 0x162   :  { %1207 = vmatpush.msrb.mxu1 %v1136_v7  ;;  %1051 = vmatpush.msrb.mxu2 %v2145_v34  ;;  %v1129_v34 = vmul.f32 %v2030_v28, %v2030_v28  ;;  %v1101_v28 = vmul.f32 %v1941_v3, %v1941_v3  ;;  %v1096_v3 = vmul.f32 %v1846_v36, %v1846_v36 }
 0x163   :  { %1194 = vmatpush.msra.mxu3 %v1113_v1  ;;  %1052 = vmatmul.f32.vlgmr.msrb.gmra.mxu2 %v1706_v10  ;;  %v1155_v36 = vmul.f32 %v2103_v8, %v2103_v8  ;;  %v1150_v8 = vmul.f32 %v2024_v26, %v2024_v26  ;;  %v1145_v26 = vmul.f32 %v1920_v60, %v1920_v60 }
 0x164   :  { %1208 = vmatpush.msrb.mxu1 %v1135_v58  ;;  %1160 = vmatpush.msra.mxu2 %v1111_v18 }
 0x165   :  { %1195 = vmatpush.msra.mxu3 %v1112_v5 }
 0x166   :  { %1209 = vmatpush.msrb.mxu1 %v1134_v52  ;;  %1161 = vmatpush.msra.mxu2 %v1110_v22 }
 0x167   :  { %1196 = vmatmul.f32.vlgmr.msra.gmra.mxu3 %v1706_v10 }
 0x168   :  { %1210 = vmatpush.msrb.mxu1 %v1133_v42  ;;  %1162 = vmatpush.msra.mxu2 %v1109_v12 }
 0x16a   :  { %1211 = vmatpush.msrb.mxu1 %v1132_v45  ;;  %1163 = vmatpush.msra.mxu2 %v1108_v39 }
 0x16c   :  { %1212 = vmatpush.msrb.mxu1 %v1131_v13  ;;  %1164 = vmatpush.msra.mxu2 %v1107_v0 }
 0x16e   :  { %1213 = vmatpush.msrb.mxu1 %v1130_v61  ;;  %1165 = vmatpush.msra.mxu2 %v1106_v56 }
 0x170   :  { %1214 = vmatpush.msrb.mxu1 %v1129_v34  ;;  %1166 = vmatpush.msra.mxu2 %v1105_v51 }
 0x172   :  { %1215 = vmatpush.msrb.mxu1 %v1128_v43  ;;  %1167 = vmatpush.msra.mxu2 %v1104_v38 }
 0x173   :  { %1216 = vmatmul.f32.vlgmr.msrb.gmra.mxu1 %v1706_v10 }
 0x174   :  { %1168 = vmatpush.msra.mxu2 %v1103_v32 }
 0x176   :  { %1169 = vmatpush.msra.mxu2 %v1102_v27 }
 0x178   :  { %1170 = vmatpush.msra.mxu2 %v1101_v28 }
 0x17a   :  { %1171 = vmatpush.msra.mxu2 %v1100_v23 }
 0x17c   :  { %1172 = vmatpush.msra.mxu2 %v1099_v24 }
 0x17e   :  { %1173 = vmatpush.msra.mxu2 %v1098_v16 }
 0x180   :  { %1174 = vmatpush.msra.mxu2 %v1097_v11 }
 0x182   :  { %1175 = vmatpush.msra.mxu2 %v1096_v3 }
 0x183   :  { %1176 = vmatmul.f32.vlgmr.msra.gmra.mxu2 %v1706_v10 }
 0x184   :  { %1220 = vmatpush.msrb.mxu2 %v1159_v62 }
 0x186   :  { %1221 = vmatpush.msrb.mxu2 %v1158_v54 }
 0x188   :  { %1222 = vmatpush.msrb.mxu2 %v1157_v49 }
 0x18a   :  { %1223 = vmatpush.msrb.mxu2 %v1156_v41 }
 0x18c   :  { %1224 = vmatpush.msrb.mxu2 %v1155_v36 }
 0x18e   :  { %1225 = vmatpush.msrb.mxu2 %v1154_v33 }
 0x190   :  { %1226 = vmatpush.msrb.mxu2 %v1153_v37 }
 0x192   :  { %1227 = vmatpush.msrb.mxu2 %v1152_v63 }
 0x194   :  { %1228 = vmatpush.msrb.mxu2 %v1151_v25  ;;  %v1073_v55 = vpop.f32.mrf.mxu3 }
 0x196   :  { %1229 = vmatpush.msrb.mxu2 %v1150_v8 }
 0x198   :  { %1230 = vmatpush.msrb.mxu2 %v1149_v59 }
 0x19a   :  { %1231 = vmatpush.msrb.mxu2 %v1148_v48 }
 0x19c   :  { %1232 = vmatpush.msrb.mxu2 %v1147_v35 }
 0x19e   :  { %1233 = vmatpush.msrb.mxu2 %v1146_v31 }
 0x1a0   :  { %1234 = vmatpush.msrb.mxu2 %v1145_v26 }
 0x1a2   :  { %1235 = vmatpush.msrb.mxu2 %v1144_v21 }
 0x1a3   :  { %1236 = vmatmul.f32.vlgmr.msrb.gmra.mxu2 %v1706_v10 }
 0x1b0   :  { %v1033_v15 = vpop.f32.mrf.mxu1 }
 0x1d0   :  { %v1093_v50 = vpop.f32.mrf.mxu1 }
 0x1e6   :  { %v1053_v57 = vpop.f32.mrf.mxu2 }
 0x1e7   :  { %v1054_v9 = vadd.f32 %v1053_v57, %v1033_v15 }
 0x1e9   :  { %v1074_v44 = vadd.f32 %v1073_v55, %v1054_v9 }
 0x1ea   :  { %v1197_v2 = vpop.f32.mrf.mxu3 }
 0x1eb   :  { %v1094_v46 = vadd.f32 %v1093_v50, %v1074_v44 }
 0x1ed   :  { %1240 = vst [vmem:[%s2330_s3] sm:$0x1] %v1094_v46 }
 0x1f0   :  { %v1217_v19 = vpop.f32.mrf.mxu1 }
 0x206   :  { %v1177_v60 = vpop.f32.mrf.mxu2 }
 0x207   :  { %v1198_v6 = vadd.f32 %v1197_v2, %v1177_v60 }
 0x209   :  { %v1218_v53 = vadd.f32 %v1217_v19, %v1198_v6 }
 0x226   :  { %v1237_v47 = vpop.f32.mrf.mxu2 }
 0x227   :  { %v1238_v40 = vadd.f32 %v1237_v47, %v1218_v53 }
 0x229   :  { %1241 = vst [vmem:[%s2331_s4] sm:$0x1] %v1238_v40 }
 0x22a   :  { %1254 = vsyncpa [#allocation4], 1 }

// kernel: generator_forward.14
= control target key start
LH: loop header
LB: loop body
LE: loop exit
PB: predicated region body
PF: predicated region fallthrough
CT: control target
= control target key end

     0   :  { %s1176_s0 = inlined_call_operand.vmem [shape: bf16[512,128], index: 0, kind: input, shape index: {}]   ;;  %s1177_s1 = inlined_call_operand.vmem [shape: f32[1,128], index: 1, kind: input, shape index: {}]   ;;  %s1178_s2 = inlined_call_operand.vmem [shape: f32[1,128], index: 2, kind: input, shape index: {}]   ;;  %s1179_s3 = inlined_call_operand.vmem [shape: bf16[512,128], index: 3, kind: output, shape index: {}]  }
   0x1   :  { %v475_v0 = vld [vmem:[%s1176_s0] sm:$0xff]   ;;  %v762_v5 = vld [vmem:[%s1176_s0 + $0x8] sm:$0xff]   ;;  %v763_v8 = vld [vmem:[%s1176_s0 + $0x10] sm:$0xff]  }
   0x2   :  { %v852_v1 = vld [vmem:[%s1177_s1] ss:$0 sm:$0xff]  ;;  %v476_v2 = vunpack.c.l.bf16 %v475_v0  ;;  %v477_v3 = vunpack.c.h.bf16 %v475_v0  ;;  %v480_v6 = vunpack.c.l.bf16 %v762_v5  ;;  %v481_v7 = vunpack.c.h.bf16 %v762_v5  ;;  %v764_v9 = vld [vmem:[%s1176_s0 + $0x18] sm:$0xff]   ;;  %v766_v35 = vld [vmem:[%s1176_s0 + $0x28] sm:$0xff]  }
   0x3   :  { %v857_v4 = vld [vmem:[%s1178_s2] ss:$0 sm:$0xff]  ;;  %v484_v12 = vunpack.c.l.bf16 %v763_v8  ;;  %v485_v13 = vunpack.c.h.bf16 %v763_v8  ;;  %v488_v16 = vunpack.c.l.bf16 %v764_v9  ;;  %v489_v17 = vunpack.c.h.bf16 %v764_v9  ;;  %v767_v40 = vld [vmem:[%s1176_s0 + $0x30] sm:$0xff]   ;;  %v768_v45 = vld [vmem:[%s1176_s0 + $0x38] sm:$0xff]  }
   0x4   :  { %v146_v10 = vmul.f32 %v852_v1, %v476_v2  ;;  %v147_v11 = vmul.f32 %v852_v1, %v477_v3  ;;  %v148_v14 = vmul.f32 %v852_v1, %v480_v6  ;;  %v149_v15 = vmul.f32 %v852_v1, %v481_v7  ;;  %v765_v26 = vld [vmem:[%s1176_s0 + $0x20] sm:$0xff]  }
   0x5   :  { %v150_v20 = vmul.f32 %v852_v1, %v484_v12  ;;  %v151_v21 = vmul.f32 %v852_v1, %v485_v13  ;;  %v152_v24 = vmul.f32 %v852_v1, %v488_v16  ;;  %v153_v25 = vmul.f32 %v852_v1, %v489_v17  ;;  %v769_v62 = vld [vmem:[%s1176_s0 + $0x40] sm:$0xff]   ;;  %v770_v13 = vld [vmem:[%s1176_s0 + $0x48] sm:$0xff]  }
   0x6   :  { %v214_v18 = vadd.f32 %v857_v4, %v146_v10  ;;  %v215_v19 = vadd.f32 %v857_v4, %v147_v11  ;;  %v216_v22 = vadd.f32 %v857_v4, %v148_v14  ;;  %v217_v23 = vadd.f32 %v857_v4, %v149_v15 }
   0x7   :  { %v218_v29 = vadd.f32 %v857_v4, %v150_v20  ;;  %v219_v30 = vadd.f32 %v857_v4, %v151_v21  ;;  %v220_v33 = vadd.f32 %v857_v4, %v152_v24  ;;  %v221_v34 = vadd.f32 %v857_v4, %v153_v25 }
   0x8   :  { %v278_v27 = vmax.f32 %v214_v18, 0.0  ;;  %v279_v28 = vmax.f32 %v215_v19, 0.0  ;;  %v280_v31 = vmax.f32 %v216_v22, 0.0  ;;  %v281_v32 = vmax.f32 %v217_v23, 0.0  ;;  %v771_v18 = vld [vmem:[%s1176_s0 + $0x50] sm:$0xff]   ;;  %v772_v23 = vld [vmem:[%s1176_s0 + $0x58] sm:$0xff]  }
   0x9   :  { %v282_v37 = vmax.f32 %v218_v29, 0.0  ;;  %v283_v38 = vmax.f32 %v219_v30, 0.0  ;;  %v492_v39 = vunpack.c.l.bf16 %v765_v26  ;;  %v284_v42 = vmax.f32 %v220_v33, 0.0 }
   0xa   :  { %v605_v36 = vpack.c.bf16 %v279_v28, %v278_v27  ;;  %v610_v41 = vpack.c.bf16 %v281_v32, %v280_v31  ;;  %v285_v43 = vmax.f32 %v221_v34, 0.0  ;;  %v493_v44 = vunpack.c.h.bf16 %v765_v26 }
   0xb   :  { %v615_v46 = vpack.c.bf16 %v283_v38, %v282_v37  ;;  %v154_v47 = vmul.f32 %v852_v1, %v492_v39  ;;  %v496_v48 = vunpack.c.l.bf16 %v766_v35  ;;  %v497_v49 = vunpack.c.h.bf16 %v766_v35 }
   0xc   :  { %606 = vst [vmem:[%s1179_s3] sm:$0xff] %v605_v36   ;;  %v620_v50 = vpack.c.bf16 %v285_v43, %v284_v42  ;;  %v155_v51 = vmul.f32 %v852_v1, %v493_v44  ;;  %v500_v52 = vunpack.c.l.bf16 %v767_v40  ;;  %v501_v53 = vunpack.c.h.bf16 %v767_v40  ;;  %v773_v36 = vld [vmem:[%s1176_s0 + $0x60] sm:$0xff]  }
   0xd   :  { %793 = vst [vmem:[%s1179_s3 + $0x8] sm:$0xff] %v610_v41   ;;  %v222_v54 = vadd.f32 %v857_v4, %v154_v47  ;;  %v156_v55 = vmul.f32 %v852_v1, %v496_v48  ;;  %v157_v56 = vmul.f32 %v852_v1, %v497_v49  ;;  %v504_v57 = vunpack.c.l.bf16 %v768_v45 }
   0xe   :  { %794 = vst [vmem:[%s1179_s3 + $0x10] sm:$0xff] %v615_v46   ;;  %v223_v58 = vadd.f32 %v857_v4, %v155_v51  ;;  %v158_v59 = vmul.f32 %v852_v1, %v500_v52  ;;  %v159_v60 = vmul.f32 %v852_v1, %v501_v53  ;;  %v505_v61 = vunpack.c.h.bf16 %v768_v45  ;;  %v774_v53 = vld [vmem:[%s1176_s0 + $0x68] sm:$0xff]  }
   0xf   :  { %795 = vst [vmem:[%s1179_s3 + $0x18] sm:$0xff] %v620_v50   ;;  %v286_v63 = vmax.f32 %v222_v54, 0.0  ;;  %v224_v0 = vadd.f32 %v857_v4, %v156_v55  ;;  %v225_v2 = vadd.f32 %v857_v4, %v157_v56  ;;  %v160_v3 = vmul.f32 %v852_v1, %v504_v57 }
  0x10   :  { %v287_v5 = vmax.f32 %v223_v58, 0.0  ;;  %v226_v6 = vadd.f32 %v857_v4, %v158_v59  ;;  %v227_v7 = vadd.f32 %v857_v4, %v159_v60  ;;  %v161_v8 = vmul.f32 %v852_v1, %v505_v61  ;;  %v775_v58 = vld [vmem:[%s1176_s0 + $0x70] sm:$0xff]  }
  0x11   :  { %v288_v9 = vmax.f32 %v224_v0, 0.0  ;;  %v289_v10 = vmax.f32 %v225_v2, 0.0  ;;  %v228_v11 = vadd.f32 %v857_v4, %v160_v3  ;;  %v508_v12 = vunpack.c.l.bf16 %v769_v62 }
  0x12   :  { %v625_v14 = vpack.c.bf16 %v287_v5, %v286_v63  ;;  %v290_v15 = vmax.f32 %v226_v6, 0.0  ;;  %v291_v16 = vmax.f32 %v227_v7, 0.0  ;;  %v229_v17 = vadd.f32 %v857_v4, %v161_v8  ;;  %v776_v63 = vld [vmem:[%s1176_s0 + $0x78] sm:$0xff]  }
  0x13   :  { %v630_v19 = vpack.c.bf16 %v289_v10, %v288_v9  ;;  %v292_v20 = vmax.f32 %v228_v11, 0.0  ;;  %v509_v21 = vunpack.c.h.bf16 %v769_v62  ;;  %v162_v22 = vmul.f32 %v852_v1, %v508_v12 }
  0x14   :  { %796 = vst [vmem:[%s1179_s3 + $0x20] sm:$0xff] %v625_v14   ;;  %v635_v24 = vpack.c.bf16 %v291_v16, %v290_v15  ;;  %v293_v25 = vmax.f32 %v229_v17, 0.0  ;;  %v512_v26 = vunpack.c.l.bf16 %v770_v13  ;;  %v513_v27 = vunpack.c.h.bf16 %v770_v13  ;;  %v777_v14 = vld [vmem:[%s1176_s0 + $0x80] sm:$0xff]  }
  0x15   :  { %797 = vst [vmem:[%s1179_s3 + $0x28] sm:$0xff] %v630_v19   ;;  %v163_v28 = vmul.f32 %v852_v1, %v509_v21  ;;  %v230_v29 = vadd.f32 %v857_v4, %v162_v22  ;;  %v516_v30 = vunpack.c.l.bf16 %v771_v18  ;;  %v517_v31 = vunpack.c.h.bf16 %v771_v18 }
  0x16   :  { %798 = vst [vmem:[%s1179_s3 + $0x30] sm:$0xff] %v635_v24   ;;  %v640_v32 = vpack.c.bf16 %v293_v25, %v292_v20  ;;  %v164_v33 = vmul.f32 %v852_v1, %v512_v26  ;;  %v165_v34 = vmul.f32 %v852_v1, %v513_v27  ;;  %v520_v35 = vunpack.c.l.bf16 %v772_v23  ;;  %v778_v27 = vld [vmem:[%s1176_s0 + $0x88] sm:$0xff]  }
  0x17   :  { %v231_v37 = vadd.f32 %v857_v4, %v163_v28  ;;  %v294_v38 = vmax.f32 %v230_v29, 0.0  ;;  %v166_v39 = vmul.f32 %v852_v1, %v516_v30  ;;  %v167_v40 = vmul.f32 %v852_v1, %v517_v31 }
  0x18   :  { %799 = vst [vmem:[%s1179_s3 + $0x38] sm:$0xff] %v640_v32   ;;  %v232_v41 = vadd.f32 %v857_v4, %v164_v33  ;;  %v233_v42 = vadd.f32 %v857_v4, %v165_v34  ;;  %v521_v43 = vunpack.c.h.bf16 %v772_v23  ;;  %v168_v44 = vmul.f32 %v852_v1, %v520_v35 }
  0x19   :  { %v295_v45 = vmax.f32 %v231_v37, 0.0  ;;  %v234_v46 = vadd.f32 %v857_v4, %v166_v39  ;;  %v235_v47 = vadd.f32 %v857_v4, %v167_v40  ;;  %v524_v48 = vunpack.c.l.bf16 %v773_v36 }
  0x1a   :  { %v296_v49 = vmax.f32 %v232_v41, 0.0  ;;  %v297_v50 = vmax.f32 %v233_v42, 0.0  ;;  %v169_v51 = vmul.f32 %v852_v1, %v521_v43  ;;  %v236_v52 = vadd.f32 %v857_v4, %v168_v44  ;;  %v780_v41 = vld [vmem:[%s1176_s0 + $0x98] sm:$0xff]  }
  0x1b   :  { %v645_v54 = vpack.c.bf16 %v295_v45, %v294_v38  ;;  %v298_v55 = vmax.f32 %v234_v46, 0.0  ;;  %v299_v56 = vmax.f32 %v235_v47, 0.0  ;;  %v525_v57 = vunpack.c.h.bf16 %v773_v36  ;;  %v779_v36 = vld [vmem:[%s1176_s0 + $0x90] sm:$0xff]  }
  0x1c   :  { %v650_v59 = vpack.c.bf16 %v297_v50, %v296_v49  ;;  %v237_v60 = vadd.f32 %v857_v4, %v169_v51  ;;  %v300_v61 = vmax.f32 %v236_v52, 0.0  ;;  %v170_v62 = vmul.f32 %v852_v1, %v524_v48 }
  0x1d   :  { %800 = vst [vmem:[%s1179_s3 + $0x40] sm:$0xff] %v645_v54   ;;  %v655_v0 = vpack.c.bf16 %v299_v56, %v298_v55  ;;  %v171_v2 = vmul.f32 %v852_v1, %v525_v57  ;;  %v528_v3 = vunpack.c.l.bf16 %v774_v53  ;;  %v529_v5 = vunpack.c.h.bf16 %v774_v53  ;;  %v781_v54 = vld [vmem:[%s1176_s0 + $0xa0] sm:$0xff]  }
  0x1e   :  { %801 = vst [vmem:[%s1179_s3 + $0x48] sm:$0xff] %v650_v59   ;;  %v301_v6 = vmax.f32 %v237_v60, 0.0  ;;  %v238_v7 = vadd.f32 %v857_v4, %v170_v62  ;;  %v532_v8 = vunpack.c.l.bf16 %v775_v58  ;;  %v533_v9 = vunpack.c.h.bf16 %v775_v58 }
  0x1f   :  { %802 = vst [vmem:[%s1179_s3 + $0x50] sm:$0xff] %v655_v0   ;;  %v239_v10 = vadd.f32 %v857_v4, %v171_v2  ;;  %v172_v11 = vmul.f32 %v852_v1, %v528_v3  ;;  %v173_v12 = vmul.f32 %v852_v1, %v529_v5  ;;  %v536_v13 = vunpack.c.l.bf16 %v776_v63  ;;  %v782_v5 = vld [vmem:[%s1176_s0 + $0xa8] sm:$0xff]  }
  0x20   :  { %v660_v15 = vpack.c.bf16 %v301_v6, %v300_v61  ;;  %v302_v16 = vmax.f32 %v238_v7, 0.0  ;;  %v174_v17 = vmul.f32 %v852_v1, %v532_v8  ;;  %v175_v18 = vmul.f32 %v852_v1, %v533_v9 }
  0x21   :  { %v303_v19 = vmax.f32 %v239_v10, 0.0  ;;  %v240_v20 = vadd.f32 %v857_v4, %v172_v11  ;;  %v241_v21 = vadd.f32 %v857_v4, %v173_v12  ;;  %v537_v22 = vunpack.c.h.bf16 %v776_v63 }
  0x22   :  { %803 = vst [vmem:[%s1179_s3 + $0x58] sm:$0xff] %v660_v15   ;;  %v242_v23 = vadd.f32 %v857_v4, %v174_v17  ;;  %v243_v24 = vadd.f32 %v857_v4, %v175_v18  ;;  %v176_v25 = vmul.f32 %v852_v1, %v536_v13  ;;  %v540_v26 = vunpack.c.l.bf16 %v777_v14 }
  0x23   :  { %v665_v28 = vpack.c.bf16 %v303_v19, %v302_v16  ;;  %v304_v29 = vmax.f32 %v240_v20, 0.0  ;;  %v305_v30 = vmax.f32 %v241_v21, 0.0  ;;  %v177_v31 = vmul.f32 %v852_v1, %v537_v22 }
  0x24   :  { %v306_v32 = vmax.f32 %v242_v23, 0.0  ;;  %v307_v33 = vmax.f32 %v243_v24, 0.0  ;;  %v244_v34 = vadd.f32 %v857_v4, %v176_v25  ;;  %v541_v35 = vunpack.c.h.bf16 %v777_v14  ;;  %v783_v14 = vld [vmem:[%s1176_s0 + $0xb0] sm:$0xff]   ;;  %v784_v23 = vld [vmem:[%s1176_s0 + $0xb8] sm:$0xff]  }
  0x25   :  { %804 = vst [vmem:[%s1179_s3 + $0x60] sm:$0xff] %v665_v28   ;;  %v670_v37 = vpack.c.bf16 %v305_v30, %v304_v29  ;;  %v245_v38 = vadd.f32 %v857_v4, %v177_v31  ;;  %v178_v39 = vmul.f32 %v852_v1, %v540_v26  ;;  %v544_v40 = vunpack.c.l.bf16 %v778_v27 }
  0x26   :  { %v675_v42 = vpack.c.bf16 %v307_v33, %v306_v32  ;;  %v308_v43 = vmax.f32 %v244_v34, 0.0  ;;  %v179_v44 = vmul.f32 %v852_v1, %v541_v35  ;;  %v545_v45 = vunpack.c.h.bf16 %v778_v27  ;;  %v785_v32 = vld [vmem:[%s1176_s0 + $0xc0] sm:$0xff]  }
  0x27   :  { %805 = vst [vmem:[%s1179_s3 + $0x68] sm:$0xff] %v670_v37   ;;  %v309_v46 = vmax.f32 %v245_v38, 0.0  ;;  %v246_v47 = vadd.f32 %v857_v4, %v178_v39  ;;  %v180_v48 = vmul.f32 %v852_v1, %v544_v40  ;;  %v548_v49 = vunpack.c.l.bf16 %v779_v36 }
  0x28   :  { %806 = vst [vmem:[%s1179_s3 + $0x70] sm:$0xff] %v675_v42   ;;  %v247_v50 = vadd.f32 %v857_v4, %v179_v44  ;;  %v181_v51 = vmul.f32 %v852_v1, %v545_v45  ;;  %v549_v52 = vunpack.c.h.bf16 %v779_v36  ;;  %v552_v53 = vunpack.c.l.bf16 %v780_v41  ;;  %v786_v45 = vld [vmem:[%s1176_s0 + $0xc8] sm:$0xff]  }
  0x29   :  { %v680_v55 = vpack.c.bf16 %v309_v46, %v308_v43  ;;  %v310_v56 = vmax.f32 %v246_v47, 0.0  ;;  %v248_v57 = vadd.f32 %v857_v4, %v180_v48  ;;  %v182_v58 = vmul.f32 %v852_v1, %v548_v49 }
  0x2a   :  { %v311_v59 = vmax.f32 %v247_v50, 0.0  ;;  %v249_v60 = vadd.f32 %v857_v4, %v181_v51  ;;  %v183_v61 = vmul.f32 %v852_v1, %v549_v52  ;;  %v553_v62 = vunpack.c.h.bf16 %v780_v41 }
  0x2b   :  { %807 = vst [vmem:[%s1179_s3 + $0x78] sm:$0xff] %v680_v55   ;;  %v312_v63 = vmax.f32 %v248_v57, 0.0  ;;  %v250_v0 = vadd.f32 %v857_v4, %v182_v58  ;;  %v184_v2 = vmul.f32 %v852_v1, %v552_v53  ;;  %v556_v3 = vunpack.c.l.bf16 %v781_v54 }
  0x2c   :  { %v685_v6 = vpack.c.bf16 %v311_v59, %v310_v56  ;;  %v313_v7 = vmax.f32 %v249_v60, 0.0  ;;  %v251_v8 = vadd.f32 %v857_v4, %v183_v61  ;;  %v185_v9 = vmul.f32 %v852_v1, %v553_v62 }
  0x2d   :  { %v314_v10 = vmax.f32 %v250_v0, 0.0  ;;  %v252_v11 = vadd.f32 %v857_v4, %v184_v2  ;;  %v557_v12 = vunpack.c.h.bf16 %v781_v54  ;;  %v186_v13 = vmul.f32 %v852_v1, %v556_v3  ;;  %v787_v54 = vld [vmem:[%s1176_s0 + $0xd0] sm:$0xff]  }
  0x2e   :  { %808 = vst [vmem:[%s1179_s3 + $0x80] sm:$0xff] %v685_v6   ;;  %v690_v15 = vpack.c.bf16 %v313_v7, %v312_v63  ;;  %v315_v16 = vmax.f32 %v251_v8, 0.0  ;;  %v253_v17 = vadd.f32 %v857_v4, %v185_v9  ;;  %v560_v18 = vunpack.c.l.bf16 %v782_v5  ;;  %v788_v63 = vld [vmem:[%s1176_s0 + $0xd8] sm:$0xff]  }
  0x2f   :  { %v316_v19 = vmax.f32 %v252_v11, 0.0  ;;  %v187_v20 = vmul.f32 %v852_v1, %v557_v12  ;;  %v254_v21 = vadd.f32 %v857_v4, %v186_v13  ;;  %v561_v22 = vunpack.c.h.bf16 %v782_v5 }
  0x30   :  { %809 = vst [vmem:[%s1179_s3 + $0x88] sm:$0xff] %v690_v15   ;;  %v695_v24 = vpack.c.bf16 %v315_v16, %v314_v10  ;;  %v317_v25 = vmax.f32 %v253_v17, 0.0  ;;  %v188_v26 = vmul.f32 %v852_v1, %v560_v18  ;;  %v564_v27 = vunpack.c.l.bf16 %v783_v14  ;;  %v789_v10 = vld [vmem:[%s1176_s0 + $0xe0] sm:$0xff]  }
  0x31   :  { %v255_v28 = vadd.f32 %v857_v4, %v187_v20  ;;  %v318_v29 = vmax.f32 %v254_v21, 0.0  ;;  %v189_v30 = vmul.f32 %v852_v1, %v561_v22  ;;  %v565_v31 = vunpack.c.h.bf16 %v783_v14 }
  0x32   :  { %810 = vst [vmem:[%s1179_s3 + $0x90] sm:$0xff] %v695_v24   ;;  %v700_v33 = vpack.c.bf16 %v317_v25, %v316_v19  ;;  %v256_v34 = vadd.f32 %v857_v4, %v188_v26  ;;  %v190_v35 = vmul.f32 %v852_v1, %v564_v27  ;;  %v568_v36 = vunpack.c.l.bf16 %v784_v23 }
  0x33   :  { %v319_v37 = vmax.f32 %v255_v28, 0.0  ;;  %v257_v38 = vadd.f32 %v857_v4, %v189_v30  ;;  %v191_v39 = vmul.f32 %v852_v1, %v565_v31  ;;  %v569_v40 = vunpack.c.h.bf16 %v784_v23  ;;  %v790_v23 = vld [vmem:[%s1176_s0 + $0xe8] sm:$0xff]  }
  0x34   :  { %811 = vst [vmem:[%s1179_s3 + $0x98] sm:$0xff] %v700_v33   ;;  %v320_v41 = vmax.f32 %v256_v34, 0.0  ;;  %v258_v42 = vadd.f32 %v857_v4, %v190_v35  ;;  %v192_v43 = vmul.f32 %v852_v1, %v568_v36  ;;  %v572_v44 = vunpack.c.l.bf16 %v785_v32 }
  0x35   :  { %v705_v46 = vpack.c.bf16 %v319_v37, %v318_v29  ;;  %v321_v47 = vmax.f32 %v257_v38, 0.0  ;;  %v259_v48 = vadd.f32 %v857_v4, %v191_v39  ;;  %v193_v49 = vmul.f32 %v852_v1, %v569_v40 }
  0x36   :  { %v322_v50 = vmax.f32 %v258_v42, 0.0  ;;  %v260_v51 = vadd.f32 %v857_v4, %v192_v43  ;;  %v573_v52 = vunpack.c.h.bf16 %v785_v32  ;;  %v194_v53 = vmul.f32 %v852_v1, %v572_v44  ;;  %v791_v32 = vld [vmem:[%s1176_s0 + $0xf0] sm:$0xff]  }
  0x37   :  { %812 = vst [vmem:[%s1179_s3 + $0xa0] sm:$0xff] %v705_v46   ;;  %v710_v55 = vpack.c.bf16 %v321_v47, %v320_v41  ;;  %v323_v56 = vmax.f32 %v259_v48, 0.0  ;;  %v261_v57 = vadd.f32 %v857_v4, %v193_v49  ;;  %v576_v58 = vunpack.c.l.bf16 %v786_v45  ;;  %v792_v41 = vld [vmem:[%s1176_s0 + $0xf8] sm:$0xff]  }
  0x38   :  { %v324_v59 = vmax.f32 %v260_v51, 0.0  ;;  %v195_v60 = vmul.f32 %v852_v1, %v573_v52  ;;  %v262_v61 = vadd.f32 %v857_v4, %v194_v53  ;;  %v577_v62 = vunpack.c.h.bf16 %v786_v45 }
  0x39   :  { %813 = vst [vmem:[%s1179_s3 + $0xa8] sm:$0xff] %v710_v55   ;;  %v715_v0 = vpack.c.bf16 %v323_v56, %v322_v50  ;;  %v325_v2 = vmax.f32 %v261_v57, 0.0  ;;  %v196_v3 = vmul.f32 %v852_v1, %v576_v58  ;;  %v580_v5 = vunpack.c.l.bf16 %v787_v54 }
  0x3a   :  { %v263_v6 = vadd.f32 %v857_v4, %v195_v60  ;;  %v326_v7 = vmax.f32 %v262_v61, 0.0  ;;  %v197_v8 = vmul.f32 %v852_v1, %v577_v62  ;;  %v581_v9 = vunpack.c.h.bf16 %v787_v54 }
  0x3b   :  { %814 = vst [vmem:[%s1179_s3 + $0xb0] sm:$0xff] %v715_v0   ;;  %v720_v11 = vpack.c.bf16 %v325_v2, %v324_v59  ;;  %v264_v12 = vadd.f32 %v857_v4, %v196_v3  ;;  %v198_v13 = vmul.f32 %v852_v1, %v580_v5  ;;  %v584_v14 = vunpack.c.l.bf16 %v788_v63 }
  0x3c   :  { %v327_v15 = vmax.f32 %v263_v6, 0.0  ;;  %v265_v16 = vadd.f32 %v857_v4, %v197_v8  ;;  %v199_v17 = vmul.f32 %v852_v1, %v581_v9  ;;  %v585_v18 = vunpack.c.h.bf16 %v788_v63 }
  0x3d   :  { %815 = vst [vmem:[%s1179_s3 + $0xb8] sm:$0xff] %v720_v11   ;;  %v328_v19 = vmax.f32 %v264_v12, 0.0  ;;  %v266_v20 = vadd.f32 %v857_v4, %v198_v13  ;;  %v200_v21 = vmul.f32 %v852_v1, %v584_v14  ;;  %v588_v22 = vunpack.c.l.bf16 %v789_v10 }
  0x3e   :  { %v725_v24 = vpack.c.bf16 %v327_v15, %v326_v7  ;;  %v329_v25 = vmax.f32 %v265_v16, 0.0  ;;  %v267_v26 = vadd.f32 %v857_v4, %v199_v17  ;;  %v201_v27 = vmul.f32 %v852_v1, %v585_v18 }
  0x3f   :  { %v330_v28 = vmax.f32 %v266_v20, 0.0  ;;  %v268_v29 = vadd.f32 %v857_v4, %v200_v21  ;;  %v589_v30 = vunpack.c.h.bf16 %v789_v10  ;;  %v202_v31 = vmul.f32 %v852_v1, %v588_v22 }
  0x40   :  { %816 = vst [vmem:[%s1179_s3 + $0xc0] sm:$0xff] %v725_v24   ;;  %v730_v33 = vpack.c.bf16 %v329_v25, %v328_v19  ;;  %v331_v34 = vmax.f32 %v267_v26, 0.0  ;;  %v269_v35 = vadd.f32 %v857_v4, %v201_v27  ;;  %v592_v36 = vunpack.c.l.bf16 %v790_v23 }
  0x41   :  { %v332_v37 = vmax.f32 %v268_v29, 0.0  ;;  %v203_v38 = vmul.f32 %v852_v1, %v589_v30  ;;  %v270_v39 = vadd.f32 %v857_v4, %v202_v31  ;;  %v593_v40 = vunpack.c.h.bf16 %v790_v23 }
  0x42   :  { %817 = vst [vmem:[%s1179_s3 + $0xc8] sm:$0xff] %v730_v33   ;;  %v735_v42 = vpack.c.bf16 %v331_v34, %v330_v28  ;;  %v333_v43 = vmax.f32 %v269_v35, 0.0  ;;  %v204_v44 = vmul.f32 %v852_v1, %v592_v36  ;;  %v596_v45 = vunpack.c.l.bf16 %v791_v32 }
  0x43   :  { %v271_v46 = vadd.f32 %v857_v4, %v203_v38  ;;  %v334_v47 = vmax.f32 %v270_v39, 0.0  ;;  %v205_v48 = vmul.f32 %v852_v1, %v593_v40  ;;  %v597_v49 = vunpack.c.h.bf16 %v791_v32 }
  0x44   :  { %818 = vst [vmem:[%s1179_s3 + $0xd0] sm:$0xff] %v735_v42   ;;  %v740_v50 = vpack.c.bf16 %v333_v43, %v332_v37  ;;  %v272_v51 = vadd.f32 %v857_v4, %v204_v44  ;;  %v206_v52 = vmul.f32 %v852_v1, %v596_v45  ;;  %v600_v53 = vunpack.c.l.bf16 %v792_v41 }
  0x45   :  { %v335_v54 = vmax.f32 %v271_v46, 0.0  ;;  %v273_v55 = vadd.f32 %v857_v4, %v205_v48  ;;  %v207_v56 = vmul.f32 %v852_v1, %v597_v49  ;;  %v601_v57 = vunpack.c.h.bf16 %v792_v41 }
  0x46   :  { %819 = vst [vmem:[%s1179_s3 + $0xd8] sm:$0xff] %v740_v50   ;;  %v336_v58 = vmax.f32 %v272_v51, 0.0  ;;  %v274_v59 = vadd.f32 %v857_v4, %v206_v52  ;;  %v208_v60 = vmul.f32 %v852_v1, %v600_v53 }
  0x47   :  { %v745_v61 = vpack.c.bf16 %v335_v54, %v334_v47  ;;  %v337_v62 = vmax.f32 %v273_v55, 0.0  ;;  %v275_v63 = vadd.f32 %v857_v4, %v207_v56  ;;  %v209_v0 = vmul.f32 %v852_v1, %v601_v57 }
  0x48   :  { %v338_v2 = vmax.f32 %v274_v59, 0.0  ;;  %v276_v3 = vadd.f32 %v857_v4, %v208_v60 }
  0x49   :  { %820 = vst [vmem:[%s1179_s3 + $0xe0] sm:$0xff] %v745_v61   ;;  %v750_v5 = vpack.c.bf16 %v337_v62, %v336_v58  ;;  %v339_v6 = vmax.f32 %v275_v63, 0.0  ;;  %v277_v7 = vadd.f32 %v857_v4, %v209_v0 }
  0x4a   :  { %v340_v8 = vmax.f32 %v276_v3, 0.0 }
  0x4b   :  { %821 = vst [vmem:[%s1179_s3 + $0xe8] sm:$0xff] %v750_v5   ;;  %v755_v9 = vpack.c.bf16 %v339_v6, %v338_v2  ;;  %v341_v10 = vmax.f32 %v277_v7, 0.0 }
  0x4d   :  { %822 = vst [vmem:[%s1179_s3 + $0xf0] sm:$0xff] %v755_v9   ;;  %v760_v1 = vpack.c.bf16 %v341_v10, %v340_v8 }
  0x4f   :  { %823 = vst [vmem:[%s1179_s3 + $0xf8] sm:$0xff] %v760_v1  }

// kernel: generator_forward.15
= control target key start
LH: loop header
LB: loop body
LE: loop exit
PB: predicated region body
PF: predicated region fallthrough
CT: control target
= control target key end

     0   :  { %vm1832_vm0 = vcmask 1041408   ;;  %vm1447_vm1 = vcmask 293888   ;;  %s7553_s1 = inlined_call_operand.vmem [shape: bf16[36,128], index: 1, kind: input, shape index: {}]   ;;  %s7554_s2 = inlined_call_operand.vmem [shape: f32[1,128], index: 2, kind: input, shape index: {}]   ;;  %s7555_s0 = inlined_call_operand.vmem [shape: bf16[2048,36], index: 0, kind: input, shape index: {}]   ;;  %s7556_s3 = inlined_call_operand.vmem [shape: bf16[2048,128], index: 3, kind: output, shape index: {}]  }
   0x1   :  { %v791_v0 = vld [vmem:[%s7553_s1 + $0x10] sm:$0x3]  ;;  %v5065_v4 = vld [vmem:[%s7553_s1 + $0x8] sm:$0xff]  ;;  %v5064_v5 = vld [vmem:[%s7553_s1] sm:$0xff] }
   0x2   :  { %v1441_v1 = vunpack.c.l.b16 %v791_v0  ;;  %v4936_v6 = vld [vmem:[%s7555_s0] sm:$0xff]  ;;  %v4937_v10 = vld [vmem:[%s7555_s0 + $0x8] sm:$0xff]  ;;  %v4938_v14 = vld [vmem:[%s7555_s0 + $0x10] sm:$0xff] }
   0x3   :  { %v4968_v7 = vld [vmem:[%s7555_s0 + $0x100] sm:$0xff]  ;;  %v4969_v11 = vld [vmem:[%s7555_s0 + $0x108] sm:$0xff]  ;;  %v4970_v15 = vld [vmem:[%s7555_s0 + $0x110] sm:$0xff] }
   0x4   :  { %v1444_v2 = vpack.c.b16 %v1441_v1, %v1441_v1  ;;  %v5000_v8 = vld [vmem:[%s7555_s0 + $0x200] sm:$0xff]  ;;  %v5001_v12 = vld [vmem:[%s7555_s0 + $0x208] sm:$0xff]  ;;  %v5002_v16 = vld [vmem:[%s7555_s0 + $0x210] sm:$0xff] }
   0x5   :  { %v5032_v9 = vld [vmem:[%s7555_s0 + $0x300] sm:$0xff]  ;;  %v5033_v13 = vld [vmem:[%s7555_s0 + $0x308] sm:$0xff]  ;;  %v5034_v17 = vld [vmem:[%s7555_s0 + $0x310] sm:$0xff] }
   0x6   :  { %v1834_v3 = vsel %vm1832_vm0, %v1444_v2, 0  ;;  %v4939_v18 = vld [vmem:[%s7555_s0 + $0x18] sm:$0xff]  ;;  %v4940_v22 = vld [vmem:[%s7555_s0 + $0x20] sm:$0xff]  ;;  %v4941_v26 = vld [vmem:[%s7555_s0 + $0x28] sm:$0xff] }
   0x7   :  { %1841 = vmatpush.bf16.msra.mxu0 %v1834_v3  ;;  %5833 = vmatpush.bf16.msra.mxu1 %v1834_v3  ;;  %v4971_v19 = vld [vmem:[%s7555_s0 + $0x118] sm:$0xff]  ;;  %v4972_v23 = vld [vmem:[%s7555_s0 + $0x120] sm:$0xff]  ;;  %v4973_v27 = vld [vmem:[%s7555_s0 + $0x128] sm:$0xff] }
   0x8   :  { %5834 = vmatpush.bf16.msra.mxu2 %v1834_v3  ;;  %5835 = vmatpush.bf16.msra.mxu3 %v1834_v3  ;;  %v5003_v20 = vld [vmem:[%s7555_s0 + $0x218] sm:$0xff]  ;;  %v5004_v24 = vld [vmem:[%s7555_s0 + $0x220] sm:$0xff]  ;;  %v5005_v28 = vld [vmem:[%s7555_s0 + $0x228] sm:$0xff] }
   0x9   :  { %v5035_v21 = vld [vmem:[%s7555_s0 + $0x318] sm:$0xff]  ;;  %v5036_v25 = vld [vmem:[%s7555_s0 + $0x320] sm:$0xff]  ;;  %v5037_v29 = vld [vmem:[%s7555_s0 + $0x328] sm:$0xff] }
   0xa   :  { %v4942_v30 = vld [vmem:[%s7555_s0 + $0x30] sm:$0xff]  ;;  %v4943_v34 = vld [vmem:[%s7555_s0 + $0x38] sm:$0xff]  ;;  %v4944_v38 = vld [vmem:[%s7555_s0 + $0x40] sm:$0xff] }
   0xb   :  { %1842 = vmatpush.bf16.msra.mxu0 %v5065_v4  ;;  %5836 = vmatpush.bf16.msra.mxu1 %v5065_v4  ;;  %v4974_v31 = vld [vmem:[%s7555_s0 + $0x130] sm:$0xff]  ;;  %v4975_v35 = vld [vmem:[%s7555_s0 + $0x138] sm:$0xff]  ;;  %v4976_v39 = vld [vmem:[%s7555_s0 + $0x140] sm:$0xff] }
   0xc   :  { %5837 = vmatpush.bf16.msra.mxu2 %v5065_v4  ;;  %5838 = vmatpush.bf16.msra.mxu3 %v5065_v4  ;;  %v5006_v32 = vld [vmem:[%s7555_s0 + $0x230] sm:$0xff]  ;;  %v5007_v36 = vld [vmem:[%s7555_s0 + $0x238] sm:$0xff]  ;;  %v5008_v42 = vld [vmem:[%s7555_s0 + $0x240] sm:$0xff] }
   0xd   :  { %v5038_v33 = vld [vmem:[%s7555_s0 + $0x330] sm:$0xff]  ;;  %v5039_v37 = vld [vmem:[%s7555_s0 + $0x338] sm:$0xff]  ;;  %v5040_v43 = vld [vmem:[%s7555_s0 + $0x340] sm:$0xff] }
   0xe   :  { %v6529_v44 = vld [vmem:[%s7554_s2] ss:$0 sm:$0xff]  ;;  %v4945_v57 = vld [vmem:[%s7555_s0 + $0x48] sm:$0xff] }
   0xf   :  { %1843 = vmatpush.bf16.msra.mxu0 %v5064_v5  ;;  %5839 = vmatpush.bf16.msra.mxu1 %v5064_v5  ;;  %v4977_v58 = vld [vmem:[%s7555_s0 + $0x148] sm:$0xff] }
  0x10   :  { %5840 = vmatpush.bf16.msra.mxu2 %v5064_v5  ;;  %5841 = vmatpush.bf16.msra.mxu3 %v5064_v5  ;;  %v5009_v0 = vld [vmem:[%s7555_s0 + $0x248] sm:$0xff] }
  0x11   :  { %v5041_v1 = vld [vmem:[%s7555_s0 + $0x348] sm:$0xff] }
  0x12   :  { %4808 = vmatmul.msk.bf16.vlgmr.msra.gmra.mxu0 %vm1447_vm1, %v4936_v6  ;;  %4840 = vmatmul.msk.bf16.vlgmr.msra.gmra.mxu1 %vm1447_vm1, %v4968_v7 }
  0x13   :  { %4872 = vmatmul.msk.bf16.vlgmr.msra.gmra.mxu2 %vm1447_vm1, %v5000_v8  ;;  %4904 = vmatmul.msk.bf16.vlgmr.msra.gmra.mxu3 %vm1447_vm1, %v5032_v9 }
  0x22   :  { %4809 = vmatmul.msk.bf16.gmra.mxu0 %vm1447_vm1, %v4937_v10  ;;  %4841 = vmatmul.msk.bf16.gmra.mxu1 %vm1447_vm1, %v4969_v11 }
  0x23   :  { %4873 = vmatmul.msk.bf16.gmra.mxu2 %vm1447_vm1, %v5001_v12  ;;  %4905 = vmatmul.msk.bf16.gmra.mxu3 %vm1447_vm1, %v5033_v13 }
  0x32   :  { %4810 = vmatmul.msk.bf16.gmra.mxu0 %vm1447_vm1, %v4938_v14  ;;  %4842 = vmatmul.msk.bf16.gmra.mxu1 %vm1447_vm1, %v4970_v15 }
  0x33   :  { %4874 = vmatmul.msk.bf16.gmra.mxu2 %vm1447_vm1, %v5002_v16  ;;  %4906 = vmatmul.msk.bf16.gmra.mxu3 %vm1447_vm1, %v5034_v17 }
  0x42   :  { %4811 = vmatmul.msk.bf16.gmra.mxu0 %vm1447_vm1, %v4939_v18  ;;  %4843 = vmatmul.msk.bf16.gmra.mxu1 %vm1447_vm1, %v4971_v19 }
  0x43   :  { %4875 = vmatmul.msk.bf16.gmra.mxu2 %vm1447_vm1, %v5003_v20  ;;  %4907 = vmatmul.msk.bf16.gmra.mxu3 %vm1447_vm1, %v5035_v21 }
  0x52   :  { %4812 = vmatmul.msk.bf16.gmra.mxu0 %vm1447_vm1, %v4940_v22  ;;  %4844 = vmatmul.msk.bf16.gmra.mxu1 %vm1447_vm1, %v4972_v23 }
  0x53   :  { %4876 = vmatmul.msk.bf16.gmra.mxu2 %vm1447_vm1, %v5004_v24  ;;  %4908 = vmatmul.msk.bf16.gmra.mxu3 %vm1447_vm1, %v5036_v25  ;;  %v4946_v25 = vld [vmem:[%s7555_s0 + $0x50] sm:$0xff] }
  0x62   :  { %4813 = vmatmul.msk.bf16.gmra.mxu0 %vm1447_vm1, %v4941_v26  ;;  %4845 = vmatmul.msk.bf16.gmra.mxu1 %vm1447_vm1, %v4973_v27  ;;  %v4978_v26 = vld [vmem:[%s7555_s0 + $0x150] sm:$0xff] }
  0x63   :  { %4877 = vmatmul.msk.bf16.gmra.mxu2 %vm1447_vm1, %v5005_v28  ;;  %4909 = vmatmul.msk.bf16.gmra.mxu3 %vm1447_vm1, %v5037_v29 }
  0x72   :  { %4814 = vmatmul.msk.bf16.gmra.mxu0 %vm1447_vm1, %v4942_v30  ;;  %4846 = vmatmul.msk.bf16.gmra.mxu1 %vm1447_vm1, %v4974_v31 }
  0x73   :  { %4878 = vmatmul.msk.bf16.gmra.mxu2 %vm1447_vm1, %v5006_v32  ;;  %4910 = vmatmul.msk.bf16.gmra.mxu3 %vm1447_vm1, %v5038_v33  ;;  %v5010_v32 = vld [vmem:[%s7555_s0 + $0x250] sm:$0xff] }
  0x74   :  { %v5042_v33 = vld [vmem:[%s7555_s0 + $0x350] sm:$0xff] }
  0x82   :  { %4815 = vmatmul.msk.bf16.gmra.mxu0 %vm1447_vm1, %v4943_v34  ;;  %4847 = vmatmul.msk.bf16.gmra.mxu1 %vm1447_vm1, %v4975_v35 }
  0x83   :  { %4879 = vmatmul.msk.bf16.gmra.mxu2 %vm1447_vm1, %v5007_v36  ;;  %4911 = vmatmul.msk.bf16.gmra.mxu3 %vm1447_vm1, %v5039_v37 }
  0x8f   :  { %v1845_v40 = vpop.f32.mrf.mxu0  ;;  %v2005_v41 = vpop.f32.mrf.mxu1 }
  0x90   :  { %v3260_v45 = vadd.f32 %v6529_v44, %v1845_v40  ;;  %v3324_v46 = vadd.f32 %v6529_v44, %v2005_v41 }
  0x92   :  { %4816 = vmatmul.msk.bf16.gmra.mxu0 %vm1447_vm1, %v4944_v38  ;;  %4848 = vmatmul.msk.bf16.gmra.mxu1 %vm1447_vm1, %v4976_v39  ;;  %5843 = vtanh.f32 %v3260_v45 }
  0x93   :  { %4880 = vmatmul.msk.bf16.gmra.mxu2 %vm1447_vm1, %v5008_v42  ;;  %4912 = vmatmul.msk.bf16.gmra.mxu3 %vm1447_vm1, %v5040_v43  ;;  %5845 = vtanh.f32 %v3324_v46 }
  0x96   :  { %v2165_v47 = vpop.f32.mrf.mxu2  ;;  %v2325_v48 = vpop.f32.mrf.mxu3 }
  0x97   :  { %v1847_v49 = vpop.f32.mrf.mxu0  ;;  %v2007_v50 = vpop.f32.mrf.mxu1  ;;  %v3388_v53 = vadd.f32 %v6529_v44, %v2165_v47  ;;  %v3452_v54 = vadd.f32 %v6529_v44, %v2325_v48 }
  0x98   :  { %v3261_v51 = vadd.f32 %v6529_v44, %v1847_v49  ;;  %v3325_v52 = vadd.f32 %v6529_v44, %v2007_v50  ;;  %v5844_v59 = vpop.eup %5843 }
  0x99   :  { %v5846_v2 = vpop.eup %5845 }
  0x9a   :  { %5847 = vtanh.f32 %v3261_v51 }
  0x9b   :  { %5849 = vtanh.f32 %v3325_v52 }
  0x9c   :  { %5851 = vtanh.f32 %v3388_v53 }
  0x9d   :  { %5853 = vtanh.f32 %v3452_v54 }
  0x9e   :  { %v2167_v55 = vpop.f32.mrf.mxu2  ;;  %v2327_v56 = vpop.f32.mrf.mxu3 }
  0x9f   :  { %v3389_v60 = vadd.f32 %v6529_v44, %v2167_v55  ;;  %v3453_v61 = vadd.f32 %v6529_v44, %v2327_v56  ;;  %v1850_v62 = vpop.f32.mrf.mxu0  ;;  %v2010_v63 = vpop.f32.mrf.mxu1 }
  0xa0   :  { %v5848_v3 = vpop.eup %5847  ;;  %v3262_v8 = vadd.f32 %v6529_v44, %v1850_v62  ;;  %v3326_v10 = vadd.f32 %v6529_v44, %v2010_v63 }
  0xa1   :  { %5855 = vtanh.f32 %v3389_v60  ;;  %v5850_v4 = vpop.eup %5849  ;;  %v5069_v5 = vpack.c.bf16 %v5848_v3, %v5844_v59  ;;  %v4979_v59 = vld [vmem:[%s7555_s0 + $0x158] sm:$0xff] }
  0xa2   :  { %5857 = vtanh.f32 %v3453_v61  ;;  %4817 = vmatmul.msk.bf16.gmra.mxu0 %vm1447_vm1, %v4945_v57  ;;  %4849 = vmatmul.msk.bf16.gmra.mxu1 %vm1447_vm1, %v4977_v58  ;;  %v5229_v6 = vpack.c.bf16 %v5850_v4, %v5846_v2  ;;  %v5852_v7 = vpop.eup %5851  ;;  %v4947_v58 = vld [vmem:[%s7555_s0 + $0x58] sm:$0xff] }
  0xa3   :  { %4881 = vmatmul.msk.bf16.gmra.mxu2 %vm1447_vm1, %v5009_v0  ;;  %4913 = vmatmul.msk.bf16.gmra.mxu3 %vm1447_vm1, %v5041_v1  ;;  %5070 = vst [vmem:[%s7556_s3] sm:$0xff] %v5069_v5   ;;  %v5854_v9 = vpop.eup %5853  ;;  %5859 = vtanh.f32 %v3262_v8  ;;  %v5011_v1 = vld [vmem:[%s7555_s0 + $0x258] sm:$0xff] }
  0xa4   :  { %5737 = vst [vmem:[%s7556_s3 + $0x100] sm:$0xff] %v5229_v6   ;;  %5861 = vtanh.f32 %v3326_v10  ;;  %v5043_v2 = vld [vmem:[%s7555_s0 + $0x358] sm:$0xff] }
  0xa6   :  { %v2170_v11 = vpop.f32.mrf.mxu2  ;;  %v2330_v12 = vpop.f32.mrf.mxu3 }
  0xa7   :  { %v5856_v13 = vpop.eup %5855  ;;  %v1852_v14 = vpop.f32.mrf.mxu0  ;;  %v3390_v21 = vadd.f32 %v6529_v44, %v2170_v11  ;;  %v3454_v22 = vadd.f32 %v6529_v44, %v2330_v12 }
  0xa8   :  { %v2012_v15 = vpop.f32.mrf.mxu1  ;;  %v5858_v16 = vpop.eup %5857  ;;  %v5389_v17 = vpack.c.bf16 %v5856_v13, %v5852_v7  ;;  %v3263_v18 = vadd.f32 %v6529_v44, %v1852_v14 }
  0xa9   :  { %v3327_v19 = vadd.f32 %v6529_v44, %v2012_v15  ;;  %v5549_v20 = vpack.c.bf16 %v5858_v16, %v5854_v9  ;;  %v5860_v27 = vpop.eup %5859 }
  0xaa   :  { %5769 = vst [vmem:[%s7556_s3 + $0x200] sm:$0xff] %v5389_v17   ;;  %5863 = vtanh.f32 %v3263_v18  ;;  %v5862_v34 = vpop.eup %5861 }
  0xab   :  { %5801 = vst [vmem:[%s7556_s3 + $0x300] sm:$0xff] %v5549_v20   ;;  %5865 = vtanh.f32 %v3327_v19 }
  0xac   :  { %5867 = vtanh.f32 %v3390_v21 }
  0xad   :  { %5869 = vtanh.f32 %v3454_v22 }
  0xae   :  { %v2172_v23 = vpop.f32.mrf.mxu2  ;;  %v2332_v24 = vpop.f32.mrf.mxu3 }
  0xaf   :  { %v3391_v28 = vadd.f32 %v6529_v44, %v2172_v23  ;;  %v3455_v29 = vadd.f32 %v6529_v44, %v2332_v24  ;;  %v1855_v30 = vpop.f32.mrf.mxu0 }
  0xb0   :  { %v2015_v31 = vpop.f32.mrf.mxu1  ;;  %v5864_v35 = vpop.eup %5863  ;;  %v3264_v40 = vadd.f32 %v6529_v44, %v1855_v30 }
  0xb1   :  { %5871 = vtanh.f32 %v3391_v28  ;;  %v5866_v36 = vpop.eup %5865  ;;  %v5074_v37 = vpack.c.bf16 %v5864_v35, %v5860_v27  ;;  %v3328_v42 = vadd.f32 %v6529_v44, %v2015_v31  ;;  %v4980_v27 = vld [vmem:[%s7555_s0 + $0x160] sm:$0xff] }
  0xb2   :  { %5873 = vtanh.f32 %v3455_v29  ;;  %4818 = vmatmul.msk.bf16.gmra.mxu0 %vm1447_vm1, %v4946_v25  ;;  %4850 = vmatmul.msk.bf16.gmra.mxu1 %vm1447_vm1, %v4978_v26  ;;  %v5234_v38 = vpack.c.bf16 %v5866_v36, %v5862_v34  ;;  %v5868_v39 = vpop.eup %5867  ;;  %v4948_v26 = vld [vmem:[%s7555_s0 + $0x60] sm:$0xff] }
  0xb3   :  { %4882 = vmatmul.msk.bf16.gmra.mxu2 %vm1447_vm1, %v5010_v32  ;;  %4914 = vmatmul.msk.bf16.gmra.mxu3 %vm1447_vm1, %v5042_v33  ;;  %5706 = vst [vmem:[%s7556_s3 + $0x8] sm:$0xff] %v5074_v37   ;;  %v5870_v41 = vpop.eup %5869  ;;  %5875 = vtanh.f32 %v3264_v40  ;;  %v5012_v33 = vld [vmem:[%s7555_s0 + $0x260] sm:$0xff] }
  0xb4   :  { %5738 = vst [vmem:[%s7556_s3 + $0x108] sm:$0xff] %v5234_v38   ;;  %5877 = vtanh.f32 %v3328_v42  ;;  %v5044_v34 = vld [vmem:[%s7555_s0 + $0x360] sm:$0xff] }
  0xb6   :  { %v2175_v43 = vpop.f32.mrf.mxu2  ;;  %v2335_v45 = vpop.f32.mrf.mxu3 }
  0xb7   :  { %v5872_v46 = vpop.eup %5871  ;;  %v1857_v47 = vpop.f32.mrf.mxu0  ;;  %v3392_v54 = vadd.f32 %v6529_v44, %v2175_v43  ;;  %v3456_v55 = vadd.f32 %v6529_v44, %v2335_v45 }
  0xb8   :  { %v2017_v48 = vpop.f32.mrf.mxu1  ;;  %v5874_v49 = vpop.eup %5873  ;;  %v5394_v50 = vpack.c.bf16 %v5872_v46, %v5868_v39  ;;  %v3265_v51 = vadd.f32 %v6529_v44, %v1857_v47 }
  0xb9   :  { %v3329_v52 = vadd.f32 %v6529_v44, %v2017_v48  ;;  %v5554_v53 = vpack.c.bf16 %v5874_v49, %v5870_v41  ;;  %v5876_v60 = vpop.eup %5875 }
  0xba   :  { %5770 = vst [vmem:[%s7556_s3 + $0x208] sm:$0xff] %v5394_v50   ;;  %5879 = vtanh.f32 %v3265_v51  ;;  %v5878_v3 = vpop.eup %5877 }
  0xbb   :  { %5802 = vst [vmem:[%s7556_s3 + $0x308] sm:$0xff] %v5554_v53   ;;  %5881 = vtanh.f32 %v3329_v52 }
  0xbc   :  { %5883 = vtanh.f32 %v3392_v54 }
  0xbd   :  { %5885 = vtanh.f32 %v3456_v55 }
  0xbe   :  { %v2177_v56 = vpop.f32.mrf.mxu2  ;;  %v2337_v57 = vpop.f32.mrf.mxu3 }
  0xbf   :  { %v3393_v61 = vadd.f32 %v6529_v44, %v2177_v56  ;;  %v3457_v62 = vadd.f32 %v6529_v44, %v2337_v57  ;;  %v1860_v63 = vpop.f32.mrf.mxu0 }
  0xc0   :  { %v2020_v0 = vpop.f32.mrf.mxu1  ;;  %v5880_v4 = vpop.eup %5879  ;;  %v3266_v9 = vadd.f32 %v6529_v44, %v1860_v63 }
  0xc1   :  { %5887 = vtanh.f32 %v3393_v61  ;;  %v5882_v5 = vpop.eup %5881  ;;  %v5079_v6 = vpack.c.bf16 %v5880_v4, %v5876_v60  ;;  %v3330_v11 = vadd.f32 %v6529_v44, %v2020_v0  ;;  %v4981_v60 = vld [vmem:[%s7555_s0 + $0x168] sm:$0xff] }
  0xc2   :  { %5889 = vtanh.f32 %v3457_v62  ;;  %4819 = vmatmul.msk.bf16.gmra.mxu0 %vm1447_vm1, %v4947_v58  ;;  %4851 = vmatmul.msk.bf16.gmra.mxu1 %vm1447_vm1, %v4979_v59  ;;  %v5239_v7 = vpack.c.bf16 %v5882_v5, %v5878_v3  ;;  %v5884_v8 = vpop.eup %5883  ;;  %v4949_v59 = vld [vmem:[%s7555_s0 + $0x68] sm:$0xff] }
  0xc3   :  { %4883 = vmatmul.msk.bf16.gmra.mxu2 %vm1447_vm1, %v5011_v1  ;;  %4915 = vmatmul.msk.bf16.gmra.mxu3 %vm1447_vm1, %v5043_v2  ;;  %5707 = vst [vmem:[%s7556_s3 + $0x10] sm:$0xff] %v5079_v6   ;;  %v5886_v10 = vpop.eup %5885  ;;  %5891 = vtanh.f32 %v3266_v9  ;;  %v5013_v2 = vld [vmem:[%s7555_s0 + $0x268] sm:$0xff] }
  0xc4   :  { %5739 = vst [vmem:[%s7556_s3 + $0x110] sm:$0xff] %v5239_v7   ;;  %5893 = vtanh.f32 %v3330_v11  ;;  %v5045_v3 = vld [vmem:[%s7555_s0 + $0x368] sm:$0xff] }
  0xc6   :  { %v2180_v12 = vpop.f32.mrf.mxu2  ;;  %v2340_v13 = vpop.f32.mrf.mxu3 }
  0xc7   :  { %v5888_v14 = vpop.eup %5887  ;;  %v1862_v15 = vpop.f32.mrf.mxu0  ;;  %v3394_v22 = vadd.f32 %v6529_v44, %v2180_v12  ;;  %v3458_v23 = vadd.f32 %v6529_v44, %v2340_v13 }
  0xc8   :  { %v2022_v16 = vpop.f32.mrf.mxu1  ;;  %v5890_v17 = vpop.eup %5889  ;;  %v5399_v18 = vpack.c.bf16 %v5888_v14, %v5884_v8  ;;  %v3267_v19 = vadd.f32 %v6529_v44, %v1862_v15 }
  0xc9   :  { %v3331_v20 = vadd.f32 %v6529_v44, %v2022_v16  ;;  %v5559_v21 = vpack.c.bf16 %v5890_v17, %v5886_v10  ;;  %v5892_v28 = vpop.eup %5891 }
  0xca   :  { %5771 = vst [vmem:[%s7556_s3 + $0x210] sm:$0xff] %v5399_v18   ;;  %5895 = vtanh.f32 %v3267_v19  ;;  %v5894_v35 = vpop.eup %5893 }
  0xcb   :  { %5803 = vst [vmem:[%s7556_s3 + $0x310] sm:$0xff] %v5559_v21   ;;  %5897 = vtanh.f32 %v3331_v20 }
  0xcc   :  { %5899 = vtanh.f32 %v3394_v22 }
  0xcd   :  { %5901 = vtanh.f32 %v3458_v23 }
  0xce   :  { %v2182_v24 = vpop.f32.mrf.mxu2  ;;  %v2342_v25 = vpop.f32.mrf.mxu3 }
  0xcf   :  { %v3395_v29 = vadd.f32 %v6529_v44, %v2182_v24  ;;  %v3459_v30 = vadd.f32 %v6529_v44, %v2342_v25  ;;  %v1865_v31 = vpop.f32.mrf.mxu0 }
  0xd0   :  { %v2025_v32 = vpop.f32.mrf.mxu1  ;;  %v5896_v36 = vpop.eup %5895  ;;  %v3268_v41 = vadd.f32 %v6529_v44, %v1865_v31 }
  0xd1   :  { %5903 = vtanh.f32 %v3395_v29  ;;  %v5898_v37 = vpop.eup %5897  ;;  %v5084_v38 = vpack.c.bf16 %v5896_v36, %v5892_v28  ;;  %v3332_v43 = vadd.f32 %v6529_v44, %v2025_v32  ;;  %v4982_v28 = vld [vmem:[%s7555_s0 + $0x170] sm:$0xff] }
  0xd2   :  { %5905 = vtanh.f32 %v3459_v30  ;;  %4820 = vmatmul.msk.bf16.gmra.mxu0 %vm1447_vm1, %v4948_v26  ;;  %4852 = vmatmul.msk.bf16.gmra.mxu1 %vm1447_vm1, %v4980_v27  ;;  %v5244_v39 = vpack.c.bf16 %v5898_v37, %v5894_v35  ;;  %v5900_v40 = vpop.eup %5899  ;;  %v4950_v27 = vld [vmem:[%s7555_s0 + $0x70] sm:$0xff] }
  0xd3   :  { %4884 = vmatmul.msk.bf16.gmra.mxu2 %vm1447_vm1, %v5012_v33  ;;  %4916 = vmatmul.msk.bf16.gmra.mxu3 %vm1447_vm1, %v5044_v34  ;;  %5708 = vst [vmem:[%s7556_s3 + $0x18] sm:$0xff] %v5084_v38   ;;  %v5902_v42 = vpop.eup %5901  ;;  %5907 = vtanh.f32 %v3268_v41  ;;  %v5014_v34 = vld [vmem:[%s7555_s0 + $0x270] sm:$0xff] }
  0xd4   :  { %5740 = vst [vmem:[%s7556_s3 + $0x118] sm:$0xff] %v5244_v39   ;;  %5909 = vtanh.f32 %v3332_v43  ;;  %v5046_v35 = vld [vmem:[%s7555_s0 + $0x370] sm:$0xff] }
  0xd6   :  { %v2185_v45 = vpop.f32.mrf.mxu2  ;;  %v2345_v46 = vpop.f32.mrf.mxu3 }
  0xd7   :  { %v5904_v47 = vpop.eup %5903  ;;  %v1867_v48 = vpop.f32.mrf.mxu0  ;;  %v3396_v55 = vadd.f32 %v6529_v44, %v2185_v45  ;;  %v3460_v56 = vadd.f32 %v6529_v44, %v2345_v46 }
  0xd8   :  { %v2027_v49 = vpop.f32.mrf.mxu1  ;;  %v5906_v50 = vpop.eup %5905  ;;  %v5404_v51 = vpack.c.bf16 %v5904_v47, %v5900_v40  ;;  %v3269_v52 = vadd.f32 %v6529_v44, %v1867_v48 }
  0xd9   :  { %v3333_v53 = vadd.f32 %v6529_v44, %v2027_v49  ;;  %v5564_v54 = vpack.c.bf16 %v5906_v50, %v5902_v42  ;;  %v5908_v61 = vpop.eup %5907 }
  0xda   :  { %5772 = vst [vmem:[%s7556_s3 + $0x218] sm:$0xff] %v5404_v51   ;;  %5911 = vtanh.f32 %v3269_v52  ;;  %v5910_v4 = vpop.eup %5909 }
  0xdb   :  { %5804 = vst [vmem:[%s7556_s3 + $0x318] sm:$0xff] %v5564_v54   ;;  %5913 = vtanh.f32 %v3333_v53 }
  0xdc   :  { %5915 = vtanh.f32 %v3396_v55 }
  0xdd   :  { %5917 = vtanh.f32 %v3460_v56 }
  0xde   :  { %v2187_v57 = vpop.f32.mrf.mxu2  ;;  %v2347_v58 = vpop.f32.mrf.mxu3 }
  0xdf   :  { %v3397_v62 = vadd.f32 %v6529_v44, %v2187_v57  ;;  %v3461_v63 = vadd.f32 %v6529_v44, %v2347_v58  ;;  %v1870_v0 = vpop.f32.mrf.mxu0 }
  0xe0   :  { %v2030_v1 = vpop.f32.mrf.mxu1  ;;  %v5912_v5 = vpop.eup %5911  ;;  %v3270_v10 = vadd.f32 %v6529_v44, %v1870_v0 }
  0xe1   :  { %5919 = vtanh.f32 %v3397_v62  ;;  %v5914_v6 = vpop.eup %5913  ;;  %v5089_v7 = vpack.c.bf16 %v5912_v5, %v5908_v61  ;;  %v3334_v12 = vadd.f32 %v6529_v44, %v2030_v1  ;;  %v4983_v61 = vld [vmem:[%s7555_s0 + $0x178] sm:$0xff] }
  0xe2   :  { %5921 = vtanh.f32 %v3461_v63  ;;  %4821 = vmatmul.msk.bf16.gmra.mxu0 %vm1447_vm1, %v4949_v59  ;;  %4853 = vmatmul.msk.bf16.gmra.mxu1 %vm1447_vm1, %v4981_v60  ;;  %v5249_v8 = vpack.c.bf16 %v5914_v6, %v5910_v4  ;;  %v5916_v9 = vpop.eup %5915  ;;  %v4951_v60 = vld [vmem:[%s7555_s0 + $0x78] sm:$0xff] }
  0xe3   :  { %4885 = vmatmul.msk.bf16.gmra.mxu2 %vm1447_vm1, %v5013_v2  ;;  %4917 = vmatmul.msk.bf16.gmra.mxu3 %vm1447_vm1, %v5045_v3  ;;  %5709 = vst [vmem:[%s7556_s3 + $0x20] sm:$0xff] %v5089_v7   ;;  %v5918_v11 = vpop.eup %5917  ;;  %5923 = vtanh.f32 %v3270_v10  ;;  %v5015_v3 = vld [vmem:[%s7555_s0 + $0x278] sm:$0xff] }
  0xe4   :  { %5741 = vst [vmem:[%s7556_s3 + $0x120] sm:$0xff] %v5249_v8   ;;  %5925 = vtanh.f32 %v3334_v12  ;;  %v5047_v4 = vld [vmem:[%s7555_s0 + $0x378] sm:$0xff] }
  0xe6   :  { %v2190_v13 = vpop.f32.mrf.mxu2  ;;  %v2350_v14 = vpop.f32.mrf.mxu3 }
  0xe7   :  { %v5920_v15 = vpop.eup %5919  ;;  %v1872_v16 = vpop.f32.mrf.mxu0  ;;  %v3398_v23 = vadd.f32 %v6529_v44, %v2190_v13  ;;  %v3462_v24 = vadd.f32 %v6529_v44, %v2350_v14 }
  0xe8   :  { %v2032_v17 = vpop.f32.mrf.mxu1  ;;  %v5922_v18 = vpop.eup %5921  ;;  %v5409_v19 = vpack.c.bf16 %v5920_v15, %v5916_v9  ;;  %v3271_v20 = vadd.f32 %v6529_v44, %v1872_v16 }
  0xe9   :  { %v3335_v21 = vadd.f32 %v6529_v44, %v2032_v17  ;;  %v5569_v22 = vpack.c.bf16 %v5922_v18, %v5918_v11  ;;  %v5924_v29 = vpop.eup %5923 }
  0xea   :  { %5773 = vst [vmem:[%s7556_s3 + $0x220] sm:$0xff] %v5409_v19   ;;  %5927 = vtanh.f32 %v3271_v20  ;;  %v5926_v36 = vpop.eup %5925 }
  0xeb   :  { %5805 = vst [vmem:[%s7556_s3 + $0x320] sm:$0xff] %v5569_v22   ;;  %5929 = vtanh.f32 %v3335_v21 }
  0xec   :  { %5931 = vtanh.f32 %v3398_v23 }
  0xed   :  { %5933 = vtanh.f32 %v3462_v24 }
  0xee   :  { %v2192_v25 = vpop.f32.mrf.mxu2  ;;  %v2352_v26 = vpop.f32.mrf.mxu3 }
  0xef   :  { %v3399_v30 = vadd.f32 %v6529_v44, %v2192_v25  ;;  %v3463_v31 = vadd.f32 %v6529_v44, %v2352_v26  ;;  %v1875_v32 = vpop.f32.mrf.mxu0 }
  0xf0   :  { %v2035_v33 = vpop.f32.mrf.mxu1  ;;  %v5928_v37 = vpop.eup %5927  ;;  %v3272_v42 = vadd.f32 %v6529_v44, %v1875_v32 }
  0xf1   :  { %5935 = vtanh.f32 %v3399_v30  ;;  %v5930_v38 = vpop.eup %5929  ;;  %v5094_v39 = vpack.c.bf16 %v5928_v37, %v5924_v29  ;;  %v3336_v45 = vadd.f32 %v6529_v44, %v2035_v33  ;;  %v4984_v29 = vld [vmem:[%s7555_s0 + $0x180] sm:$0xff] }
  0xf2   :  { %5937 = vtanh.f32 %v3463_v31  ;;  %4822 = vmatmul.msk.bf16.gmra.mxu0 %vm1447_vm1, %v4950_v27  ;;  %4854 = vmatmul.msk.bf16.gmra.mxu1 %vm1447_vm1, %v4982_v28  ;;  %v5254_v40 = vpack.c.bf16 %v5930_v38, %v5926_v36  ;;  %v5932_v41 = vpop.eup %5931  ;;  %v4952_v28 = vld [vmem:[%s7555_s0 + $0x80] sm:$0xff] }
  0xf3   :  { %4886 = vmatmul.msk.bf16.gmra.mxu2 %vm1447_vm1, %v5014_v34  ;;  %4918 = vmatmul.msk.bf16.gmra.mxu3 %vm1447_vm1, %v5046_v35  ;;  %5710 = vst [vmem:[%s7556_s3 + $0x28] sm:$0xff] %v5094_v39   ;;  %v5934_v43 = vpop.eup %5933  ;;  %5939 = vtanh.f32 %v3272_v42  ;;  %v5016_v35 = vld [vmem:[%s7555_s0 + $0x280] sm:$0xff] }
  0xf4   :  { %5742 = vst [vmem:[%s7556_s3 + $0x128] sm:$0xff] %v5254_v40   ;;  %5941 = vtanh.f32 %v3336_v45  ;;  %v5048_v36 = vld [vmem:[%s7555_s0 + $0x380] sm:$0xff] }
  0xf6   :  { %v2195_v46 = vpop.f32.mrf.mxu2  ;;  %v2355_v47 = vpop.f32.mrf.mxu3 }
  0xf7   :  { %v5936_v48 = vpop.eup %5935  ;;  %v1877_v49 = vpop.f32.mrf.mxu0  ;;  %v3400_v56 = vadd.f32 %v6529_v44, %v2195_v46  ;;  %v3464_v57 = vadd.f32 %v6529_v44, %v2355_v47 }
  0xf8   :  { %v2037_v50 = vpop.f32.mrf.mxu1  ;;  %v5938_v51 = vpop.eup %5937  ;;  %v5414_v52 = vpack.c.bf16 %v5936_v48, %v5932_v41  ;;  %v3273_v53 = vadd.f32 %v6529_v44, %v1877_v49 }
  0xf9   :  { %v3337_v54 = vadd.f32 %v6529_v44, %v2037_v50  ;;  %v5574_v55 = vpack.c.bf16 %v5938_v51, %v5934_v43  ;;  %v5940_v62 = vpop.eup %5939 }
  0xfa   :  { %5774 = vst [vmem:[%s7556_s3 + $0x228] sm:$0xff] %v5414_v52   ;;  %5943 = vtanh.f32 %v3273_v53  ;;  %v5942_v5 = vpop.eup %5941 }
  0xfb   :  { %5806 = vst [vmem:[%s7556_s3 + $0x328] sm:$0xff] %v5574_v55   ;;  %5945 = vtanh.f32 %v3337_v54 }
  0xfc   :  { %5947 = vtanh.f32 %v3400_v56 }
  0xfd   :  { %5949 = vtanh.f32 %v3464_v57 }
  0xfe   :  { %v2197_v58 = vpop.f32.mrf.mxu2  ;;  %v2357_v59 = vpop.f32.mrf.mxu3 }
  0xff   :  { %v3401_v63 = vadd.f32 %v6529_v44, %v2197_v58  ;;  %v3465_v0 = vadd.f32 %v6529_v44, %v2357_v59  ;;  %v1880_v1 = vpop.f32.mrf.mxu0 }
 0x100   :  { %v2040_v2 = vpop.f32.mrf.mxu1  ;;  %v5944_v6 = vpop.eup %5943  ;;  %v3274_v11 = vadd.f32 %v6529_v44, %v1880_v1 }
 0x101   :  { %5951 = vtanh.f32 %v3401_v63  ;;  %v5946_v7 = vpop.eup %5945  ;;  %v5099_v8 = vpack.c.bf16 %v5944_v6, %v5940_v62  ;;  %v3338_v13 = vadd.f32 %v6529_v44, %v2040_v2  ;;  %v4985_v62 = vld [vmem:[%s7555_s0 + $0x188] sm:$0xff] }
 0x102   :  { %5953 = vtanh.f32 %v3465_v0  ;;  %4823 = vmatmul.msk.bf16.gmra.mxu0 %vm1447_vm1, %v4951_v60  ;;  %4855 = vmatmul.msk.bf16.gmra.mxu1 %vm1447_vm1, %v4983_v61  ;;  %v5259_v9 = vpack.c.bf16 %v5946_v7, %v5942_v5  ;;  %v5948_v10 = vpop.eup %5947  ;;  %v4953_v61 = vld [vmem:[%s7555_s0 + $0x88] sm:$0xff] }
 0x103   :  { %4887 = vmatmul.msk.bf16.gmra.mxu2 %vm1447_vm1, %v5015_v3  ;;  %4919 = vmatmul.msk.bf16.gmra.mxu3 %vm1447_vm1, %v5047_v4  ;;  %5711 = vst [vmem:[%s7556_s3 + $0x30] sm:$0xff] %v5099_v8   ;;  %v5950_v12 = vpop.eup %5949  ;;  %5955 = vtanh.f32 %v3274_v11  ;;  %v5017_v4 = vld [vmem:[%s7555_s0 + $0x288] sm:$0xff] }
 0x104   :  { %5743 = vst [vmem:[%s7556_s3 + $0x130] sm:$0xff] %v5259_v9   ;;  %5957 = vtanh.f32 %v3338_v13  ;;  %v5049_v5 = vld [vmem:[%s7555_s0 + $0x388] sm:$0xff] }
 0x106   :  { %v2200_v14 = vpop.f32.mrf.mxu2  ;;  %v2360_v15 = vpop.f32.mrf.mxu3 }
 0x107   :  { %v5952_v16 = vpop.eup %5951  ;;  %v1882_v17 = vpop.f32.mrf.mxu0  ;;  %v3402_v24 = vadd.f32 %v6529_v44, %v2200_v14  ;;  %v3466_v25 = vadd.f32 %v6529_v44, %v2360_v15 }
 0x108   :  { %v2042_v18 = vpop.f32.mrf.mxu1  ;;  %v5954_v19 = vpop.eup %5953  ;;  %v5419_v20 = vpack.c.bf16 %v5952_v16, %v5948_v10  ;;  %v3275_v21 = vadd.f32 %v6529_v44, %v1882_v17 }
 0x109   :  { %v3339_v22 = vadd.f32 %v6529_v44, %v2042_v18  ;;  %v5579_v23 = vpack.c.bf16 %v5954_v19, %v5950_v12  ;;  %v5956_v30 = vpop.eup %5955 }
 0x10a   :  { %5775 = vst [vmem:[%s7556_s3 + $0x230] sm:$0xff] %v5419_v20   ;;  %5959 = vtanh.f32 %v3275_v21  ;;  %v5958_v37 = vpop.eup %5957 }
 0x10b   :  { %5807 = vst [vmem:[%s7556_s3 + $0x330] sm:$0xff] %v5579_v23   ;;  %5961 = vtanh.f32 %v3339_v22 }
 0x10c   :  { %5963 = vtanh.f32 %v3402_v24 }
 0x10d   :  { %5965 = vtanh.f32 %v3466_v25 }
 0x10e   :  { %v2202_v26 = vpop.f32.mrf.mxu2  ;;  %v2362_v27 = vpop.f32.mrf.mxu3 }
 0x10f   :  { %v3403_v31 = vadd.f32 %v6529_v44, %v2202_v26  ;;  %v3467_v32 = vadd.f32 %v6529_v44, %v2362_v27  ;;  %v1885_v33 = vpop.f32.mrf.mxu0 }
 0x110   :  { %v2045_v34 = vpop.f32.mrf.mxu1  ;;  %v5960_v38 = vpop.eup %5959  ;;  %v3276_v43 = vadd.f32 %v6529_v44, %v1885_v33 }
 0x111   :  { %5967 = vtanh.f32 %v3403_v31  ;;  %v5962_v39 = vpop.eup %5961  ;;  %v5104_v40 = vpack.c.bf16 %v5960_v38, %v5956_v30  ;;  %v3340_v46 = vadd.f32 %v6529_v44, %v2045_v34  ;;  %v4986_v30 = vld [vmem:[%s7555_s0 + $0x190] sm:$0xff] }
 0x112   :  { %5969 = vtanh.f32 %v3467_v32  ;;  %4824 = vmatmul.msk.bf16.gmra.mxu0 %vm1447_vm1, %v4952_v28  ;;  %4856 = vmatmul.msk.bf16.gmra.mxu1 %vm1447_vm1, %v4984_v29  ;;  %v5264_v41 = vpack.c.bf16 %v5962_v39, %v5958_v37  ;;  %v5964_v42 = vpop.eup %5963  ;;  %v4954_v29 = vld [vmem:[%s7555_s0 + $0x90] sm:$0xff] }
 0x113   :  { %4888 = vmatmul.msk.bf16.gmra.mxu2 %vm1447_vm1, %v5016_v35  ;;  %4920 = vmatmul.msk.bf16.gmra.mxu3 %vm1447_vm1, %v5048_v36  ;;  %5712 = vst [vmem:[%s7556_s3 + $0x38] sm:$0xff] %v5104_v40   ;;  %v5966_v45 = vpop.eup %5965  ;;  %5971 = vtanh.f32 %v3276_v43  ;;  %v5018_v36 = vld [vmem:[%s7555_s0 + $0x290] sm:$0xff] }
 0x114   :  { %5744 = vst [vmem:[%s7556_s3 + $0x138] sm:$0xff] %v5264_v41   ;;  %5973 = vtanh.f32 %v3340_v46  ;;  %v5050_v37 = vld [vmem:[%s7555_s0 + $0x390] sm:$0xff] }
 0x116   :  { %v2205_v47 = vpop.f32.mrf.mxu2  ;;  %v2365_v48 = vpop.f32.mrf.mxu3 }
 0x117   :  { %v5968_v49 = vpop.eup %5967  ;;  %v1887_v50 = vpop.f32.mrf.mxu0  ;;  %v3404_v57 = vadd.f32 %v6529_v44, %v2205_v47  ;;  %v3468_v58 = vadd.f32 %v6529_v44, %v2365_v48 }
 0x118   :  { %v2047_v51 = vpop.f32.mrf.mxu1  ;;  %v5970_v52 = vpop.eup %5969  ;;  %v5424_v53 = vpack.c.bf16 %v5968_v49, %v5964_v42  ;;  %v3277_v54 = vadd.f32 %v6529_v44, %v1887_v50 }
 0x119   :  { %v3341_v55 = vadd.f32 %v6529_v44, %v2047_v51  ;;  %v5584_v56 = vpack.c.bf16 %v5970_v52, %v5966_v45  ;;  %v5972_v63 = vpop.eup %5971 }
 0x11a   :  { %5776 = vst [vmem:[%s7556_s3 + $0x238] sm:$0xff] %v5424_v53   ;;  %5975 = vtanh.f32 %v3277_v54  ;;  %v5974_v6 = vpop.eup %5973 }
 0x11b   :  { %5808 = vst [vmem:[%s7556_s3 + $0x338] sm:$0xff] %v5584_v56   ;;  %5977 = vtanh.f32 %v3341_v55 }
 0x11c   :  { %5979 = vtanh.f32 %v3404_v57 }
 0x11d   :  { %5981 = vtanh.f32 %v3468_v58 }
 0x11e   :  { %v2207_v59 = vpop.f32.mrf.mxu2  ;;  %v2367_v60 = vpop.f32.mrf.mxu3 }
 0x11f   :  { %v3405_v0 = vadd.f32 %v6529_v44, %v2207_v59  ;;  %v3469_v1 = vadd.f32 %v6529_v44, %v2367_v60  ;;  %v1890_v2 = vpop.f32.mrf.mxu0 }
 0x120   :  { %v2050_v3 = vpop.f32.mrf.mxu1  ;;  %v5976_v7 = vpop.eup %5975  ;;  %v3278_v12 = vadd.f32 %v6529_v44, %v1890_v2 }
 0x121   :  { %5983 = vtanh.f32 %v3405_v0  ;;  %v5978_v8 = vpop.eup %5977  ;;  %v5109_v9 = vpack.c.bf16 %v5976_v7, %v5972_v63  ;;  %v3342_v14 = vadd.f32 %v6529_v44, %v2050_v3  ;;  %v4987_v63 = vld [vmem:[%s7555_s0 + $0x198] sm:$0xff] }
 0x122   :  { %5985 = vtanh.f32 %v3469_v1  ;;  %4825 = vmatmul.msk.bf16.gmra.mxu0 %vm1447_vm1, %v4953_v61  ;;  %4857 = vmatmul.msk.bf16.gmra.mxu1 %vm1447_vm1, %v4985_v62  ;;  %v5269_v10 = vpack.c.bf16 %v5978_v8, %v5974_v6  ;;  %v5980_v11 = vpop.eup %5979  ;;  %v4955_v62 = vld [vmem:[%s7555_s0 + $0x98] sm:$0xff] }
 0x123   :  { %4889 = vmatmul.msk.bf16.gmra.mxu2 %vm1447_vm1, %v5017_v4  ;;  %4921 = vmatmul.msk.bf16.gmra.mxu3 %vm1447_vm1, %v5049_v5  ;;  %5713 = vst [vmem:[%s7556_s3 + $0x40] sm:$0xff] %v5109_v9   ;;  %v5982_v13 = vpop.eup %5981  ;;  %5987 = vtanh.f32 %v3278_v12  ;;  %v5019_v5 = vld [vmem:[%s7555_s0 + $0x298] sm:$0xff]  ;;  %v6928_v12 = vld [vmem:[%s7554_s2] ss:$0 sm:$0xff] }
 0x124   :  { %5745 = vst [vmem:[%s7556_s3 + $0x140] sm:$0xff] %v5269_v10   ;;  %5989 = vtanh.f32 %v3342_v14  ;;  %v5051_v6 = vld [vmem:[%s7555_s0 + $0x398] sm:$0xff] }
 0x126   :  { %v2210_v15 = vpop.f32.mrf.mxu2  ;;  %v2370_v16 = vpop.f32.mrf.mxu3 }
 0x127   :  { %v5984_v17 = vpop.eup %5983  ;;  %v1892_v18 = vpop.f32.mrf.mxu0  ;;  %v3406_v25 = vadd.f32 %v6529_v44, %v2210_v15  ;;  %v3470_v26 = vadd.f32 %v6529_v44, %v2370_v16 }
 0x128   :  { %v2052_v19 = vpop.f32.mrf.mxu1  ;;  %v5986_v20 = vpop.eup %5985  ;;  %v5429_v21 = vpack.c.bf16 %v5984_v17, %v5980_v11  ;;  %v3279_v22 = vadd.f32 %v6529_v44, %v1892_v18 }
 0x129   :  { %v3343_v23 = vadd.f32 %v6529_v44, %v2052_v19  ;;  %v5589_v24 = vpack.c.bf16 %v5986_v20, %v5982_v13  ;;  %v5988_v31 = vpop.eup %5987 }
 0x12a   :  { %5777 = vst [vmem:[%s7556_s3 + $0x240] sm:$0xff] %v5429_v21   ;;  %5991 = vtanh.f32 %v3279_v22  ;;  %v5990_v38 = vpop.eup %5989 }
 0x12b   :  { %5809 = vst [vmem:[%s7556_s3 + $0x340] sm:$0xff] %v5589_v24   ;;  %5993 = vtanh.f32 %v3343_v23 }
 0x12c   :  { %5995 = vtanh.f32 %v3406_v25 }
 0x12d   :  { %5997 = vtanh.f32 %v3470_v26 }
 0x12e   :  { %v2212_v27 = vpop.f32.mrf.mxu2  ;;  %v2372_v28 = vpop.f32.mrf.mxu3 }
 0x12f   :  { %v3407_v32 = vadd.f32 %v6529_v44, %v2212_v27  ;;  %v3471_v33 = vadd.f32 %v6529_v44, %v2372_v28  ;;  %v1895_v34 = vpop.f32.mrf.mxu0 }
 0x130   :  { %v2055_v35 = vpop.f32.mrf.mxu1  ;;  %v5992_v39 = vpop.eup %5991  ;;  %v3280_v45 = vadd.f32 %v6529_v44, %v1895_v34 }
 0x131   :  { %5999 = vtanh.f32 %v3407_v32  ;;  %v5994_v40 = vpop.eup %5993  ;;  %v5114_v41 = vpack.c.bf16 %v5992_v39, %v5988_v31  ;;  %v3344_v47 = vadd.f32 %v6529_v44, %v2055_v35  ;;  %v4988_v31 = vld [vmem:[%s7555_s0 + $0x1a0] sm:$0xff] }
 0x132   :  { %6001 = vtanh.f32 %v3471_v33  ;;  %4826 = vmatmul.msk.bf16.gmra.mxu0 %vm1447_vm1, %v4954_v29  ;;  %4858 = vmatmul.msk.bf16.gmra.mxu1 %vm1447_vm1, %v4986_v30  ;;  %v5274_v42 = vpack.c.bf16 %v5994_v40, %v5990_v38  ;;  %v5996_v43 = vpop.eup %5995  ;;  %v4956_v30 = vld [vmem:[%s7555_s0 + $0xa0] sm:$0xff] }
 0x133   :  { %4890 = vmatmul.msk.bf16.gmra.mxu2 %vm1447_vm1, %v5018_v36  ;;  %4922 = vmatmul.msk.bf16.gmra.mxu3 %vm1447_vm1, %v5050_v37  ;;  %5714 = vst [vmem:[%s7556_s3 + $0x48] sm:$0xff] %v5114_v41   ;;  %v5998_v46 = vpop.eup %5997  ;;  %6003 = vtanh.f32 %v3280_v45  ;;  %v5020_v37 = vld [vmem:[%s7555_s0 + $0x2a0] sm:$0xff] }
 0x134   :  { %5746 = vst [vmem:[%s7556_s3 + $0x148] sm:$0xff] %v5274_v42   ;;  %6005 = vtanh.f32 %v3344_v47  ;;  %v5052_v38 = vld [vmem:[%s7555_s0 + $0x3a0] sm:$0xff] }
 0x136   :  { %v2215_v48 = vpop.f32.mrf.mxu2  ;;  %v2375_v49 = vpop.f32.mrf.mxu3 }
 0x137   :  { %v6000_v50 = vpop.eup %5999  ;;  %v1897_v51 = vpop.f32.mrf.mxu0  ;;  %v3408_v58 = vadd.f32 %v6529_v44, %v2215_v48  ;;  %v3472_v59 = vadd.f32 %v6529_v44, %v2375_v49 }
 0x138   :  { %v2057_v52 = vpop.f32.mrf.mxu1  ;;  %v6002_v53 = vpop.eup %6001  ;;  %v5434_v54 = vpack.c.bf16 %v6000_v50, %v5996_v43  ;;  %v3281_v55 = vadd.f32 %v6529_v44, %v1897_v51 }
 0x139   :  { %v3345_v56 = vadd.f32 %v6529_v44, %v2057_v52  ;;  %v5594_v57 = vpack.c.bf16 %v6002_v53, %v5998_v46  ;;  %v6004_v0 = vpop.eup %6003 }
 0x13a   :  { %5778 = vst [vmem:[%s7556_s3 + $0x248] sm:$0xff] %v5434_v54   ;;  %6007 = vtanh.f32 %v3281_v55  ;;  %v6006_v7 = vpop.eup %6005 }
 0x13b   :  { %5810 = vst [vmem:[%s7556_s3 + $0x348] sm:$0xff] %v5594_v57   ;;  %6009 = vtanh.f32 %v3345_v56 }
 0x13c   :  { %6011 = vtanh.f32 %v3408_v58 }
 0x13d   :  { %6013 = vtanh.f32 %v3472_v59 }
 0x13e   :  { %v2217_v60 = vpop.f32.mrf.mxu2  ;;  %v2377_v61 = vpop.f32.mrf.mxu3 }
 0x13f   :  { %v3409_v1 = vadd.f32 %v6529_v44, %v2217_v60  ;;  %v3473_v2 = vadd.f32 %v6529_v44, %v2377_v61  ;;  %v1900_v3 = vpop.f32.mrf.mxu0 }
 0x140   :  { %v2060_v4 = vpop.f32.mrf.mxu1  ;;  %v6008_v8 = vpop.eup %6007  ;;  %v3282_v13 = vadd.f32 %v6928_v12, %v1900_v3 }
 0x141   :  { %6015 = vtanh.f32 %v3409_v1  ;;  %v6010_v9 = vpop.eup %6009  ;;  %v5119_v10 = vpack.c.bf16 %v6008_v8, %v6004_v0  ;;  %v3346_v15 = vadd.f32 %v6928_v12, %v2060_v4  ;;  %v4989_v0 = vld [vmem:[%s7555_s0 + $0x1a8] sm:$0xff] }
 0x142   :  { %6017 = vtanh.f32 %v3473_v2  ;;  %4827 = vmatmul.msk.bf16.gmra.mxu0 %vm1447_vm1, %v4955_v62  ;;  %4859 = vmatmul.msk.bf16.gmra.mxu1 %vm1447_vm1, %v4987_v63  ;;  %v5279_v44 = vpack.c.bf16 %v6010_v9, %v6006_v7  ;;  %v6012_v11 = vpop.eup %6011  ;;  %v4957_v63 = vld [vmem:[%s7555_s0 + $0xa8] sm:$0xff] }
 0x143   :  { %4891 = vmatmul.msk.bf16.gmra.mxu2 %vm1447_vm1, %v5019_v5  ;;  %4923 = vmatmul.msk.bf16.gmra.mxu3 %vm1447_vm1, %v5051_v6  ;;  %5715 = vst [vmem:[%s7556_s3 + $0x50] sm:$0xff] %v5119_v10   ;;  %v6014_v14 = vpop.eup %6013  ;;  %6019 = vtanh.f32 %v3282_v13  ;;  %v5021_v6 = vld [vmem:[%s7555_s0 + $0x2a8] sm:$0xff] }
 0x144   :  { %5747 = vst [vmem:[%s7556_s3 + $0x150] sm:$0xff] %v5279_v44   ;;  %6021 = vtanh.f32 %v3346_v15  ;;  %v5053_v7 = vld [vmem:[%s7555_s0 + $0x3a8] sm:$0xff] }
 0x146   :  { %v2220_v16 = vpop.f32.mrf.mxu2  ;;  %v2380_v17 = vpop.f32.mrf.mxu3 }
 0x147   :  { %v6016_v18 = vpop.eup %6015  ;;  %v1902_v19 = vpop.f32.mrf.mxu0  ;;  %v3410_v26 = vadd.f32 %v6928_v12, %v2220_v16  ;;  %v3474_v27 = vadd.f32 %v6928_v12, %v2380_v17 }
 0x148   :  { %v2062_v20 = vpop.f32.mrf.mxu1  ;;  %v6018_v21 = vpop.eup %6017  ;;  %v5439_v22 = vpack.c.bf16 %v6016_v18, %v6012_v11  ;;  %v3283_v23 = vadd.f32 %v6928_v12, %v1902_v19 }
 0x149   :  { %v3347_v24 = vadd.f32 %v6928_v12, %v2062_v20  ;;  %v5599_v25 = vpack.c.bf16 %v6018_v21, %v6014_v14  ;;  %v6020_v32 = vpop.eup %6019 }
 0x14a   :  { %5779 = vst [vmem:[%s7556_s3 + $0x250] sm:$0xff] %v5439_v22   ;;  %6023 = vtanh.f32 %v3283_v23  ;;  %v6022_v39 = vpop.eup %6021 }
 0x14b   :  { %5811 = vst [vmem:[%s7556_s3 + $0x350] sm:$0xff] %v5599_v25   ;;  %6025 = vtanh.f32 %v3347_v24 }
 0x14c   :  { %6027 = vtanh.f32 %v3410_v26 }
 0x14d   :  { %6029 = vtanh.f32 %v3474_v27 }
 0x14e   :  { %v2222_v28 = vpop.f32.mrf.mxu2  ;;  %v2382_v29 = vpop.f32.mrf.mxu3 }
 0x14f   :  { %v3411_v33 = vadd.f32 %v6928_v12, %v2222_v28  ;;  %v3475_v34 = vadd.f32 %v6928_v12, %v2382_v29  ;;  %v1905_v35 = vpop.f32.mrf.mxu0 }
 0x150   :  { %v2065_v36 = vpop.f32.mrf.mxu1  ;;  %v6024_v40 = vpop.eup %6023  ;;  %v3284_v46 = vadd.f32 %v6928_v12, %v1905_v35 }
 0x151   :  { %6031 = vtanh.f32 %v3411_v33  ;;  %v6026_v41 = vpop.eup %6025  ;;  %v5124_v42 = vpack.c.bf16 %v6024_v40, %v6020_v32  ;;  %v3348_v48 = vadd.f32 %v6928_v12, %v2065_v36  ;;  %v4990_v32 = vld [vmem:[%s7555_s0 + $0x1b0] sm:$0xff] }
 0x152   :  { %6033 = vtanh.f32 %v3475_v34  ;;  %4828 = vmatmul.msk.bf16.gmra.mxu0 %vm1447_vm1, %v4956_v30  ;;  %4860 = vmatmul.msk.bf16.gmra.mxu1 %vm1447_vm1, %v4988_v31  ;;  %v5284_v43 = vpack.c.bf16 %v6026_v41, %v6022_v39  ;;  %v6028_v45 = vpop.eup %6027  ;;  %v4958_v31 = vld [vmem:[%s7555_s0 + $0xb0] sm:$0xff] }
 0x153   :  { %4892 = vmatmul.msk.bf16.gmra.mxu2 %vm1447_vm1, %v5020_v37  ;;  %4924 = vmatmul.msk.bf16.gmra.mxu3 %vm1447_vm1, %v5052_v38  ;;  %5716 = vst [vmem:[%s7556_s3 + $0x58] sm:$0xff] %v5124_v42   ;;  %v6030_v47 = vpop.eup %6029  ;;  %6035 = vtanh.f32 %v3284_v46  ;;  %v5022_v38 = vld [vmem:[%s7555_s0 + $0x2b0] sm:$0xff] }
 0x154   :  { %5748 = vst [vmem:[%s7556_s3 + $0x158] sm:$0xff] %v5284_v43   ;;  %6037 = vtanh.f32 %v3348_v48  ;;  %v5054_v39 = vld [vmem:[%s7555_s0 + $0x3b0] sm:$0xff] }
 0x156   :  { %v2225_v49 = vpop.f32.mrf.mxu2  ;;  %v2385_v50 = vpop.f32.mrf.mxu3 }
 0x157   :  { %v6032_v51 = vpop.eup %6031  ;;  %v1907_v52 = vpop.f32.mrf.mxu0  ;;  %v3412_v59 = vadd.f32 %v6928_v12, %v2225_v49  ;;  %v3476_v60 = vadd.f32 %v6928_v12, %v2385_v50 }
 0x158   :  { %v2067_v53 = vpop.f32.mrf.mxu1  ;;  %v6034_v54 = vpop.eup %6033  ;;  %v5444_v55 = vpack.c.bf16 %v6032_v51, %v6028_v45  ;;  %v3285_v56 = vadd.f32 %v6928_v12, %v1907_v52 }
 0x159   :  { %v3349_v57 = vadd.f32 %v6928_v12, %v2067_v53  ;;  %v5604_v58 = vpack.c.bf16 %v6034_v54, %v6030_v47  ;;  %v6036_v1 = vpop.eup %6035 }
 0x15a   :  { %5780 = vst [vmem:[%s7556_s3 + $0x258] sm:$0xff] %v5444_v55   ;;  %6039 = vtanh.f32 %v3285_v56  ;;  %v6038_v8 = vpop.eup %6037 }
 0x15b   :  { %5812 = vst [vmem:[%s7556_s3 + $0x358] sm:$0xff] %v5604_v58   ;;  %6041 = vtanh.f32 %v3349_v57 }
 0x15c   :  { %6043 = vtanh.f32 %v3412_v59 }
 0x15d   :  { %6045 = vtanh.f32 %v3476_v60 }
 0x15e   :  { %v2227_v61 = vpop.f32.mrf.mxu2  ;;  %v2387_v62 = vpop.f32.mrf.mxu3 }
 0x15f   :  { %v3413_v2 = vadd.f32 %v6928_v12, %v2227_v61  ;;  %v3477_v3 = vadd.f32 %v6928_v12, %v2387_v62  ;;  %v1910_v4 = vpop.f32.mrf.mxu0 }
 0x160   :  { %v2070_v5 = vpop.f32.mrf.mxu1  ;;  %v6040_v9 = vpop.eup %6039  ;;  %v3286_v14 = vadd.f32 %v6928_v12, %v1910_v4 }
 0x161   :  { %6047 = vtanh.f32 %v3413_v2  ;;  %v6042_v10 = vpop.eup %6041  ;;  %v5129_v44 = vpack.c.bf16 %v6040_v9, %v6036_v1  ;;  %v3350_v16 = vadd.f32 %v6928_v12, %v2070_v5  ;;  %v4991_v1 = vld [vmem:[%s7555_s0 + $0x1b8] sm:$0xff] }
 0x162   :  { %6049 = vtanh.f32 %v3477_v3  ;;  %4829 = vmatmul.msk.bf16.gmra.mxu0 %vm1447_vm1, %v4957_v63  ;;  %4861 = vmatmul.msk.bf16.gmra.mxu1 %vm1447_vm1, %v4989_v0  ;;  %v5289_v11 = vpack.c.bf16 %v6042_v10, %v6038_v8  ;;  %v6044_v13 = vpop.eup %6043  ;;  %v4959_v0 = vld [vmem:[%s7555_s0 + $0xb8] sm:$0xff] }
 0x163   :  { %4893 = vmatmul.msk.bf16.gmra.mxu2 %vm1447_vm1, %v5021_v6  ;;  %4925 = vmatmul.msk.bf16.gmra.mxu3 %vm1447_vm1, %v5053_v7  ;;  %5717 = vst [vmem:[%s7556_s3 + $0x60] sm:$0xff] %v5129_v44   ;;  %v6046_v15 = vpop.eup %6045  ;;  %6051 = vtanh.f32 %v3286_v14  ;;  %v5023_v7 = vld [vmem:[%s7555_s0 + $0x2b8] sm:$0xff] }
 0x164   :  { %5749 = vst [vmem:[%s7556_s3 + $0x160] sm:$0xff] %v5289_v11   ;;  %6053 = vtanh.f32 %v3350_v16  ;;  %v5055_v8 = vld [vmem:[%s7555_s0 + $0x3b8] sm:$0xff] }
 0x166   :  { %v2230_v17 = vpop.f32.mrf.mxu2  ;;  %v2390_v18 = vpop.f32.mrf.mxu3 }
 0x167   :  { %v6048_v19 = vpop.eup %6047  ;;  %v1912_v20 = vpop.f32.mrf.mxu0  ;;  %v3414_v27 = vadd.f32 %v6928_v12, %v2230_v17  ;;  %v3478_v28 = vadd.f32 %v6928_v12, %v2390_v18 }
 0x168   :  { %v2072_v21 = vpop.f32.mrf.mxu1  ;;  %v6050_v22 = vpop.eup %6049  ;;  %v5449_v23 = vpack.c.bf16 %v6048_v19, %v6044_v13  ;;  %v3287_v24 = vadd.f32 %v6928_v12, %v1912_v20 }
 0x169   :  { %v3351_v25 = vadd.f32 %v6928_v12, %v2072_v21  ;;  %v5609_v26 = vpack.c.bf16 %v6050_v22, %v6046_v15  ;;  %v6052_v33 = vpop.eup %6051 }
 0x16a   :  { %5781 = vst [vmem:[%s7556_s3 + $0x260] sm:$0xff] %v5449_v23   ;;  %6055 = vtanh.f32 %v3287_v24  ;;  %v6054_v40 = vpop.eup %6053 }
 0x16b   :  { %5813 = vst [vmem:[%s7556_s3 + $0x360] sm:$0xff] %v5609_v26   ;;  %6057 = vtanh.f32 %v3351_v25 }
 0x16c   :  { %6059 = vtanh.f32 %v3414_v27 }
 0x16d   :  { %6061 = vtanh.f32 %v3478_v28 }
 0x16e   :  { %v2232_v29 = vpop.f32.mrf.mxu2  ;;  %v2392_v30 = vpop.f32.mrf.mxu3 }
 0x16f   :  { %v3415_v34 = vadd.f32 %v6928_v12, %v2232_v29  ;;  %v3479_v35 = vadd.f32 %v6928_v12, %v2392_v30  ;;  %v1915_v36 = vpop.f32.mrf.mxu0 }
 0x170   :  { %v2075_v37 = vpop.f32.mrf.mxu1  ;;  %v6056_v41 = vpop.eup %6055  ;;  %v3288_v47 = vadd.f32 %v6928_v12, %v1915_v36 }
 0x171   :  { %6063 = vtanh.f32 %v3415_v34  ;;  %v6058_v42 = vpop.eup %6057  ;;  %v5134_v43 = vpack.c.bf16 %v6056_v41, %v6052_v33  ;;  %v3352_v49 = vadd.f32 %v6928_v12, %v2075_v37  ;;  %v4992_v33 = vld [vmem:[%s7555_s0 + $0x1c0] sm:$0xff] }
 0x172   :  { %6065 = vtanh.f32 %v3479_v35  ;;  %4830 = vmatmul.msk.bf16.gmra.mxu0 %vm1447_vm1, %v4958_v31  ;;  %4862 = vmatmul.msk.bf16.gmra.mxu1 %vm1447_vm1, %v4990_v32  ;;  %v5294_v45 = vpack.c.bf16 %v6058_v42, %v6054_v40  ;;  %v6060_v46 = vpop.eup %6059  ;;  %v4960_v32 = vld [vmem:[%s7555_s0 + $0xc0] sm:$0xff] }
 0x173   :  { %4894 = vmatmul.msk.bf16.gmra.mxu2 %vm1447_vm1, %v5022_v38  ;;  %4926 = vmatmul.msk.bf16.gmra.mxu3 %vm1447_vm1, %v5054_v39  ;;  %5718 = vst [vmem:[%s7556_s3 + $0x68] sm:$0xff] %v5134_v43   ;;  %v6062_v48 = vpop.eup %6061  ;;  %6067 = vtanh.f32 %v3288_v47  ;;  %v5024_v39 = vld [vmem:[%s7555_s0 + $0x2c0] sm:$0xff] }
 0x174   :  { %5750 = vst [vmem:[%s7556_s3 + $0x168] sm:$0xff] %v5294_v45   ;;  %6069 = vtanh.f32 %v3352_v49  ;;  %v5056_v40 = vld [vmem:[%s7555_s0 + $0x3c0] sm:$0xff] }
 0x176   :  { %v2235_v50 = vpop.f32.mrf.mxu2  ;;  %v2395_v51 = vpop.f32.mrf.mxu3 }
 0x177   :  { %v6064_v52 = vpop.eup %6063  ;;  %v1917_v53 = vpop.f32.mrf.mxu0  ;;  %v3416_v60 = vadd.f32 %v6928_v12, %v2235_v50  ;;  %v3480_v61 = vadd.f32 %v6928_v12, %v2395_v51 }
 0x178   :  { %v2077_v54 = vpop.f32.mrf.mxu1  ;;  %v6066_v55 = vpop.eup %6065  ;;  %v5454_v56 = vpack.c.bf16 %v6064_v52, %v6060_v46  ;;  %v3289_v57 = vadd.f32 %v6928_v12, %v1917_v53 }
 0x179   :  { %v3353_v58 = vadd.f32 %v6928_v12, %v2077_v54  ;;  %v5614_v59 = vpack.c.bf16 %v6066_v55, %v6062_v48  ;;  %v6068_v2 = vpop.eup %6067 }
 0x17a   :  { %5782 = vst [vmem:[%s7556_s3 + $0x268] sm:$0xff] %v5454_v56   ;;  %6071 = vtanh.f32 %v3289_v57  ;;  %v6070_v9 = vpop.eup %6069 }
 0x17b   :  { %5814 = vst [vmem:[%s7556_s3 + $0x368] sm:$0xff] %v5614_v59   ;;  %6073 = vtanh.f32 %v3353_v58 }
 0x17c   :  { %6075 = vtanh.f32 %v3416_v60 }
 0x17d   :  { %6077 = vtanh.f32 %v3480_v61 }
 0x17e   :  { %v2237_v62 = vpop.f32.mrf.mxu2  ;;  %v2397_v63 = vpop.f32.mrf.mxu3 }
 0x17f   :  { %v3417_v3 = vadd.f32 %v6928_v12, %v2237_v62  ;;  %v3481_v4 = vadd.f32 %v6928_v12, %v2397_v63  ;;  %v1920_v5 = vpop.f32.mrf.mxu0 }
 0x180   :  { %v2080_v6 = vpop.f32.mrf.mxu1  ;;  %v6072_v10 = vpop.eup %6071  ;;  %v3290_v15 = vadd.f32 %v6928_v12, %v1920_v5 }
 0x181   :  { %6079 = vtanh.f32 %v3417_v3  ;;  %v6074_v44 = vpop.eup %6073  ;;  %v5139_v11 = vpack.c.bf16 %v6072_v10, %v6068_v2  ;;  %v3354_v17 = vadd.f32 %v6928_v12, %v2080_v6  ;;  %v4993_v2 = vld [vmem:[%s7555_s0 + $0x1c8] sm:$0xff] }
 0x182   :  { %6081 = vtanh.f32 %v3481_v4  ;;  %4831 = vmatmul.msk.bf16.gmra.mxu0 %vm1447_vm1, %v4959_v0  ;;  %4863 = vmatmul.msk.bf16.gmra.mxu1 %vm1447_vm1, %v4991_v1  ;;  %v5299_v13 = vpack.c.bf16 %v6074_v44, %v6070_v9  ;;  %v6076_v14 = vpop.eup %6075  ;;  %v4961_v1 = vld [vmem:[%s7555_s0 + $0xc8] sm:$0xff] }
 0x183   :  { %4895 = vmatmul.msk.bf16.gmra.mxu2 %vm1447_vm1, %v5023_v7  ;;  %4927 = vmatmul.msk.bf16.gmra.mxu3 %vm1447_vm1, %v5055_v8  ;;  %5719 = vst [vmem:[%s7556_s3 + $0x70] sm:$0xff] %v5139_v11   ;;  %v6078_v16 = vpop.eup %6077  ;;  %6083 = vtanh.f32 %v3290_v15  ;;  %v5025_v8 = vld [vmem:[%s7555_s0 + $0x2c8] sm:$0xff] }
 0x184   :  { %5751 = vst [vmem:[%s7556_s3 + $0x170] sm:$0xff] %v5299_v13   ;;  %6085 = vtanh.f32 %v3354_v17  ;;  %v5057_v9 = vld [vmem:[%s7555_s0 + $0x3c8] sm:$0xff] }
 0x186   :  { %v2240_v18 = vpop.f32.mrf.mxu2  ;;  %v2400_v19 = vpop.f32.mrf.mxu3 }
 0x187   :  { %v6080_v20 = vpop.eup %6079  ;;  %v1922_v21 = vpop.f32.mrf.mxu0  ;;  %v3418_v28 = vadd.f32 %v6928_v12, %v2240_v18  ;;  %v3482_v29 = vadd.f32 %v6928_v12, %v2400_v19 }
 0x188   :  { %v2082_v22 = vpop.f32.mrf.mxu1  ;;  %v6082_v23 = vpop.eup %6081  ;;  %v5459_v24 = vpack.c.bf16 %v6080_v20, %v6076_v14  ;;  %v3291_v25 = vadd.f32 %v6928_v12, %v1922_v21 }
 0x189   :  { %v3355_v26 = vadd.f32 %v6928_v12, %v2082_v22  ;;  %v5619_v27 = vpack.c.bf16 %v6082_v23, %v6078_v16  ;;  %v6084_v34 = vpop.eup %6083 }
 0x18a   :  { %5783 = vst [vmem:[%s7556_s3 + $0x270] sm:$0xff] %v5459_v24   ;;  %6087 = vtanh.f32 %v3291_v25  ;;  %v6086_v41 = vpop.eup %6085 }
 0x18b   :  { %5815 = vst [vmem:[%s7556_s3 + $0x370] sm:$0xff] %v5619_v27   ;;  %6089 = vtanh.f32 %v3355_v26 }
 0x18c   :  { %6091 = vtanh.f32 %v3418_v28 }
 0x18d   :  { %6093 = vtanh.f32 %v3482_v29 }
 0x18e   :  { %v2242_v30 = vpop.f32.mrf.mxu2  ;;  %v2402_v31 = vpop.f32.mrf.mxu3 }
 0x18f   :  { %v3419_v35 = vadd.f32 %v6928_v12, %v2242_v30  ;;  %v3483_v36 = vadd.f32 %v6928_v12, %v2402_v31  ;;  %v1925_v37 = vpop.f32.mrf.mxu0 }
 0x190   :  { %v2085_v38 = vpop.f32.mrf.mxu1  ;;  %v6088_v42 = vpop.eup %6087  ;;  %v3292_v48 = vadd.f32 %v6928_v12, %v1925_v37 }
 0x191   :  { %6095 = vtanh.f32 %v3419_v35  ;;  %v6090_v43 = vpop.eup %6089  ;;  %v5144_v45 = vpack.c.bf16 %v6088_v42, %v6084_v34  ;;  %v3356_v50 = vadd.f32 %v6928_v12, %v2085_v38  ;;  %v4994_v34 = vld [vmem:[%s7555_s0 + $0x1d0] sm:$0xff] }
 0x192   :  { %6097 = vtanh.f32 %v3483_v36  ;;  %4832 = vmatmul.msk.bf16.gmra.mxu0 %vm1447_vm1, %v4960_v32  ;;  %4864 = vmatmul.msk.bf16.gmra.mxu1 %vm1447_vm1, %v4992_v33  ;;  %v5304_v46 = vpack.c.bf16 %v6090_v43, %v6086_v41  ;;  %v6092_v47 = vpop.eup %6091  ;;  %v4962_v33 = vld [vmem:[%s7555_s0 + $0xd0] sm:$0xff] }
 0x193   :  { %4896 = vmatmul.msk.bf16.gmra.mxu2 %vm1447_vm1, %v5024_v39  ;;  %4928 = vmatmul.msk.bf16.gmra.mxu3 %vm1447_vm1, %v5056_v40  ;;  %5720 = vst [vmem:[%s7556_s3 + $0x78] sm:$0xff] %v5144_v45   ;;  %v6094_v49 = vpop.eup %6093  ;;  %6099 = vtanh.f32 %v3292_v48  ;;  %v5026_v40 = vld [vmem:[%s7555_s0 + $0x2d0] sm:$0xff] }
 0x194   :  { %5752 = vst [vmem:[%s7556_s3 + $0x178] sm:$0xff] %v5304_v46   ;;  %6101 = vtanh.f32 %v3356_v50  ;;  %v5058_v41 = vld [vmem:[%s7555_s0 + $0x3d0] sm:$0xff] }
 0x196   :  { %v2245_v51 = vpop.f32.mrf.mxu2  ;;  %v2405_v52 = vpop.f32.mrf.mxu3 }
 0x197   :  { %v6096_v53 = vpop.eup %6095  ;;  %v1927_v54 = vpop.f32.mrf.mxu0  ;;  %v3420_v61 = vadd.f32 %v6928_v12, %v2245_v51  ;;  %v3484_v62 = vadd.f32 %v6928_v12, %v2405_v52 }
 0x198   :  { %v2087_v55 = vpop.f32.mrf.mxu1  ;;  %v6098_v56 = vpop.eup %6097  ;;  %v5464_v57 = vpack.c.bf16 %v6096_v53, %v6092_v47  ;;  %v3293_v58 = vadd.f32 %v6928_v12, %v1927_v54 }
 0x199   :  { %v3357_v59 = vadd.f32 %v6928_v12, %v2087_v55  ;;  %v5624_v60 = vpack.c.bf16 %v6098_v56, %v6094_v49  ;;  %v6100_v3 = vpop.eup %6099 }
 0x19a   :  { %5784 = vst [vmem:[%s7556_s3 + $0x278] sm:$0xff] %v5464_v57   ;;  %6103 = vtanh.f32 %v3293_v58  ;;  %v6102_v10 = vpop.eup %6101 }
 0x19b   :  { %5816 = vst [vmem:[%s7556_s3 + $0x378] sm:$0xff] %v5624_v60   ;;  %6105 = vtanh.f32 %v3357_v59 }
 0x19c   :  { %6107 = vtanh.f32 %v3420_v61 }
 0x19d   :  { %6109 = vtanh.f32 %v3484_v62 }
 0x19e   :  { %v2247_v63 = vpop.f32.mrf.mxu2  ;;  %v2407_v0 = vpop.f32.mrf.mxu3 }
 0x19f   :  { %v3421_v4 = vadd.f32 %v6928_v12, %v2247_v63  ;;  %v3485_v5 = vadd.f32 %v6928_v12, %v2407_v0  ;;  %v1930_v6 = vpop.f32.mrf.mxu0 }
 0x1a0   :  { %v2090_v7 = vpop.f32.mrf.mxu1  ;;  %v6104_v44 = vpop.eup %6103  ;;  %v3294_v16 = vadd.f32 %v6928_v12, %v1930_v6 }
 0x1a1   :  { %6111 = vtanh.f32 %v3421_v4  ;;  %v6106_v11 = vpop.eup %6105  ;;  %v5149_v13 = vpack.c.bf16 %v6104_v44, %v6100_v3  ;;  %v3358_v18 = vadd.f32 %v6928_v12, %v2090_v7  ;;  %v4995_v3 = vld [vmem:[%s7555_s0 + $0x1d8] sm:$0xff] }
 0x1a2   :  { %6113 = vtanh.f32 %v3485_v5  ;;  %4833 = vmatmul.msk.bf16.gmra.mxu0 %vm1447_vm1, %v4961_v1  ;;  %4865 = vmatmul.msk.bf16.gmra.mxu1 %vm1447_vm1, %v4993_v2  ;;  %v5309_v14 = vpack.c.bf16 %v6106_v11, %v6102_v10  ;;  %v6108_v15 = vpop.eup %6107  ;;  %v4963_v2 = vld [vmem:[%s7555_s0 + $0xd8] sm:$0xff] }
 0x1a3   :  { %4897 = vmatmul.msk.bf16.gmra.mxu2 %vm1447_vm1, %v5025_v8  ;;  %4929 = vmatmul.msk.bf16.gmra.mxu3 %vm1447_vm1, %v5057_v9  ;;  %5721 = vst [vmem:[%s7556_s3 + $0x80] sm:$0xff] %v5149_v13   ;;  %v6110_v17 = vpop.eup %6109  ;;  %6115 = vtanh.f32 %v3294_v16  ;;  %v5027_v9 = vld [vmem:[%s7555_s0 + $0x2d8] sm:$0xff] }
 0x1a4   :  { %5753 = vst [vmem:[%s7556_s3 + $0x180] sm:$0xff] %v5309_v14   ;;  %6117 = vtanh.f32 %v3358_v18  ;;  %v5059_v10 = vld [vmem:[%s7555_s0 + $0x3d8] sm:$0xff] }
 0x1a6   :  { %v2250_v19 = vpop.f32.mrf.mxu2  ;;  %v2410_v20 = vpop.f32.mrf.mxu3 }
 0x1a7   :  { %v6112_v21 = vpop.eup %6111  ;;  %v1932_v22 = vpop.f32.mrf.mxu0  ;;  %v3422_v29 = vadd.f32 %v6928_v12, %v2250_v19  ;;  %v3486_v30 = vadd.f32 %v6928_v12, %v2410_v20 }
 0x1a8   :  { %v2092_v23 = vpop.f32.mrf.mxu1  ;;  %v6114_v24 = vpop.eup %6113  ;;  %v5469_v25 = vpack.c.bf16 %v6112_v21, %v6108_v15  ;;  %v3295_v26 = vadd.f32 %v6928_v12, %v1932_v22 }
 0x1a9   :  { %v3359_v27 = vadd.f32 %v6928_v12, %v2092_v23  ;;  %v5629_v28 = vpack.c.bf16 %v6114_v24, %v6110_v17  ;;  %v6116_v35 = vpop.eup %6115 }
 0x1aa   :  { %5785 = vst [vmem:[%s7556_s3 + $0x280] sm:$0xff] %v5469_v25   ;;  %6119 = vtanh.f32 %v3295_v26  ;;  %v6118_v42 = vpop.eup %6117 }
 0x1ab   :  { %5817 = vst [vmem:[%s7556_s3 + $0x380] sm:$0xff] %v5629_v28   ;;  %6121 = vtanh.f32 %v3359_v27 }
 0x1ac   :  { %6123 = vtanh.f32 %v3422_v29 }
 0x1ad   :  { %6125 = vtanh.f32 %v3486_v30 }
 0x1ae   :  { %v2252_v31 = vpop.f32.mrf.mxu2  ;;  %v2412_v32 = vpop.f32.mrf.mxu3 }
 0x1af   :  { %v3423_v36 = vadd.f32 %v6928_v12, %v2252_v31  ;;  %v3487_v37 = vadd.f32 %v6928_v12, %v2412_v32  ;;  %v1935_v38 = vpop.f32.mrf.mxu0 }
 0x1b0   :  { %v2095_v39 = vpop.f32.mrf.mxu1  ;;  %v6120_v43 = vpop.eup %6119  ;;  %v3296_v49 = vadd.f32 %v6928_v12, %v1935_v38 }
 0x1b1   :  { %6127 = vtanh.f32 %v3423_v36  ;;  %v6122_v45 = vpop.eup %6121  ;;  %v5154_v46 = vpack.c.bf16 %v6120_v43, %v6116_v35  ;;  %v3360_v51 = vadd.f32 %v6928_v12, %v2095_v39  ;;  %v4996_v35 = vld [vmem:[%s7555_s0 + $0x1e0] sm:$0xff] }
 0x1b2   :  { %6129 = vtanh.f32 %v3487_v37  ;;  %4834 = vmatmul.msk.bf16.gmra.mxu0 %vm1447_vm1, %v4962_v33  ;;  %4866 = vmatmul.msk.bf16.gmra.mxu1 %vm1447_vm1, %v4994_v34  ;;  %v5314_v47 = vpack.c.bf16 %v6122_v45, %v6118_v42  ;;  %v6124_v48 = vpop.eup %6123  ;;  %v4964_v34 = vld [vmem:[%s7555_s0 + $0xe0] sm:$0xff] }
 0x1b3   :  { %4898 = vmatmul.msk.bf16.gmra.mxu2 %vm1447_vm1, %v5026_v40  ;;  %4930 = vmatmul.msk.bf16.gmra.mxu3 %vm1447_vm1, %v5058_v41  ;;  %5722 = vst [vmem:[%s7556_s3 + $0x88] sm:$0xff] %v5154_v46   ;;  %v6126_v50 = vpop.eup %6125  ;;  %6131 = vtanh.f32 %v3296_v49  ;;  %v5028_v41 = vld [vmem:[%s7555_s0 + $0x2e0] sm:$0xff] }
 0x1b4   :  { %5754 = vst [vmem:[%s7556_s3 + $0x188] sm:$0xff] %v5314_v47   ;;  %6133 = vtanh.f32 %v3360_v51  ;;  %v5060_v42 = vld [vmem:[%s7555_s0 + $0x3e0] sm:$0xff] }
 0x1b6   :  { %v2255_v52 = vpop.f32.mrf.mxu2  ;;  %v2415_v53 = vpop.f32.mrf.mxu3 }
 0x1b7   :  { %v6128_v54 = vpop.eup %6127  ;;  %v1937_v55 = vpop.f32.mrf.mxu0  ;;  %v3424_v62 = vadd.f32 %v6928_v12, %v2255_v52  ;;  %v3488_v63 = vadd.f32 %v6928_v12, %v2415_v53 }
 0x1b8   :  { %v2097_v56 = vpop.f32.mrf.mxu1  ;;  %v6130_v57 = vpop.eup %6129  ;;  %v5474_v58 = vpack.c.bf16 %v6128_v54, %v6124_v48  ;;  %v3297_v59 = vadd.f32 %v6928_v12, %v1937_v55 }
 0x1b9   :  { %v3361_v60 = vadd.f32 %v6928_v12, %v2097_v56  ;;  %v5634_v61 = vpack.c.bf16 %v6130_v57, %v6126_v50  ;;  %v6132_v4 = vpop.eup %6131 }
 0x1ba   :  { %5786 = vst [vmem:[%s7556_s3 + $0x288] sm:$0xff] %v5474_v58   ;;  %6135 = vtanh.f32 %v3297_v59  ;;  %v6134_v44 = vpop.eup %6133 }
 0x1bb   :  { %5818 = vst [vmem:[%s7556_s3 + $0x388] sm:$0xff] %v5634_v61   ;;  %6137 = vtanh.f32 %v3361_v60 }
 0x1bc   :  { %6139 = vtanh.f32 %v3424_v62 }
 0x1bd   :  { %6141 = vtanh.f32 %v3488_v63 }
 0x1be   :  { %v2257_v0 = vpop.f32.mrf.mxu2  ;;  %v2417_v1 = vpop.f32.mrf.mxu3 }
 0x1bf   :  { %v3425_v5 = vadd.f32 %v6928_v12, %v2257_v0  ;;  %v3489_v6 = vadd.f32 %v6928_v12, %v2417_v1  ;;  %v1940_v7 = vpop.f32.mrf.mxu0 }
 0x1c0   :  { %v2100_v8 = vpop.f32.mrf.mxu1  ;;  %v6136_v11 = vpop.eup %6135  ;;  %v3298_v17 = vadd.f32 %v6928_v12, %v1940_v7 }
 0x1c1   :  { %6143 = vtanh.f32 %v3425_v5  ;;  %v6138_v13 = vpop.eup %6137  ;;  %v5159_v14 = vpack.c.bf16 %v6136_v11, %v6132_v4  ;;  %v3362_v19 = vadd.f32 %v6928_v12, %v2100_v8  ;;  %v4997_v4 = vld [vmem:[%s7555_s0 + $0x1e8] sm:$0xff] }
 0x1c2   :  { %6145 = vtanh.f32 %v3489_v6  ;;  %4835 = vmatmul.msk.bf16.gmra.mxu0 %vm1447_vm1, %v4963_v2  ;;  %4867 = vmatmul.msk.bf16.gmra.mxu1 %vm1447_vm1, %v4995_v3  ;;  %v5319_v15 = vpack.c.bf16 %v6138_v13, %v6134_v44  ;;  %v6140_v16 = vpop.eup %6139  ;;  %v4965_v3 = vld [vmem:[%s7555_s0 + $0xe8] sm:$0xff] }
 0x1c3   :  { %4899 = vmatmul.msk.bf16.gmra.mxu2 %vm1447_vm1, %v5027_v9  ;;  %4931 = vmatmul.msk.bf16.gmra.mxu3 %vm1447_vm1, %v5059_v10  ;;  %5723 = vst [vmem:[%s7556_s3 + $0x90] sm:$0xff] %v5159_v14   ;;  %v6142_v18 = vpop.eup %6141  ;;  %6147 = vtanh.f32 %v3298_v17  ;;  %v5029_v10 = vld [vmem:[%s7555_s0 + $0x2e8] sm:$0xff] }
 0x1c4   :  { %5755 = vst [vmem:[%s7556_s3 + $0x190] sm:$0xff] %v5319_v15   ;;  %6149 = vtanh.f32 %v3362_v19  ;;  %v5061_v44 = vld [vmem:[%s7555_s0 + $0x3e8] sm:$0xff] }
 0x1c6   :  { %v2260_v20 = vpop.f32.mrf.mxu2  ;;  %v2420_v21 = vpop.f32.mrf.mxu3 }
 0x1c7   :  { %v6144_v22 = vpop.eup %6143  ;;  %v1942_v23 = vpop.f32.mrf.mxu0  ;;  %v3426_v30 = vadd.f32 %v6928_v12, %v2260_v20  ;;  %v3490_v31 = vadd.f32 %v6928_v12, %v2420_v21 }
 0x1c8   :  { %v2102_v24 = vpop.f32.mrf.mxu1  ;;  %v6146_v25 = vpop.eup %6145  ;;  %v5479_v26 = vpack.c.bf16 %v6144_v22, %v6140_v16  ;;  %v3299_v27 = vadd.f32 %v6928_v12, %v1942_v23 }
 0x1c9   :  { %v3363_v28 = vadd.f32 %v6928_v12, %v2102_v24  ;;  %v5639_v29 = vpack.c.bf16 %v6146_v25, %v6142_v18  ;;  %v6148_v36 = vpop.eup %6147 }
 0x1ca   :  { %5787 = vst [vmem:[%s7556_s3 + $0x290] sm:$0xff] %v5479_v26   ;;  %6151 = vtanh.f32 %v3299_v27  ;;  %v6150_v43 = vpop.eup %6149 }
 0x1cb   :  { %5819 = vst [vmem:[%s7556_s3 + $0x390] sm:$0xff] %v5639_v29   ;;  %6153 = vtanh.f32 %v3363_v28 }
 0x1cc   :  { %6155 = vtanh.f32 %v3426_v30 }
 0x1cd   :  { %6157 = vtanh.f32 %v3490_v31 }
 0x1ce   :  { %v2262_v32 = vpop.f32.mrf.mxu2  ;;  %v2422_v33 = vpop.f32.mrf.mxu3 }
 0x1cf   :  { %v3427_v37 = vadd.f32 %v6928_v12, %v2262_v32  ;;  %v3491_v38 = vadd.f32 %v6928_v12, %v2422_v33  ;;  %v1945_v39 = vpop.f32.mrf.mxu0 }
 0x1d0   :  { %v2105_v40 = vpop.f32.mrf.mxu1  ;;  %v6152_v45 = vpop.eup %6151  ;;  %v3300_v50 = vadd.f32 %v6928_v12, %v1945_v39 }
 0x1d1   :  { %6159 = vtanh.f32 %v3427_v37  ;;  %v6154_v46 = vpop.eup %6153  ;;  %v5164_v47 = vpack.c.bf16 %v6152_v45, %v6148_v36  ;;  %v3364_v52 = vadd.f32 %v6928_v12, %v2105_v40  ;;  %v4998_v36 = vld [vmem:[%s7555_s0 + $0x1f0] sm:$0xff] }
 0x1d2   :  { %6161 = vtanh.f32 %v3491_v38  ;;  %4836 = vmatmul.msk.bf16.gmra.mxu0 %vm1447_vm1, %v4964_v34  ;;  %4868 = vmatmul.msk.bf16.gmra.mxu1 %vm1447_vm1, %v4996_v35  ;;  %v5324_v48 = vpack.c.bf16 %v6154_v46, %v6150_v43  ;;  %v6156_v49 = vpop.eup %6155  ;;  %v4966_v35 = vld [vmem:[%s7555_s0 + $0xf0] sm:$0xff] }
 0x1d3   :  { %4900 = vmatmul.msk.bf16.gmra.mxu2 %vm1447_vm1, %v5028_v41  ;;  %4932 = vmatmul.msk.bf16.gmra.mxu3 %vm1447_vm1, %v5060_v42  ;;  %5724 = vst [vmem:[%s7556_s3 + $0x98] sm:$0xff] %v5164_v47   ;;  %v6158_v51 = vpop.eup %6157  ;;  %6163 = vtanh.f32 %v3300_v50  ;;  %v5030_v42 = vld [vmem:[%s7555_s0 + $0x2f0] sm:$0xff]  ;;  %v7329_v50 = vld [vmem:[%s7554_s2] ss:$0 sm:$0xff] }
 0x1d4   :  { %5756 = vst [vmem:[%s7556_s3 + $0x198] sm:$0xff] %v5324_v48   ;;  %6165 = vtanh.f32 %v3364_v52  ;;  %v5062_v43 = vld [vmem:[%s7555_s0 + $0x3f0] sm:$0xff] }
 0x1d6   :  { %v2265_v53 = vpop.f32.mrf.mxu2  ;;  %v2425_v54 = vpop.f32.mrf.mxu3 }
 0x1d7   :  { %v6160_v55 = vpop.eup %6159  ;;  %v1947_v56 = vpop.f32.mrf.mxu0  ;;  %v3428_v63 = vadd.f32 %v6928_v12, %v2265_v53  ;;  %v3492_v0 = vadd.f32 %v6928_v12, %v2425_v54 }
 0x1d8   :  { %v2107_v57 = vpop.f32.mrf.mxu1  ;;  %v6162_v58 = vpop.eup %6161  ;;  %v5484_v59 = vpack.c.bf16 %v6160_v55, %v6156_v49  ;;  %v3301_v60 = vadd.f32 %v6928_v12, %v1947_v56 }
 0x1d9   :  { %v3365_v61 = vadd.f32 %v6928_v12, %v2107_v57  ;;  %v5644_v62 = vpack.c.bf16 %v6162_v58, %v6158_v51  ;;  %v6164_v5 = vpop.eup %6163 }
 0x1da   :  { %5788 = vst [vmem:[%s7556_s3 + $0x298] sm:$0xff] %v5484_v59   ;;  %6167 = vtanh.f32 %v3301_v60  ;;  %v6166_v11 = vpop.eup %6165 }
 0x1db   :  { %5820 = vst [vmem:[%s7556_s3 + $0x398] sm:$0xff] %v5644_v62   ;;  %6169 = vtanh.f32 %v3365_v61 }
 0x1dc   :  { %6171 = vtanh.f32 %v3428_v63 }
 0x1dd   :  { %6173 = vtanh.f32 %v3492_v0 }
 0x1de   :  { %v2267_v1 = vpop.f32.mrf.mxu2  ;;  %v2427_v2 = vpop.f32.mrf.mxu3 }
 0x1df   :  { %v3429_v6 = vadd.f32 %v6928_v12, %v2267_v1  ;;  %v3493_v7 = vadd.f32 %v6928_v12, %v2427_v2  ;;  %v1950_v8 = vpop.f32.mrf.mxu0 }
 0x1e0   :  { %v2110_v9 = vpop.f32.mrf.mxu1  ;;  %v6168_v13 = vpop.eup %6167  ;;  %v3302_v18 = vadd.f32 %v6928_v12, %v1950_v8 }
 0x1e1   :  { %6175 = vtanh.f32 %v3429_v6  ;;  %v6170_v14 = vpop.eup %6169  ;;  %v5169_v15 = vpack.c.bf16 %v6168_v13, %v6164_v5  ;;  %v3366_v20 = vadd.f32 %v6928_v12, %v2110_v9  ;;  %v4999_v5 = vld [vmem:[%s7555_s0 + $0x1f8] sm:$0xff] }
 0x1e2   :  { %6177 = vtanh.f32 %v3493_v7  ;;  %4837 = vmatmul.msk.bf16.gmra.mxu0 %vm1447_vm1, %v4965_v3  ;;  %4869 = vmatmul.msk.bf16.gmra.mxu1 %vm1447_vm1, %v4997_v4  ;;  %v5329_v16 = vpack.c.bf16 %v6170_v14, %v6166_v11  ;;  %v6172_v17 = vpop.eup %6171  ;;  %v4967_v4 = vld [vmem:[%s7555_s0 + $0xf8] sm:$0xff] }
 0x1e3   :  { %4901 = vmatmul.msk.bf16.gmra.mxu2 %vm1447_vm1, %v5029_v10  ;;  %4933 = vmatmul.msk.bf16.gmra.mxu3 %vm1447_vm1, %v5061_v44  ;;  %5725 = vst [vmem:[%s7556_s3 + $0xa0] sm:$0xff] %v5169_v15   ;;  %v6174_v19 = vpop.eup %6173  ;;  %6179 = vtanh.f32 %v3302_v18  ;;  %v5031_v44 = vld [vmem:[%s7555_s0 + $0x2f8] sm:$0xff] }
 0x1e4   :  { %5757 = vst [vmem:[%s7556_s3 + $0x1a0] sm:$0xff] %v5329_v16   ;;  %6181 = vtanh.f32 %v3366_v20  ;;  %v5063_v11 = vld [vmem:[%s7555_s0 + $0x3f8] sm:$0xff] }
 0x1e6   :  { %v2270_v21 = vpop.f32.mrf.mxu2  ;;  %v2430_v22 = vpop.f32.mrf.mxu3 }
 0x1e7   :  { %v6176_v23 = vpop.eup %6175  ;;  %v1952_v24 = vpop.f32.mrf.mxu0  ;;  %v3430_v31 = vadd.f32 %v6928_v12, %v2270_v21  ;;  %v3494_v32 = vadd.f32 %v6928_v12, %v2430_v22 }
 0x1e8   :  { %v2112_v25 = vpop.f32.mrf.mxu1  ;;  %v6178_v26 = vpop.eup %6177  ;;  %v5489_v27 = vpack.c.bf16 %v6176_v23, %v6172_v17  ;;  %v3303_v28 = vadd.f32 %v6928_v12, %v1952_v24 }
 0x1e9   :  { %v3367_v29 = vadd.f32 %v6928_v12, %v2112_v25  ;;  %v5649_v30 = vpack.c.bf16 %v6178_v26, %v6174_v19  ;;  %v6180_v37 = vpop.eup %6179 }
 0x1ea   :  { %5789 = vst [vmem:[%s7556_s3 + $0x2a0] sm:$0xff] %v5489_v27   ;;  %6183 = vtanh.f32 %v3303_v28  ;;  %v6182_v45 = vpop.eup %6181 }
 0x1eb   :  { %5821 = vst [vmem:[%s7556_s3 + $0x3a0] sm:$0xff] %v5649_v30   ;;  %6185 = vtanh.f32 %v3367_v29 }
 0x1ec   :  { %6187 = vtanh.f32 %v3430_v31 }
 0x1ed   :  { %6189 = vtanh.f32 %v3494_v32 }
 0x1ee   :  { %v2272_v33 = vpop.f32.mrf.mxu2  ;;  %v2432_v34 = vpop.f32.mrf.mxu3 }
 0x1ef   :  { %v3431_v38 = vadd.f32 %v6928_v12, %v2272_v33  ;;  %v3495_v39 = vadd.f32 %v6928_v12, %v2432_v34  ;;  %v1955_v40 = vpop.f32.mrf.mxu0 }
 0x1f0   :  { %v2115_v41 = vpop.f32.mrf.mxu1  ;;  %v6184_v46 = vpop.eup %6183  ;;  %v3304_v51 = vadd.f32 %v7329_v50, %v1955_v40 }
 0x1f1   :  { %6191 = vtanh.f32 %v3431_v38  ;;  %v6186_v47 = vpop.eup %6185  ;;  %v5174_v48 = vpack.c.bf16 %v6184_v46, %v6180_v37  ;;  %v3368_v53 = vadd.f32 %v7329_v50, %v2115_v41 }
 0x1f2   :  { %6193 = vtanh.f32 %v3495_v39  ;;  %4838 = vmatmul.msk.bf16.gmra.mxu0 %vm1447_vm1, %v4966_v35  ;;  %4870 = vmatmul.msk.bf16.gmra.mxu1 %vm1447_vm1, %v4998_v36  ;;  %v5334_v12 = vpack.c.bf16 %v6186_v47, %v6182_v45  ;;  %v6188_v49 = vpop.eup %6187 }
 0x1f3   :  { %4902 = vmatmul.msk.bf16.gmra.mxu2 %vm1447_vm1, %v5030_v42  ;;  %4934 = vmatmul.msk.bf16.gmra.mxu3 %vm1447_vm1, %v5062_v43  ;;  %5726 = vst [vmem:[%s7556_s3 + $0xa8] sm:$0xff] %v5174_v48   ;;  %v6190_v52 = vpop.eup %6189  ;;  %6195 = vtanh.f32 %v3304_v51 }
 0x1f4   :  { %5758 = vst [vmem:[%s7556_s3 + $0x1a8] sm:$0xff] %v5334_v12   ;;  %6197 = vtanh.f32 %v3368_v53 }
 0x1f6   :  { %v2275_v54 = vpop.f32.mrf.mxu2  ;;  %v2435_v55 = vpop.f32.mrf.mxu3 }
 0x1f7   :  { %v6192_v56 = vpop.eup %6191  ;;  %v1957_v57 = vpop.f32.mrf.mxu0  ;;  %v3432_v0 = vadd.f32 %v7329_v50, %v2275_v54  ;;  %v3496_v1 = vadd.f32 %v7329_v50, %v2435_v55 }
 0x1f8   :  { %v2117_v58 = vpop.f32.mrf.mxu1  ;;  %v6194_v59 = vpop.eup %6193  ;;  %v5494_v60 = vpack.c.bf16 %v6192_v56, %v6188_v49  ;;  %v3305_v61 = vadd.f32 %v7329_v50, %v1957_v57 }
 0x1f9   :  { %v3369_v62 = vadd.f32 %v7329_v50, %v2117_v58  ;;  %v5654_v63 = vpack.c.bf16 %v6194_v59, %v6190_v52  ;;  %v6196_v6 = vpop.eup %6195 }
 0x1fa   :  { %5790 = vst [vmem:[%s7556_s3 + $0x2a8] sm:$0xff] %v5494_v60   ;;  %6199 = vtanh.f32 %v3305_v61  ;;  %v6198_v13 = vpop.eup %6197 }
 0x1fb   :  { %5822 = vst [vmem:[%s7556_s3 + $0x3a8] sm:$0xff] %v5654_v63   ;;  %6201 = vtanh.f32 %v3369_v62 }
 0x1fc   :  { %6203 = vtanh.f32 %v3432_v0 }
 0x1fd   :  { %6205 = vtanh.f32 %v3496_v1 }
 0x1fe   :  { %v2277_v2 = vpop.f32.mrf.mxu2  ;;  %v2437_v3 = vpop.f32.mrf.mxu3 }
 0x1ff   :  { %v3433_v7 = vadd.f32 %v7329_v50, %v2277_v2  ;;  %v3497_v8 = vadd.f32 %v7329_v50, %v2437_v3  ;;  %v1960_v9 = vpop.f32.mrf.mxu0 }
 0x200   :  { %v2120_v10 = vpop.f32.mrf.mxu1  ;;  %v6200_v14 = vpop.eup %6199  ;;  %v3306_v19 = vadd.f32 %v7329_v50, %v1960_v9 }
 0x201   :  { %6207 = vtanh.f32 %v3433_v7  ;;  %v6202_v15 = vpop.eup %6201  ;;  %v5179_v16 = vpack.c.bf16 %v6200_v14, %v6196_v6  ;;  %v3370_v21 = vadd.f32 %v7329_v50, %v2120_v10 }
 0x202   :  { %6209 = vtanh.f32 %v3497_v8  ;;  %4839 = vmatmul.msk.bf16.gmra.mxu0 %vm1447_vm1, %v4967_v4  ;;  %4871 = vmatmul.msk.bf16.gmra.mxu1 %vm1447_vm1, %v4999_v5  ;;  %v5339_v17 = vpack.c.bf16 %v6202_v15, %v6198_v13  ;;  %v6204_v18 = vpop.eup %6203 }
 0x203   :  { %4903 = vmatmul.msk.bf16.gmra.mxu2 %vm1447_vm1, %v5031_v44  ;;  %4935 = vmatmul.msk.bf16.gmra.mxu3 %vm1447_vm1, %v5063_v11  ;;  %5727 = vst [vmem:[%s7556_s3 + $0xb0] sm:$0xff] %v5179_v16   ;;  %v6206_v20 = vpop.eup %6205  ;;  %6211 = vtanh.f32 %v3306_v19 }
 0x204   :  { %5759 = vst [vmem:[%s7556_s3 + $0x1b0] sm:$0xff] %v5339_v17   ;;  %6213 = vtanh.f32 %v3370_v21 }
 0x206   :  { %v2280_v22 = vpop.f32.mrf.mxu2  ;;  %v2440_v23 = vpop.f32.mrf.mxu3 }
 0x207   :  { %v6208_v24 = vpop.eup %6207  ;;  %v1962_v25 = vpop.f32.mrf.mxu0  ;;  %v3434_v32 = vadd.f32 %v7329_v50, %v2280_v22  ;;  %v3498_v33 = vadd.f32 %v7329_v50, %v2440_v23 }
 0x208   :  { %v2122_v26 = vpop.f32.mrf.mxu1  ;;  %v6210_v27 = vpop.eup %6209  ;;  %v5499_v28 = vpack.c.bf16 %v6208_v24, %v6204_v18  ;;  %v3307_v29 = vadd.f32 %v7329_v50, %v1962_v25 }
 0x209   :  { %v3371_v30 = vadd.f32 %v7329_v50, %v2122_v26  ;;  %v5659_v31 = vpack.c.bf16 %v6210_v27, %v6206_v20  ;;  %v6212_v36 = vpop.eup %6211 }
 0x20a   :  { %5791 = vst [vmem:[%s7556_s3 + $0x2b0] sm:$0xff] %v5499_v28   ;;  %6215 = vtanh.f32 %v3307_v29  ;;  %v6214_v41 = vpop.eup %6213 }
 0x20b   :  { %5823 = vst [vmem:[%s7556_s3 + $0x3b0] sm:$0xff] %v5659_v31   ;;  %6217 = vtanh.f32 %v3371_v30 }
 0x20c   :  { %6219 = vtanh.f32 %v3434_v32 }
 0x20d   :  { %6221 = vtanh.f32 %v3498_v33 }
 0x20e   :  { %v2282_v34 = vpop.f32.mrf.mxu2  ;;  %v2442_v35 = vpop.f32.mrf.mxu3 }
 0x20f   :  { %v3435_v37 = vadd.f32 %v7329_v50, %v2282_v34  ;;  %v3499_v38 = vadd.f32 %v7329_v50, %v2442_v35  ;;  %v1965_v39 = vpop.f32.mrf.mxu0 }
 0x210   :  { %v2125_v40 = vpop.f32.mrf.mxu1  ;;  %v6216_v42 = vpop.eup %6215  ;;  %v3308_v48 = vadd.f32 %v7329_v50, %v1965_v39 }
 0x211   :  { %6223 = vtanh.f32 %v3435_v37  ;;  %v6218_v43 = vpop.eup %6217  ;;  %v5184_v45 = vpack.c.bf16 %v6216_v42, %v6212_v36  ;;  %v3372_v49 = vadd.f32 %v7329_v50, %v2125_v40 }
 0x212   :  { %6225 = vtanh.f32 %v3499_v38  ;;  %v5344_v46 = vpack.c.bf16 %v6218_v43, %v6214_v41  ;;  %v6220_v47 = vpop.eup %6219 }
 0x213   :  { %5728 = vst [vmem:[%s7556_s3 + $0xb8] sm:$0xff] %v5184_v45   ;;  %v6222_v12 = vpop.eup %6221  ;;  %6227 = vtanh.f32 %v3308_v48 }
 0x214   :  { %5760 = vst [vmem:[%s7556_s3 + $0x1b8] sm:$0xff] %v5344_v46   ;;  %6229 = vtanh.f32 %v3372_v49 }
 0x216   :  { %v2285_v51 = vpop.f32.mrf.mxu2  ;;  %v2445_v52 = vpop.f32.mrf.mxu3 }
 0x217   :  { %v6224_v53 = vpop.eup %6223  ;;  %v1967_v54 = vpop.f32.mrf.mxu0  ;;  %v3436_v61 = vadd.f32 %v7329_v50, %v2285_v51  ;;  %v3500_v62 = vadd.f32 %v7329_v50, %v2445_v52 }
 0x218   :  { %v2127_v55 = vpop.f32.mrf.mxu1  ;;  %v6226_v56 = vpop.eup %6225  ;;  %v5504_v57 = vpack.c.bf16 %v6224_v53, %v6220_v47  ;;  %v3309_v58 = vadd.f32 %v7329_v50, %v1967_v54 }
 0x219   :  { %v3373_v59 = vadd.f32 %v7329_v50, %v2127_v55  ;;  %v5664_v60 = vpack.c.bf16 %v6226_v56, %v6222_v12  ;;  %v6228_v1 = vpop.eup %6227 }
 0x21a   :  { %5792 = vst [vmem:[%s7556_s3 + $0x2b8] sm:$0xff] %v5504_v57   ;;  %6231 = vtanh.f32 %v3309_v58  ;;  %v6230_v6 = vpop.eup %6229 }
 0x21b   :  { %5824 = vst [vmem:[%s7556_s3 + $0x3b8] sm:$0xff] %v5664_v60   ;;  %6233 = vtanh.f32 %v3373_v59 }
 0x21c   :  { %6235 = vtanh.f32 %v3436_v61 }
 0x21d   :  { %6237 = vtanh.f32 %v3500_v62 }
 0x21e   :  { %v2287_v63 = vpop.f32.mrf.mxu2  ;;  %v2447_v0 = vpop.f32.mrf.mxu3 }
 0x21f   :  { %v3437_v2 = vadd.f32 %v7329_v50, %v2287_v63  ;;  %v3501_v3 = vadd.f32 %v7329_v50, %v2447_v0  ;;  %v1970_v4 = vpop.f32.mrf.mxu0 }
 0x220   :  { %v2130_v5 = vpop.f32.mrf.mxu1  ;;  %v6232_v7 = vpop.eup %6231  ;;  %v3310_v11 = vadd.f32 %v7329_v50, %v1970_v4 }
 0x221   :  { %6239 = vtanh.f32 %v3437_v2  ;;  %v6234_v8 = vpop.eup %6233  ;;  %v5189_v9 = vpack.c.bf16 %v6232_v7, %v6228_v1  ;;  %v3374_v14 = vadd.f32 %v7329_v50, %v2130_v5 }
 0x222   :  { %6241 = vtanh.f32 %v3501_v3  ;;  %v5349_v10 = vpack.c.bf16 %v6234_v8, %v6230_v6  ;;  %v6236_v44 = vpop.eup %6235 }
 0x223   :  { %5729 = vst [vmem:[%s7556_s3 + $0xc0] sm:$0xff] %v5189_v9   ;;  %v6238_v13 = vpop.eup %6237  ;;  %6243 = vtanh.f32 %v3310_v11 }
 0x224   :  { %5761 = vst [vmem:[%s7556_s3 + $0x1c0] sm:$0xff] %v5349_v10   ;;  %6245 = vtanh.f32 %v3374_v14 }
 0x226   :  { %v2290_v15 = vpop.f32.mrf.mxu2  ;;  %v2450_v16 = vpop.f32.mrf.mxu3 }
 0x227   :  { %v6240_v17 = vpop.eup %6239  ;;  %v1972_v18 = vpop.f32.mrf.mxu0  ;;  %v3438_v25 = vadd.f32 %v7329_v50, %v2290_v15  ;;  %v3502_v26 = vadd.f32 %v7329_v50, %v2450_v16 }
 0x228   :  { %v2132_v19 = vpop.f32.mrf.mxu1  ;;  %v6242_v20 = vpop.eup %6241  ;;  %v5509_v21 = vpack.c.bf16 %v6240_v17, %v6236_v44  ;;  %v3311_v22 = vadd.f32 %v7329_v50, %v1972_v18 }
 0x229   :  { %v3375_v23 = vadd.f32 %v7329_v50, %v2132_v19  ;;  %v5669_v24 = vpack.c.bf16 %v6242_v20, %v6238_v13  ;;  %v6244_v29 = vpop.eup %6243 }
 0x22a   :  { %5793 = vst [vmem:[%s7556_s3 + $0x2c0] sm:$0xff] %v5509_v21   ;;  %6247 = vtanh.f32 %v3311_v22  ;;  %v6246_v34 = vpop.eup %6245 }
 0x22b   :  { %5825 = vst [vmem:[%s7556_s3 + $0x3c0] sm:$0xff] %v5669_v24   ;;  %6249 = vtanh.f32 %v3375_v23 }
 0x22c   :  { %6251 = vtanh.f32 %v3438_v25 }
 0x22d   :  { %6253 = vtanh.f32 %v3502_v26 }
 0x22e   :  { %v2292_v27 = vpop.f32.mrf.mxu2  ;;  %v2452_v28 = vpop.f32.mrf.mxu3 }
 0x22f   :  { %v3439_v30 = vadd.f32 %v7329_v50, %v2292_v27  ;;  %v3503_v31 = vadd.f32 %v7329_v50, %v2452_v28  ;;  %v1975_v32 = vpop.f32.mrf.mxu0 }
 0x230   :  { %v2135_v33 = vpop.f32.mrf.mxu1  ;;  %v6248_v35 = vpop.eup %6247  ;;  %v3312_v40 = vadd.f32 %v7329_v50, %v1975_v32 }
 0x231   :  { %6255 = vtanh.f32 %v3439_v30  ;;  %v6250_v36 = vpop.eup %6249  ;;  %v5194_v37 = vpack.c.bf16 %v6248_v35, %v6244_v29  ;;  %v3376_v42 = vadd.f32 %v7329_v50, %v2135_v33 }
 0x232   :  { %6257 = vtanh.f32 %v3503_v31  ;;  %v5354_v38 = vpack.c.bf16 %v6250_v36, %v6246_v34  ;;  %v6252_v39 = vpop.eup %6251 }
 0x233   :  { %5730 = vst [vmem:[%s7556_s3 + $0xc8] sm:$0xff] %v5194_v37   ;;  %v6254_v41 = vpop.eup %6253  ;;  %6259 = vtanh.f32 %v3312_v40 }
 0x234   :  { %5762 = vst [vmem:[%s7556_s3 + $0x1c8] sm:$0xff] %v5354_v38   ;;  %6261 = vtanh.f32 %v3376_v42 }
 0x236   :  { %v2295_v43 = vpop.f32.mrf.mxu2  ;;  %v2455_v45 = vpop.f32.mrf.mxu3 }
 0x237   :  { %v6256_v46 = vpop.eup %6255  ;;  %v1977_v47 = vpop.f32.mrf.mxu0  ;;  %v3440_v54 = vadd.f32 %v7329_v50, %v2295_v43  ;;  %v3504_v55 = vadd.f32 %v7329_v50, %v2455_v45 }
 0x238   :  { %v2137_v48 = vpop.f32.mrf.mxu1  ;;  %v6258_v12 = vpop.eup %6257  ;;  %v5514_v49 = vpack.c.bf16 %v6256_v46, %v6252_v39  ;;  %v3313_v51 = vadd.f32 %v7329_v50, %v1977_v47 }
 0x239   :  { %v3377_v52 = vadd.f32 %v7329_v50, %v2137_v48  ;;  %v5674_v53 = vpack.c.bf16 %v6258_v12, %v6254_v41  ;;  %v6260_v58 = vpop.eup %6259 }
 0x23a   :  { %5794 = vst [vmem:[%s7556_s3 + $0x2c8] sm:$0xff] %v5514_v49   ;;  %6263 = vtanh.f32 %v3313_v51  ;;  %v6262_v63 = vpop.eup %6261 }
 0x23b   :  { %5826 = vst [vmem:[%s7556_s3 + $0x3c8] sm:$0xff] %v5674_v53   ;;  %6265 = vtanh.f32 %v3377_v52 }
 0x23c   :  { %6267 = vtanh.f32 %v3440_v54 }
 0x23d   :  { %6269 = vtanh.f32 %v3504_v55 }
 0x23e   :  { %v2297_v56 = vpop.f32.mrf.mxu2  ;;  %v2457_v57 = vpop.f32.mrf.mxu3 }
 0x23f   :  { %v3441_v59 = vadd.f32 %v7329_v50, %v2297_v56  ;;  %v3505_v60 = vadd.f32 %v7329_v50, %v2457_v57  ;;  %v1980_v61 = vpop.f32.mrf.mxu0 }
 0x240   :  { %v2140_v62 = vpop.f32.mrf.mxu1  ;;  %v6264_v0 = vpop.eup %6263  ;;  %v3314_v5 = vadd.f32 %v7329_v50, %v1980_v61 }
 0x241   :  { %6271 = vtanh.f32 %v3441_v59  ;;  %v6266_v1 = vpop.eup %6265  ;;  %v5199_v2 = vpack.c.bf16 %v6264_v0, %v6260_v58  ;;  %v3378_v7 = vadd.f32 %v7329_v50, %v2140_v62 }
 0x242   :  { %6273 = vtanh.f32 %v3505_v60  ;;  %v5359_v3 = vpack.c.bf16 %v6266_v1, %v6262_v63  ;;  %v6268_v4 = vpop.eup %6267 }
 0x243   :  { %5731 = vst [vmem:[%s7556_s3 + $0xd0] sm:$0xff] %v5199_v2   ;;  %v6270_v6 = vpop.eup %6269  ;;  %6275 = vtanh.f32 %v3314_v5 }
 0x244   :  { %5763 = vst [vmem:[%s7556_s3 + $0x1d0] sm:$0xff] %v5359_v3   ;;  %6277 = vtanh.f32 %v3378_v7 }
 0x246   :  { %v2300_v8 = vpop.f32.mrf.mxu2  ;;  %v2460_v9 = vpop.f32.mrf.mxu3 }
 0x247   :  { %v6272_v10 = vpop.eup %6271  ;;  %v1982_v44 = vpop.f32.mrf.mxu0  ;;  %v3442_v18 = vadd.f32 %v7329_v50, %v2300_v8  ;;  %v3506_v19 = vadd.f32 %v7329_v50, %v2460_v9 }
 0x248   :  { %v2142_v11 = vpop.f32.mrf.mxu1  ;;  %v6274_v13 = vpop.eup %6273  ;;  %v5519_v14 = vpack.c.bf16 %v6272_v10, %v6268_v4  ;;  %v3315_v15 = vadd.f32 %v7329_v50, %v1982_v44 }
 0x249   :  { %v3379_v16 = vadd.f32 %v7329_v50, %v2142_v11  ;;  %v5679_v17 = vpack.c.bf16 %v6274_v13, %v6270_v6  ;;  %v6276_v22 = vpop.eup %6275 }
 0x24a   :  { %5795 = vst [vmem:[%s7556_s3 + $0x2d0] sm:$0xff] %v5519_v14   ;;  %6279 = vtanh.f32 %v3315_v15  ;;  %v6278_v27 = vpop.eup %6277 }
 0x24b   :  { %5827 = vst [vmem:[%s7556_s3 + $0x3d0] sm:$0xff] %v5679_v17   ;;  %6281 = vtanh.f32 %v3379_v16 }
 0x24c   :  { %6283 = vtanh.f32 %v3442_v18 }
 0x24d   :  { %6285 = vtanh.f32 %v3506_v19 }
 0x24e   :  { %v2302_v20 = vpop.f32.mrf.mxu2  ;;  %v2462_v21 = vpop.f32.mrf.mxu3 }
 0x24f   :  { %v3443_v23 = vadd.f32 %v7329_v50, %v2302_v20  ;;  %v3507_v24 = vadd.f32 %v7329_v50, %v2462_v21  ;;  %v1985_v25 = vpop.f32.mrf.mxu0 }
 0x250   :  { %v2145_v26 = vpop.f32.mrf.mxu1  ;;  %v6280_v28 = vpop.eup %6279  ;;  %v3316_v33 = vadd.f32 %v7329_v50, %v1985_v25 }
 0x251   :  { %6287 = vtanh.f32 %v3443_v23  ;;  %v6282_v29 = vpop.eup %6281  ;;  %v5204_v30 = vpack.c.bf16 %v6280_v28, %v6276_v22  ;;  %v3380_v35 = vadd.f32 %v7329_v50, %v2145_v26 }
 0x252   :  { %6289 = vtanh.f32 %v3507_v24  ;;  %v5364_v31 = vpack.c.bf16 %v6282_v29, %v6278_v27  ;;  %v6284_v32 = vpop.eup %6283 }
 0x253   :  { %5732 = vst [vmem:[%s7556_s3 + $0xd8] sm:$0xff] %v5204_v30   ;;  %v6286_v34 = vpop.eup %6285  ;;  %6291 = vtanh.f32 %v3316_v33 }
 0x254   :  { %5764 = vst [vmem:[%s7556_s3 + $0x1d8] sm:$0xff] %v5364_v31   ;;  %6293 = vtanh.f32 %v3380_v35 }
 0x256   :  { %v2305_v36 = vpop.f32.mrf.mxu2  ;;  %v2465_v37 = vpop.f32.mrf.mxu3 }
 0x257   :  { %v6288_v38 = vpop.eup %6287  ;;  %v1987_v39 = vpop.f32.mrf.mxu0  ;;  %v3444_v47 = vadd.f32 %v7329_v50, %v2305_v36  ;;  %v3508_v48 = vadd.f32 %v7329_v50, %v2465_v37 }
 0x258   :  { %v2147_v40 = vpop.f32.mrf.mxu1  ;;  %v6290_v41 = vpop.eup %6289  ;;  %v5524_v42 = vpack.c.bf16 %v6288_v38, %v6284_v32  ;;  %v3317_v43 = vadd.f32 %v7329_v50, %v1987_v39 }
 0x259   :  { %v3381_v45 = vadd.f32 %v7329_v50, %v2147_v40  ;;  %v5684_v46 = vpack.c.bf16 %v6290_v41, %v6286_v34  ;;  %v6292_v51 = vpop.eup %6291 }
 0x25a   :  { %5796 = vst [vmem:[%s7556_s3 + $0x2d8] sm:$0xff] %v5524_v42   ;;  %6295 = vtanh.f32 %v3317_v43  ;;  %v6294_v56 = vpop.eup %6293 }
 0x25b   :  { %5828 = vst [vmem:[%s7556_s3 + $0x3d8] sm:$0xff] %v5684_v46   ;;  %6297 = vtanh.f32 %v3381_v45 }
 0x25c   :  { %6299 = vtanh.f32 %v3444_v47 }
 0x25d   :  { %6301 = vtanh.f32 %v3508_v48 }
 0x25e   :  { %v2307_v12 = vpop.f32.mrf.mxu2  ;;  %v2467_v49 = vpop.f32.mrf.mxu3 }
 0x25f   :  { %v3445_v52 = vadd.f32 %v7329_v50, %v2307_v12  ;;  %v3509_v53 = vadd.f32 %v7329_v50, %v2467_v49  ;;  %v1990_v54 = vpop.f32.mrf.mxu0 }
 0x260   :  { %v2150_v55 = vpop.f32.mrf.mxu1  ;;  %v6296_v57 = vpop.eup %6295  ;;  %v3318_v62 = vadd.f32 %v7329_v50, %v1990_v54 }
 0x261   :  { %6303 = vtanh.f32 %v3445_v52  ;;  %v6298_v58 = vpop.eup %6297  ;;  %v5209_v59 = vpack.c.bf16 %v6296_v57, %v6292_v51  ;;  %v3382_v0 = vadd.f32 %v7329_v50, %v2150_v55 }
 0x262   :  { %6305 = vtanh.f32 %v3509_v53  ;;  %v5369_v60 = vpack.c.bf16 %v6298_v58, %v6294_v56  ;;  %v6300_v61 = vpop.eup %6299 }
 0x263   :  { %5733 = vst [vmem:[%s7556_s3 + $0xe0] sm:$0xff] %v5209_v59   ;;  %v6302_v63 = vpop.eup %6301  ;;  %6307 = vtanh.f32 %v3318_v62 }
 0x264   :  { %5765 = vst [vmem:[%s7556_s3 + $0x1e0] sm:$0xff] %v5369_v60   ;;  %6309 = vtanh.f32 %v3382_v0 }
 0x266   :  { %v2310_v1 = vpop.f32.mrf.mxu2  ;;  %v2470_v2 = vpop.f32.mrf.mxu3 }
 0x267   :  { %v6304_v3 = vpop.eup %6303  ;;  %v1992_v4 = vpop.f32.mrf.mxu0  ;;  %v3446_v44 = vadd.f32 %v7329_v50, %v2310_v1  ;;  %v3510_v11 = vadd.f32 %v7329_v50, %v2470_v2 }
 0x268   :  { %v2152_v5 = vpop.f32.mrf.mxu1  ;;  %v6306_v6 = vpop.eup %6305  ;;  %v5529_v7 = vpack.c.bf16 %v6304_v3, %v6300_v61  ;;  %v3319_v8 = vadd.f32 %v7329_v50, %v1992_v4 }
 0x269   :  { %v3383_v9 = vadd.f32 %v7329_v50, %v2152_v5  ;;  %v5689_v10 = vpack.c.bf16 %v6306_v6, %v6302_v63  ;;  %v6308_v15 = vpop.eup %6307 }
 0x26a   :  { %5797 = vst [vmem:[%s7556_s3 + $0x2e0] sm:$0xff] %v5529_v7   ;;  %6311 = vtanh.f32 %v3319_v8  ;;  %v6310_v20 = vpop.eup %6309 }
 0x26b   :  { %5829 = vst [vmem:[%s7556_s3 + $0x3e0] sm:$0xff] %v5689_v10   ;;  %6313 = vtanh.f32 %v3383_v9 }
 0x26c   :  { %6315 = vtanh.f32 %v3446_v44 }
 0x26d   :  { %6317 = vtanh.f32 %v3510_v11 }
 0x26e   :  { %v2312_v13 = vpop.f32.mrf.mxu2  ;;  %v2472_v14 = vpop.f32.mrf.mxu3 }
 0x26f   :  { %v3447_v16 = vadd.f32 %v7329_v50, %v2312_v13  ;;  %v3511_v17 = vadd.f32 %v7329_v50, %v2472_v14  ;;  %v1995_v18 = vpop.f32.mrf.mxu0 }
 0x270   :  { %v2155_v19 = vpop.f32.mrf.mxu1  ;;  %v6312_v21 = vpop.eup %6311  ;;  %v3320_v26 = vadd.f32 %v7329_v50, %v1995_v18 }
 0x271   :  { %6319 = vtanh.f32 %v3447_v16  ;;  %v6314_v22 = vpop.eup %6313  ;;  %v5214_v23 = vpack.c.bf16 %v6312_v21, %v6308_v15  ;;  %v3384_v28 = vadd.f32 %v7329_v50, %v2155_v19 }
 0x272   :  { %6321 = vtanh.f32 %v3511_v17  ;;  %v5374_v24 = vpack.c.bf16 %v6314_v22, %v6310_v20  ;;  %v6316_v25 = vpop.eup %6315 }
 0x273   :  { %5734 = vst [vmem:[%s7556_s3 + $0xe8] sm:$0xff] %v5214_v23   ;;  %v6318_v27 = vpop.eup %6317  ;;  %6323 = vtanh.f32 %v3320_v26 }
 0x274   :  { %5766 = vst [vmem:[%s7556_s3 + $0x1e8] sm:$0xff] %v5374_v24   ;;  %6325 = vtanh.f32 %v3384_v28 }
 0x276   :  { %v2315_v29 = vpop.f32.mrf.mxu2  ;;  %v2475_v30 = vpop.f32.mrf.mxu3 }
 0x277   :  { %v6320_v31 = vpop.eup %6319  ;;  %v1997_v32 = vpop.f32.mrf.mxu0  ;;  %v3448_v39 = vadd.f32 %v7329_v50, %v2315_v29  ;;  %v3512_v40 = vadd.f32 %v7329_v50, %v2475_v30 }
 0x278   :  { %v2157_v33 = vpop.f32.mrf.mxu1  ;;  %v6322_v34 = vpop.eup %6321  ;;  %v5534_v35 = vpack.c.bf16 %v6320_v31, %v6316_v25  ;;  %v3321_v36 = vadd.f32 %v7329_v50, %v1997_v32 }
 0x279   :  { %v3385_v37 = vadd.f32 %v7329_v50, %v2157_v33  ;;  %v5694_v38 = vpack.c.bf16 %v6322_v34, %v6318_v27  ;;  %v6324_v43 = vpop.eup %6323 }
 0x27a   :  { %5798 = vst [vmem:[%s7556_s3 + $0x2e8] sm:$0xff] %v5534_v35   ;;  %6327 = vtanh.f32 %v3321_v36  ;;  %v6326_v12 = vpop.eup %6325 }
 0x27b   :  { %5830 = vst [vmem:[%s7556_s3 + $0x3e8] sm:$0xff] %v5694_v38   ;;  %6329 = vtanh.f32 %v3385_v37 }
 0x27c   :  { %6331 = vtanh.f32 %v3448_v39 }
 0x27d   :  { %6333 = vtanh.f32 %v3512_v40 }
 0x27e   :  { %v2317_v41 = vpop.f32.mrf.mxu2  ;;  %v2477_v42 = vpop.f32.mrf.mxu3 }
 0x27f   :  { %v3449_v45 = vadd.f32 %v7329_v50, %v2317_v41  ;;  %v3513_v46 = vadd.f32 %v7329_v50, %v2477_v42  ;;  %v2000_v47 = vpop.f32.mrf.mxu0 }
 0x280   :  { %v2160_v48 = vpop.f32.mrf.mxu1  ;;  %v6328_v49 = vpop.eup %6327  ;;  %v3322_v55 = vadd.f32 %v7329_v50, %v2000_v47 }
 0x281   :  { %6335 = vtanh.f32 %v3449_v45  ;;  %v6330_v51 = vpop.eup %6329  ;;  %v5219_v52 = vpack.c.bf16 %v6328_v49, %v6324_v43  ;;  %v3386_v57 = vadd.f32 %v7329_v50, %v2160_v48 }
 0x282   :  { %6337 = vtanh.f32 %v3513_v46  ;;  %v5379_v53 = vpack.c.bf16 %v6330_v51, %v6326_v12  ;;  %v6332_v54 = vpop.eup %6331 }
 0x283   :  { %5735 = vst [vmem:[%s7556_s3 + $0xf0] sm:$0xff] %v5219_v52   ;;  %v6334_v56 = vpop.eup %6333  ;;  %6339 = vtanh.f32 %v3322_v55 }
 0x284   :  { %5767 = vst [vmem:[%s7556_s3 + $0x1f0] sm:$0xff] %v5379_v53   ;;  %6341 = vtanh.f32 %v3386_v57 }
 0x286   :  { %v2320_v58 = vpop.f32.mrf.mxu2  ;;  %v2480_v59 = vpop.f32.mrf.mxu3 }
 0x287   :  { %v6336_v60 = vpop.eup %6335  ;;  %v2002_v61 = vpop.f32.mrf.mxu0  ;;  %v3450_v4 = vadd.f32 %v7329_v50, %v2320_v58  ;;  %v3514_v5 = vadd.f32 %v7329_v50, %v2480_v59 }
 0x288   :  { %v2162_v62 = vpop.f32.mrf.mxu1  ;;  %v6338_v63 = vpop.eup %6337  ;;  %v5539_v0 = vpack.c.bf16 %v6336_v60, %v6332_v54  ;;  %v3323_v1 = vadd.f32 %v7329_v50, %v2002_v61 }
 0x289   :  { %v3387_v2 = vadd.f32 %v7329_v50, %v2162_v62  ;;  %v5699_v3 = vpack.c.bf16 %v6338_v63, %v6334_v56  ;;  %v6340_v8 = vpop.eup %6339 }
 0x28a   :  { %5799 = vst [vmem:[%s7556_s3 + $0x2f0] sm:$0xff] %v5539_v0   ;;  %6343 = vtanh.f32 %v3323_v1  ;;  %v6342_v44 = vpop.eup %6341 }
 0x28b   :  { %5831 = vst [vmem:[%s7556_s3 + $0x3f0] sm:$0xff] %v5699_v3   ;;  %6345 = vtanh.f32 %v3387_v2 }
 0x28c   :  { %6347 = vtanh.f32 %v3450_v4 }
 0x28d   :  { %6349 = vtanh.f32 %v3514_v5 }
 0x28e   :  { %v2322_v6 = vpop.f32.mrf.mxu2  ;;  %v2482_v7 = vpop.f32.mrf.mxu3 }
 0x28f   :  { %v3451_v9 = vadd.f32 %v7329_v50, %v2322_v6  ;;  %v3515_v10 = vadd.f32 %v7329_v50, %v2482_v7 }
 0x290   :  { %v6344_v11 = vpop.eup %6343 }
 0x291   :  { %6351 = vtanh.f32 %v3451_v9  ;;  %v6346_v13 = vpop.eup %6345  ;;  %v5224_v14 = vpack.c.bf16 %v6344_v11, %v6340_v8 }
 0x292   :  { %6353 = vtanh.f32 %v3515_v10  ;;  %v5384_v15 = vpack.c.bf16 %v6346_v13, %v6342_v44  ;;  %v6348_v16 = vpop.eup %6347 }
 0x293   :  { %5736 = vst [vmem:[%s7556_s3 + $0xf8] sm:$0xff] %v5224_v14   ;;  %v6350_v17 = vpop.eup %6349 }
 0x294   :  { %5768 = vst [vmem:[%s7556_s3 + $0x1f8] sm:$0xff] %v5384_v15  }
 0x297   :  { %v6352_v18 = vpop.eup %6351 }
 0x298   :  { %v6354_v50 = vpop.eup %6353  ;;  %v5544_v19 = vpack.c.bf16 %v6352_v18, %v6348_v16 }
 0x299   :  { %v5704_v20 = vpack.c.bf16 %v6354_v50, %v6350_v17 }
 0x29a   :  { %5800 = vst [vmem:[%s7556_s3 + $0x2f8] sm:$0xff] %v5544_v19  }
 0x29b   :  { %5832 = vst [vmem:[%s7556_s3 + $0x3f8] sm:$0xff] %v5704_v20  }

</bundles_post_ra>
